<compile_context>
chip_gen: v7x
topology: tpu7x:2x2x1
jax: 0.10.0
libtpu: 0.0.40
codegen_flags: <defaults>
</compile_context>

<pallas_src>
import functools

import jax
import jax.numpy as jnp
import numpy as np
from jax import lax
from jax.experimental import pallas as pl
from jax.experimental.pallas import tpu as pltpu

EPS = 1e-5
LANE = 128


def _round_up(v, m):
    return (v + m - 1) // m * m


def _vmem_limit_bytes():
    """~55% of physical VMEM (64 MiB on v7x, 128 MiB on v5e/v6e), clamped."""
    cap = None
    try:
        info = pltpu.get_tpu_info()
        cap = getattr(info, "vmem_capacity_bytes", None)
    except Exception:
        cap = None
    if not cap:
        cap = 64 * 1024 * 1024
    return int(min(max(0.55 * cap, 32 * 1024 * 1024), 100 * 1024 * 1024))


def _compiler_params():
    return pltpu.CompilerParams(dimension_semantics=("parallel",),
                                vmem_limit_bytes=_vmem_limit_bytes())


# --------------------------------- kernels ---------------------------------- #

def _stage1_kernel(xs_ref, w_ref, y_ref, s_ref, q_ref, *, stride, Ho, Wo, Ci):
    """Fused conv1 | residual-conv (pre-BN) as a single im2col matmul (K = 9*Ci).

    xs_ref: (1, Hs, Ws, stride*stride*Ci) bf16   space-to-depth'ed, spatially padded input
    w_ref : (9*Ci, 2*Co) bf16                    [conv1 | residual] weights, K-major
    y_ref : (1, Ho, Wo, 2*Co) bf16               pre-BN conv outputs
    s_ref/q_ref: (1, 1, 2*Co) f32                per-image channel sum / sum of squares
    """
    taps = []
    for kh in range(3):
        for kw in range(3):
            phase = (kh % stride) * stride + (kw % stride)
            taps.append(xs_ref[0,
                               pl.ds(kh // stride, Ho),
                               pl.ds(kw // stride, Wo),
                               pl.ds(phase * Ci, Ci)])          # (Ho, Wo, Ci) bf16
    lhs = jnp.concatenate(taps, axis=-1).reshape(Ho * Wo, 9 * Ci)
    acc = jnp.dot(lhs, w_ref[...], preferred_element_type=jnp.float32)   # (Ho*Wo, 2Co)
    c2 = acc.shape[-1]
    y_ref[...] = acc.reshape(1, Ho, Wo, c2).astype(y_ref.dtype)
    s_ref[...] = jnp.sum(acc, axis=0, keepdims=True).reshape(1, 1, c2)
    q_ref[...] = jnp.sum(acc * acc, axis=0, keepdims=True).reshape(1, 1, c2)


def _stage2_kernel(y1_ref, a1_ref, w_ref, y2_ref, s_ref, q_ref, hpad_ref,
                   *, Ho, Wo, Co):
    """BN1 + ReLU (global stats) fused with conv2 (pre-BN, single K=9*Co matmul).

    y1_ref : (1, Ho, Wo, Co) bf16   conv1 half of the stage-1 pre-BN output
    a1_ref : (2, Co) f32            rows = (scale1, shift1) of BN1
    w_ref  : (9*Co, Co) bf16
    hpad_ref: VMEM scratch (Ho+2, Wo+2, Co) bf16 -- zero-halo'd h tile for conv2
    """
    a1 = a1_ref[...]
    scale = a1[0:1, :].reshape(1, 1, Co)
    shift = a1[1:2, :].reshape(1, 1, Co)
    h = jnp.maximum(y1_ref[0].astype(jnp.float32) * scale + shift, 0.0)   # (Ho,Wo,Co)

    # Zero only the 1-wide halo border (the interior is fully overwritten below).
    zrow = jnp.zeros((1, Wo + 2, Co), jnp.bfloat16)
    zcol = jnp.zeros((Ho, 1, Co), jnp.bfloat16)
    hpad_ref[pl.ds(0, 1), :, :] = zrow
    hpad_ref[pl.ds(Ho + 1, 1), :, :] = zrow
    hpad_ref[pl.ds(1, Ho), pl.ds(0, 1), :] = zcol
    hpad_ref[pl.ds(1, Ho), pl.ds(Wo + 1, 1), :] = zcol
    hpad_ref[pl.ds(1, Ho), pl.ds(1, Wo), :] = h.astype(jnp.bfloat16)

    taps = [hpad_ref[pl.ds(kh, Ho), pl.ds(kw, Wo), :]
            for kh in range(3) for kw in range(3)]
    lhs = jnp.concatenate(taps, axis=-1).reshape(Ho * Wo, 9 * Co)
    acc = jnp.dot(lhs, w_ref[...], preferred_element_type=jnp.float32)   # (Ho*Wo, Co)
    y2_ref[...] = acc.reshape(1, Ho, Wo, Co).astype(y2_ref.dtype)
    s_ref[...] = jnp.sum(acc, axis=0, keepdims=True).reshape(1, 1, Co)
    q_ref[...] = jnp.sum(acc * acc, axis=0, keepdims=True).reshape(1, 1, Co)


def _finalize_kernel(y2_ref, yr_ref, a_ref, o_ref, *, Ho, Wo, Co):
    """out = ReLU(BN2(y2) + BN_res(y_res)); a_ref rows = (sc2, sh2, sc_r, sh_r)."""
    a = a_ref[...]
    sc2 = a[0:1, :].reshape(1, 1, Co)
    sh2 = a[1:2, :].reshape(1, 1, Co)
    scr = a[2:3, :].reshape(1, 1, Co)
    shr = a[3:4, :].reshape(1, 1, Co)
    y = (y2_ref[0].astype(jnp.float32) * sc2 + sh2
         + yr_ref[0].astype(jnp.float32) * scr + shr)
    o_ref[...] = jnp.maximum(y, 0.0).reshape(1, Ho, Wo, Co)


# ------------------------------ pallas_call glue ----------------------------- #

def _call_stage1(xs, w, *, stride, Ho, Wo, Ci, Co):
    N, Hs, Ws, Cs = xs.shape
    c2 = 2 * Co
    flops = 2 * N * Ho * Wo * 9 * Ci * c2
    bytes_accessed = (xs.size * 2 + w.size * 2
                      + N * Ho * Wo * c2 * 2 + 2 * N * c2 * 4)
    kernel = functools.partial(_stage1_kernel, stride=stride, Ho=Ho, Wo=Wo, Ci=Ci)
    return pl.pallas_call(
        kernel,
        out_shape=(jax.ShapeDtypeStruct((N, Ho, Wo, c2), jnp.bfloat16),
                   jax.ShapeDtypeStruct((N, 1, c2), jnp.float32),
                   jax.ShapeDtypeStruct((N, 1, c2), jnp.float32)),
        grid=(N,),
        in_specs=[pl.BlockSpec((1, Hs, Ws, Cs), lambda b: (b, 0, 0, 0)),
                  pl.BlockSpec((9 * Ci, c2), lambda b: (0, 0))],
        out_specs=(pl.BlockSpec((1, Ho, Wo, c2), lambda b: (b, 0, 0, 0)),
                   pl.BlockSpec((1, 1, c2), lambda b: (b, 0, 0)),
                   pl.BlockSpec((1, 1, c2), lambda b: (b, 0, 0))),
        compiler_params=_compiler_params(),
        cost_estimate=pl.CostEstimate(flops=flops, transcendentals=0,
                                      bytes_accessed=bytes_accessed),
    )(xs, w)


def _call_stage2(y1, a1, w2, *, Ho, Wo, Co):
    N = y1.shape[0]
    flops = 2 * N * Ho * Wo * 9 * Co * Co
    bytes_accessed = (N * Ho * Wo * Co * 2 + a1.size * 4 + w2.size * 2
                      + N * Ho * Wo * Co * 2 + 2 * N * Co * 4)
    kernel = functools.partial(_stage2_kernel, Ho=Ho, Wo=Wo, Co=Co)
    return pl.pallas_call(
        kernel,
        out_shape=(jax.ShapeDtypeStruct((N, Ho, Wo, Co), jnp.bfloat16),
                   jax.ShapeDtypeStruct((N, 1, Co), jnp.float32),
                   jax.ShapeDtypeStruct((N, 1, Co), jnp.float32)),
        grid=(N,),
        in_specs=[pl.BlockSpec((1, Ho, Wo, Co), lambda b: (b, 0, 0, 0)),  # conv1 half
                  pl.BlockSpec((2, Co), lambda b: (0, 0)),
                  pl.BlockSpec((9 * Co, Co), lambda b: (0, 0))],
        out_specs=(pl.BlockSpec((1, Ho, Wo, Co), lambda b: (b, 0, 0, 0)),
                   pl.BlockSpec((1, 1, Co), lambda b: (b, 0, 0)),
                   pl.BlockSpec((1, 1, Co), lambda b: (b, 0, 0))),
        scratch_shapes=[pltpu.VMEM((Ho + 2, Wo + 2, Co), jnp.bfloat16)],
        compiler_params=_compiler_params(),
        cost_estimate=pl.CostEstimate(flops=flops, transcendentals=0,
                                      bytes_accessed=bytes_accessed),
    )(y1, a1, w2)


def _call_finalize(y2, y1, a23, *, Ho, Wo, Co):
    N = y2.shape[0]
    bytes_accessed = (2 * N * Ho * Wo * Co * 2 + N * Ho * Wo * Co * 4 + a23.size * 4)
    kernel = functools.partial(_finalize_kernel, Ho=Ho, Wo=Wo, Co=Co)
    return pl.pallas_call(
        kernel,
        out_shape=jax.ShapeDtypeStruct((N, Ho, Wo, Co), jnp.float32),
        grid=(N,),
        in_specs=[pl.BlockSpec((1, Ho, Wo, Co), lambda b: (b, 0, 0, 0)),
                  pl.BlockSpec((1, Ho, Wo, Co), lambda b: (b, 0, 0, 1)),  # residual half
                  pl.BlockSpec((4, Co), lambda b: (0, 0))],
        out_specs=pl.BlockSpec((1, Ho, Wo, Co), lambda b: (b, 0, 0, 0)),
        compiler_params=_compiler_params(),
        cost_estimate=pl.CostEstimate(flops=4 * N * Ho * Wo * Co, transcendentals=0,
                                      bytes_accessed=bytes_accessed),
    )(y2, y1, a23)


# -------------------------------- JAX-side glue ------------------------------ #

def _space_to_depth(xpad, stride):
    """(N, Hp, Wp, C) -> (N, ceil(Hp/s), ceil(Wp/s), s*s*C); identity for stride 1."""
    if stride == 1:
        return xpad
    N, Hp, Wp, C = xpad.shape
    Hs, Ws = _round_up(Hp, stride), _round_up(Wp, stride)
    xpad = jnp.pad(xpad, ((0, 0), (0, Hs - Hp), (0, Ws - Wp), (0, 0)))
    x = xpad.reshape(N, Hs // stride, stride, Ws // stride, stride, C)
    x = jnp.transpose(x, (0, 1, 3, 2, 4, 5))
    return x.reshape(N, Hs // stride, Ws // stride, stride * stride * C)


def _prep_w(w_oihw, ci_pad, co_pad):
    """PyTorch OIHW -> (kh, kw, ci, co), zero-padded to lane-dense channel counts."""
    co, ci = w_oihw.shape[:2]
    w = jnp.transpose(w_oihw, (2, 3, 1, 0))
    return jnp.pad(w, ((0, 0), (0, 0), (0, ci_pad - ci), (0, co_pad - co)))


def _pad_c(v, c_pad):
    v = v.reshape(1, -1).astype(jnp.float32)
    return jnp.pad(v, ((0, 0), (0, c_pad - v.shape[1])))


def _bn_affine(ssum, ssq, gamma, beta, m):
    """Training-mode BN (biased variance) folded into per-channel (scale, shift)."""
    mean = ssum / m
    var = jnp.maximum(ssq / m - mean * mean, 0.0)
    scale = gamma * lax.rsqrt(var + EPS)
    return scale, beta - mean * scale


def resblock_forward(x_nchw, p, *, stride):
    """Pallas implementation of resblock.forward (training-mode BatchNorm)."""
    co_t, ci_t = p["w1"].shape[:2]
    Ci, Co = _round_up(ci_t, LANE), _round_up(co_t, LANE)
    N, _, H, W = x_nchw.shape
    Ho = (H - 1) // stride + 1
    Wo = (W - 1) // stride + 1

    # NHWC, channel-pad to a lane multiple, spatial pad of 1, bf16, space-to-depth.
    x = jnp.transpose(x_nchw, (0, 2, 3, 1)).astype(jnp.float32)
    x = jnp.pad(x, ((0, 0), (1, 1), (1, 1), (0, Ci - ci_t)))
    xs = _space_to_depth(x.astype(jnp.bfloat16), stride)

    # conv1 and the residual conv share their input patches -> fuse along Cout and
    # repack the weights K-major ((kh,kw,ci) -> 9*Ci rows) for the single im2col dot.
    # Conv biases are dropped: exactly cancelled by train-mode BN mean subtraction.
    w1r = jnp.concatenate([_prep_w(p["w1"], Ci, Co), _prep_w(p["wr"], Ci, Co)],
                          axis=-1).reshape(9 * Ci, 2 * Co).astype(jnp.bfloat16)
    w2 = _prep_w(p["w2"], Co, Co).reshape(9 * Co, Co).astype(jnp.bfloat16)
    g1r = jnp.concatenate([_pad_c(p["g1"], Co), _pad_c(p["gr"], Co)], axis=-1)
    b1r = jnp.concatenate([_pad_c(p["beta1"], Co), _pad_c(p["betar"], Co)], axis=-1)
    g2, b2 = _pad_c(p["g2"], Co), _pad_c(p["beta2"], Co)

    # Pass 1: fused conv1|residual (pre-BN, bf16 in HBM) + per-image BN partial stats.
    y1, s1p, q1p = _call_stage1(xs, w1r, stride=stride, Ho=Ho, Wo=Wo, Ci=Ci, Co=Co)

    m = N * Ho * Wo
    sc1, sh1 = _bn_affine(jnp.sum(s1p, axis=0), jnp.sum(q1p, axis=0), g1r, b1r, m)
    a1 = jnp.concatenate([sc1[:, :Co], sh1[:, :Co]], axis=0)            # (2, Co) -> BN1

    # Pass 2: BN1+ReLU fused into conv2 (pre-BN) + partial stats; h never hits HBM.
    y2, s2p, q2p = _call_stage2(y1, a1, w2, Ho=Ho, Wo=Wo, Co=Co)

    sc2, sh2 = _bn_affine(jnp.sum(s2p, axis=0), jnp.sum(q2p, axis=0), g2, b2, m)
    a23 = jnp.concatenate([sc2, sh2, sc1[:, Co:], sh1[:, Co:]], axis=0)  # (4, Co)

    # Pass 3: BN2 + residual-BN + add + ReLU.
    out = _call_finalize(y2, y1, a23, Ho=Ho, Wo=Wo, Co=Co)
    return jnp.transpose(out[..., :co_t], (0, 3, 1, 2))                  # back to NCHW


# ------------------------------ pure-JAX reference --------------------------- #

def _ref_conv(x_nhwc, w_oihw, b, stride):
    y = lax.conv_general_dilated(
        x_nhwc, jnp.transpose(w_oihw, (2, 3, 1, 0)),
        window_strides=(stride, stride), padding=((1, 1), (1, 1)),
        dimension_numbers=("NHWC", "HWIO", "NHWC"))
    return y + b.reshape(1, 1, 1, -1)


def _ref_bn(y, g, beta):
    mean = y.mean(axis=(0, 1, 2), keepdims=True)
    var = ((y - mean) ** 2).mean(axis=(0, 1, 2), keepdims=True)
    return (g.reshape(1, 1, 1, -1) * (y - mean) / jnp.sqrt(var + EPS)
            + beta.reshape(1, 1, 1, -1))


def resblock_reference(x_nchw, p, *, stride):
    x = jnp.transpose(x_nchw, (0, 2, 3, 1)).astype(jnp.float32)
    h = jnp.maximum(_ref_bn(_ref_conv(x, p["w1"], p["b1"].reshape(-1), stride),
                            p["g1"].reshape(-1), p["beta1"].reshape(-1)), 0.0)
    r = _ref_bn(_ref_conv(x, p["wr"], p["br"].reshape(-1), stride),
                p["gr"].reshape(-1), p["betar"].reshape(-1))
    y = _ref_bn(_ref_conv(h, p["w2"], p["b2"].reshape(-1), 1),
                p["g2"].reshape(-1), p["beta2"].reshape(-1))
    out = jnp.maximum(y + r, 0.0)
    return jnp.transpose(out, (0, 3, 1, 2))


# ------------------------------------ main ----------------------------------- #

if __name__ == "__main__":
    key = jax.random.PRNGKey(0)
    N, Cin, H, W = 2, 4, 16, 16
    Cout, stride = 8, 2

    ks = jax.random.split(key, 16)
    x = jax.random.normal(ks[0], (N, Cin, H, W), jnp.float32)

    def conv_w(k, ci):
        return 0.1 * jax.random.normal(k, (Cout, ci, 3, 3), jnp.float32)

    def vec(k, scale):
        return scale * jax.random.normal(k, (1, Cout), jnp.float32)

    params = {
        # conv1: in_features -> out_features, stride
        "w1": conv_w(ks[1], Cin), "b1": vec(ks[2], 0.1),
        "g1": 1.0 + vec(ks[3], 0.1), "beta1": vec(ks[4], 0.1),
        # conv2: out_features -> out_features, stride 1
        "w2": conv_w(ks[5], Cout), "b2": vec(ks[6], 0.1),
        "g2": 1.0 + vec(ks[7], 0.1), "beta2": vec(ks[8], 0.1),
        # residual conv: in_features -> out_features, stride
        "wr": conv_w(ks[9], Cin), "br": vec(ks[10], 0.1),
        "gr": 1.0 + vec(ks[11], 0.1), "betar": vec(ks[12], 0.1),
    }

    fwd = jax.jit(functools.partial(resblock_forward, stride=stride))
    out = jax.block_until_ready(fwd(x, params))

    ref = jax.block_until_ready(resblock_reference(x, params, stride=stride))
    assert out.shape == (N, Cout, H // stride, W // stride), out.shape
    # bf16 MXU inputs + bf16 pre-BN activations in HBM vs a pure-f32 reference.
    np.testing.assert_allclose(np.asarray(out), np.asarray(ref), rtol=5e-2, atol=6e-2)

    print("KERNEL_OK")
</pallas_src>

<mosaic_0001>
module attributes {stable_mosaic.version = 11 : i64} {
  func.func @_stage1_kernel(%arg0: i32, %arg1: memref<1x9x9x512xbf16, #tpu.memory_space<vmem>>, %arg2: memref<1152x256xbf16, #tpu.memory_space<vmem>>, %arg3: memref<1x8x8x256xbf16, #tpu.memory_space<vmem>>, %arg4: memref<1x1x256xf32, #tpu.memory_space<vmem>>, %arg5: memref<1x1x256xf32, #tpu.memory_space<vmem>>) attributes {dimension_semantics = [#tpu.dimension_semantics<parallel>], iteration_bounds = array<i64: 2>, scalar_prefetch = 0 : i64, scratch_operands = 0 : i64, tpu.core_type = #tpu.core_type<tc>, window_params = [{transform_indices = @transform_0, window_bounds = array<i64: 1, 9, 9, 512>}, {pipeline_mode = #tpu.pipeline_mode<synchronous>, transform_indices = @transform_1, window_bounds = array<i64: 1152, 256>}, {transform_indices = @transform_2, window_bounds = array<i64: 1, 8, 8, 256>}, {transform_indices = @transform_3, window_bounds = array<i64: 1, 1, 256>}, {transform_indices = @transform_4, window_bounds = array<i64: 1, 1, 256>}]} {
    %c0 = arith.constant 0 : index
    %c0_0 = arith.constant 0 : index
    %c0_1 = arith.constant 0 : index
    %c0_2 = arith.constant 0 : index
    %0 = vector.load %arg1[%c0, %c0_0, %c0_1, %c0_2] : memref<1x9x9x512xbf16, #tpu.memory_space<vmem>>, vector<1x8x8x128xbf16>
    %1 = vector.shape_cast %0 : vector<1x8x8x128xbf16> to vector<8x8x128xbf16>
    %c0_3 = arith.constant 0 : index
    %c0_4 = arith.constant 0 : index
    %c0_5 = arith.constant 0 : index
    %c128 = arith.constant 128 : index
    %2 = vector.load %arg1[%c0_3, %c0_4, %c0_5, %c128] : memref<1x9x9x512xbf16, #tpu.memory_space<vmem>>, vector<1x8x8x128xbf16>
    %3 = vector.shape_cast %2 : vector<1x8x8x128xbf16> to vector<8x8x128xbf16>
    %c0_6 = arith.constant 0 : index
    %c0_7 = arith.constant 0 : index
    %c1 = arith.constant 1 : index
    %c0_8 = arith.constant 0 : index
    %4 = vector.load %arg1[%c0_6, %c0_7, %c1, %c0_8] : memref<1x9x9x512xbf16, #tpu.memory_space<vmem>>, vector<1x8x8x128xbf16>
    %5 = vector.shape_cast %4 : vector<1x8x8x128xbf16> to vector<8x8x128xbf16>
    %c0_9 = arith.constant 0 : index
    %c0_10 = arith.constant 0 : index
    %c0_11 = arith.constant 0 : index
    %c256 = arith.constant 256 : index
    %6 = vector.load %arg1[%c0_9, %c0_10, %c0_11, %c256] : memref<1x9x9x512xbf16, #tpu.memory_space<vmem>>, vector<1x8x8x128xbf16>
    %7 = vector.shape_cast %6 : vector<1x8x8x128xbf16> to vector<8x8x128xbf16>
    %c0_12 = arith.constant 0 : index
    %c0_13 = arith.constant 0 : index
    %c0_14 = arith.constant 0 : index
    %c384 = arith.constant 384 : index
    %8 = vector.load %arg1[%c0_12, %c0_13, %c0_14, %c384] : memref<1x9x9x512xbf16, #tpu.memory_space<vmem>>, vector<1x8x8x128xbf16>
    %9 = vector.shape_cast %8 : vector<1x8x8x128xbf16> to vector<8x8x128xbf16>
    %c0_15 = arith.constant 0 : index
    %c0_16 = arith.constant 0 : index
    %c1_17 = arith.constant 1 : index
    %c256_18 = arith.constant 256 : index
    %10 = vector.load %arg1[%c0_15, %c0_16, %c1_17, %c256_18] : memref<1x9x9x512xbf16, #tpu.memory_space<vmem>>, vector<1x8x8x128xbf16>
    %11 = vector.shape_cast %10 : vector<1x8x8x128xbf16> to vector<8x8x128xbf16>
    %c0_19 = arith.constant 0 : index
    %c1_20 = arith.constant 1 : index
    %c0_21 = arith.constant 0 : index
    %c0_22 = arith.constant 0 : index
    %12 = vector.load %arg1[%c0_19, %c1_20, %c0_21, %c0_22] : memref<1x9x9x512xbf16, #tpu.memory_space<vmem>>, vector<1x8x8x128xbf16>
    %13 = vector.shape_cast %12 : vector<1x8x8x128xbf16> to vector<8x8x128xbf16>
    %c0_23 = arith.constant 0 : index
    %c1_24 = arith.constant 1 : index
    %c0_25 = arith.constant 0 : index
    %c128_26 = arith.constant 128 : index
    %14 = vector.load %arg1[%c0_23, %c1_24, %c0_25, %c128_26] : memref<1x9x9x512xbf16, #tpu.memory_space<vmem>>, vector<1x8x8x128xbf16>
    %15 = vector.shape_cast %14 : vector<1x8x8x128xbf16> to vector<8x8x128xbf16>
    %c0_27 = arith.constant 0 : index
    %c1_28 = arith.constant 1 : index
    %c1_29 = arith.constant 1 : index
    %c0_30 = arith.constant 0 : index
    %16 = vector.load %arg1[%c0_27, %c1_28, %c1_29, %c0_30] : memref<1x9x9x512xbf16, #tpu.memory_space<vmem>>, vector<1x8x8x128xbf16>
    %17 = vector.shape_cast %16 : vector<1x8x8x128xbf16> to vector<8x8x128xbf16>
    %18 = tpu.concatenate %1, %3, %5, %7, %9, %11, %13, %15, %17 in 2 : vector<8x8x128xbf16>, vector<8x8x128xbf16>, vector<8x8x128xbf16>, vector<8x8x128xbf16>, vector<8x8x128xbf16>, vector<8x8x128xbf16>, vector<8x8x128xbf16>, vector<8x8x128xbf16>, vector<8x8x128xbf16> -> vector<8x8x1152xbf16>
    %19 = vector.shape_cast %18 : vector<8x8x1152xbf16> to vector<64x1152xbf16>
    %c0_31 = arith.constant 0 : index
    %c0_32 = arith.constant 0 : index
    %20 = vector.load %arg2[%c0_31, %c0_32] : memref<1152x256xbf16, #tpu.memory_space<vmem>>, vector<1152x256xbf16>
    %cst = arith.constant dense<0.000000e+00> : vector<64x256xf32>
    %21 = tpu.matmul %19, %20, %cst {dimension_numbers = #tpu.dot_dimension_numbers<[1], [0], [0], [1], [0, 0, 1, 1], [], []>} : vector<64x1152xbf16>, vector<1152x256xbf16>, vector<64x256xf32> -> vector<64x256xf32>
    %22 = vector.shape_cast %21 : vector<64x256xf32> to vector<1x8x8x256xf32>
    %23 = arith.truncf %22 : vector<1x8x8x256xf32> to vector<1x8x8x256xbf16>
    %c0_33 = arith.constant 0 : index
    %c0_34 = arith.constant 0 : index
    %c0_35 = arith.constant 0 : index
    %c0_36 = arith.constant 0 : index
    %24 = vector.load %arg3[%c0_33, %c0_34, %c0_35, %c0_36] : memref<1x8x8x256xbf16, #tpu.memory_space<vmem>>, vector<1x8x8x256xbf16>
    tpu.vector_store %arg3[%c0_33, %c0_34, %c0_35, %c0_36], %23 {strides = array<i32>} : memref<1x8x8x256xbf16, #tpu.memory_space<vmem>>, vector<1x8x8x256xbf16>,
    %cst_37 = arith.constant dense<0.000000e+00> : vector<256xf32>
    %25 = vector.multi_reduction <add>, %21, %cst_37 [0] : vector<64x256xf32> to vector<256xf32>
    %26 = vector.shape_cast %25 : vector<256xf32> to vector<1x256xf32>
    %27 = vector.shape_cast %26 : vector<1x256xf32> to vector<1x1x256xf32>
    %c0_38 = arith.constant 0 : index
    %c0_39 = arith.constant 0 : index
    %c0_40 = arith.constant 0 : index
    %28 = vector.load %arg4[%c0_38, %c0_39, %c0_40] : memref<1x1x256xf32, #tpu.memory_space<vmem>>, vector<1x1x256xf32>
    tpu.vector_store %arg4[%c0_38, %c0_39, %c0_40], %27 {strides = array<i32>} : memref<1x1x256xf32, #tpu.memory_space<vmem>>, vector<1x1x256xf32>,
    %29 = arith.mulf %21, %21 : vector<64x256xf32>
    %cst_41 = arith.constant dense<0.000000e+00> : vector<256xf32>
    %30 = vector.multi_reduction <add>, %29, %cst_41 [0] : vector<64x256xf32> to vector<256xf32>
    %31 = vector.shape_cast %30 : vector<256xf32> to vector<1x256xf32>
    %32 = vector.shape_cast %31 : vector<1x256xf32> to vector<1x1x256xf32>
    %c0_42 = arith.constant 0 : index
    %c0_43 = arith.constant 0 : index
    %c0_44 = arith.constant 0 : index
    %33 = vector.load %arg5[%c0_42, %c0_43, %c0_44] : memref<1x1x256xf32, #tpu.memory_space<vmem>>, vector<1x1x256xf32>
    tpu.vector_store %arg5[%c0_42, %c0_43, %c0_44], %32 {strides = array<i32>} : memref<1x1x256xf32, #tpu.memory_space<vmem>>, vector<1x1x256xf32>,
    return
  }
  func.func @transform_0(%arg0: i32) -> (i32, i32, i32, i32) {
    %c0_i32 = arith.constant 0 : i32
    %c0_i32_0 = arith.constant 0 : i32
    %c0_i32_1 = arith.constant 0 : i32
    %c0_i32_2 = arith.constant 0 : i32
    return %arg0, %c0_i32, %c0_i32_0, %c0_i32_1 : i32, i32, i32, i32
  }
  func.func @transform_1(%arg0: i32) -> (i32, i32) {
    %c0_i32 = arith.constant 0 : i32
    %c0_i32_0 = arith.constant 0 : i32
    %c0_i32_1 = arith.constant 0 : i32
    return %c0_i32, %c0_i32_0 : i32, i32
  }
  func.func @transform_2(%arg0: i32) -> (i32, i32, i32, i32) {
    %c0_i32 = arith.constant 0 : i32
    %c0_i32_0 = arith.constant 0 : i32
    %c0_i32_1 = arith.constant 0 : i32
    %c0_i32_2 = arith.constant 0 : i32
    return %arg0, %c0_i32, %c0_i32_0, %c0_i32_1 : i32, i32, i32, i32
  }
  func.func @transform_3(%arg0: i32) -> (i32, i32, i32) {
    %c0_i32 = arith.constant 0 : i32
    %c0_i32_0 = arith.constant 0 : i32
    %c0_i32_1 = arith.constant 0 : i32
    return %arg0, %c0_i32, %c0_i32_0 : i32, i32, i32
  }
  func.func @transform_4(%arg0: i32) -> (i32, i32, i32) {
    %c0_i32 = arith.constant 0 : i32
    %c0_i32_0 = arith.constant 0 : i32
    %c0_i32_1 = arith.constant 0 : i32
    return %arg0, %c0_i32, %c0_i32_0 : i32, i32, i32
  }
}

module attributes {stable_mosaic.version = 11 : i64} {
  func.func @_stage2_kernel(%arg0: i32, %arg1: memref<1x8x8x128xbf16, #tpu.memory_space<vmem>>, %arg2: memref<2x128xf32, #tpu.memory_space<vmem>>, %arg3: memref<1152x128xbf16, #tpu.memory_space<vmem>>, %arg4: memref<1x8x8x128xbf16, #tpu.memory_space<vmem>>, %arg5: memref<1x1x128xf32, #tpu.memory_space<vmem>>, %arg6: memref<1x1x128xf32, #tpu.memory_space<vmem>>, %arg7: memref<10x10x128xbf16, #tpu.memory_space<vmem>>) attributes {dimension_semantics = [#tpu.dimension_semantics<parallel>], iteration_bounds = array<i64: 2>, scalar_prefetch = 0 : i64, scratch_operands = 1 : i64, tpu.core_type = #tpu.core_type<tc>, window_params = [{transform_indices = @transform_0, window_bounds = array<i64: 1, 8, 8, 128>}, {pipeline_mode = #tpu.pipeline_mode<synchronous>, transform_indices = @transform_1, window_bounds = array<i64: 2, 128>}, {pipeline_mode = #tpu.pipeline_mode<synchronous>, transform_indices = @transform_2, window_bounds = array<i64: 1152, 128>}, {transform_indices = @transform_3, window_bounds = array<i64: 1, 8, 8, 128>}, {transform_indices = @transform_4, window_bounds = array<i64: 1, 1, 128>}, {transform_indices = @transform_5, window_bounds = array<i64: 1, 1, 128>}]} {
    %c0 = arith.constant 0 : index
    %c0_0 = arith.constant 0 : index
    %0 = vector.load %arg2[%c0, %c0_0] : memref<2x128xf32, #tpu.memory_space<vmem>>, vector<2x128xf32>
    %1 = vector.extract_strided_slice %0 {offsets = [0, 0], sizes = [1, 128], strides = [1, 1]} : vector<2x128xf32> to vector<1x128xf32>
    %2 = vector.shape_cast %1 : vector<1x128xf32> to vector<1x1x128xf32>
    %3 = vector.extract_strided_slice %0 {offsets = [1, 0], sizes = [1, 128], strides = [1, 1]} : vector<2x128xf32> to vector<1x128xf32>
    %4 = vector.shape_cast %3 : vector<1x128xf32> to vector<1x1x128xf32>
    %c0_1 = arith.constant 0 : index
    %c0_2 = arith.constant 0 : index
    %c0_3 = arith.constant 0 : index
    %c0_4 = arith.constant 0 : index
    %5 = vector.load %arg1[%c0_1, %c0_2, %c0_3, %c0_4] : memref<1x8x8x128xbf16, #tpu.memory_space<vmem>>, vector<1x8x8x128xbf16>
    %6 = vector.shape_cast %5 : vector<1x8x8x128xbf16> to vector<8x8x128xbf16>
    %7 = arith.extf %6 : vector<8x8x128xbf16> to vector<8x8x128xf32>
    %8 = vector.broadcast %2 : vector<1x1x128xf32> to vector<8x8x128xf32>
    %9 = arith.mulf %7, %8 : vector<8x8x128xf32>
    %10 = vector.broadcast %4 : vector<1x1x128xf32> to vector<8x8x128xf32>
    %11 = arith.addf %9, %10 : vector<8x8x128xf32>
    %cst = arith.constant 0.000000e+00 : f32
    %12 = vector.broadcast %cst : f32 to vector<8x8x128xf32>
    %13 = arith.maximumf %11, %12 : vector<8x8x128xf32>
    %cst_5 = arith.constant 0.000000e+00 : bf16
    %14 = vector.broadcast %cst_5 : bf16 to vector<1x10x128xbf16>
    %cst_6 = arith.constant 0.000000e+00 : bf16
    %15 = vector.broadcast %cst_6 : bf16 to vector<8x1x128xbf16>
    %c0_7 = arith.constant 0 : index
    %c0_8 = arith.constant 0 : index
    %c0_9 = arith.constant 0 : index
    %16 = vector.load %arg7[%c0_7, %c0_8, %c0_9] : memref<10x10x128xbf16, #tpu.memory_space<vmem>>, vector<1x10x128xbf16>
    tpu.vector_store %arg7[%c0_7, %c0_8, %c0_9], %14 {strides = array<i32>} : memref<10x10x128xbf16, #tpu.memory_space<vmem>>, vector<1x10x128xbf16>,
    %c9 = arith.constant 9 : index
    %c0_10 = arith.constant 0 : index
    %c0_11 = arith.constant 0 : index
    %17 = vector.load %arg7[%c9, %c0_10, %c0_11] : memref<10x10x128xbf16, #tpu.memory_space<vmem>>, vector<1x10x128xbf16>
    tpu.vector_store %arg7[%c9, %c0_10, %c0_11], %14 {strides = array<i32>} : memref<10x10x128xbf16, #tpu.memory_space<vmem>>, vector<1x10x128xbf16>,
    %c1 = arith.constant 1 : index
    %c0_12 = arith.constant 0 : index
    %c0_13 = arith.constant 0 : index
    %18 = vector.load %arg7[%c1, %c0_12, %c0_13] : memref<10x10x128xbf16, #tpu.memory_space<vmem>>, vector<8x1x128xbf16>
    tpu.vector_store %arg7[%c1, %c0_12, %c0_13], %15 {strides = array<i32>} : memref<10x10x128xbf16, #tpu.memory_space<vmem>>, vector<8x1x128xbf16>,
    %c1_14 = arith.constant 1 : index
    %c9_15 = arith.constant 9 : index
    %c0_16 = arith.constant 0 : index
    %19 = vector.load %arg7[%c1_14, %c9_15, %c0_16] : memref<10x10x128xbf16, #tpu.memory_space<vmem>>, vector<8x1x128xbf16>
    tpu.vector_store %arg7[%c1_14, %c9_15, %c0_16], %15 {strides = array<i32>} : memref<10x10x128xbf16, #tpu.memory_space<vmem>>, vector<8x1x128xbf16>,
    %20 = arith.truncf %13 : vector<8x8x128xf32> to vector<8x8x128xbf16>
    %c1_17 = arith.constant 1 : index
    %c1_18 = arith.constant 1 : index
    %c0_19 = arith.constant 0 : index
    %21 = vector.load %arg7[%c1_17, %c1_18, %c0_19] : memref<10x10x128xbf16, #tpu.memory_space<vmem>>, vector<8x8x128xbf16>
    tpu.vector_store %arg7[%c1_17, %c1_18, %c0_19], %20 {strides = array<i32>} : memref<10x10x128xbf16, #tpu.memory_space<vmem>>, vector<8x8x128xbf16>,
    %c0_20 = arith.constant 0 : index
    %c0_21 = arith.constant 0 : index
    %c0_22 = arith.constant 0 : index
    %22 = vector.load %arg7[%c0_20, %c0_21, %c0_22] : memref<10x10x128xbf16, #tpu.memory_space<vmem>>, vector<8x8x128xbf16>
    %c0_23 = arith.constant 0 : index
    %c1_24 = arith.constant 1 : index
    %c0_25 = arith.constant 0 : index
    %23 = vector.load %arg7[%c0_23, %c1_24, %c0_25] : memref<10x10x128xbf16, #tpu.memory_space<vmem>>, vector<8x8x128xbf16>
    %c0_26 = arith.constant 0 : index
    %c2 = arith.constant 2 : index
    %c0_27 = arith.constant 0 : index
    %24 = vector.load %arg7[%c0_26, %c2, %c0_27] : memref<10x10x128xbf16, #tpu.memory_space<vmem>>, vector<8x8x128xbf16>
    %c1_28 = arith.constant 1 : index
    %c0_29 = arith.constant 0 : index
    %c0_30 = arith.constant 0 : index
    %25 = vector.load %arg7[%c1_28, %c0_29, %c0_30] : memref<10x10x128xbf16, #tpu.memory_space<vmem>>, vector<8x8x128xbf16>
    %c1_31 = arith.constant 1 : index
    %c1_32 = arith.constant 1 : index
    %c0_33 = arith.constant 0 : index
    %26 = vector.load %arg7[%c1_31, %c1_32, %c0_33] : memref<10x10x128xbf16, #tpu.memory_space<vmem>>, vector<8x8x128xbf16>
    %c1_34 = arith.constant 1 : index
    %c2_35 = arith.constant 2 : index
    %c0_36 = arith.constant 0 : index
    %27 = vector.load %arg7[%c1_34, %c2_35, %c0_36] : memref<10x10x128xbf16, #tpu.memory_space<vmem>>, vector<8x8x128xbf16>
    %c2_37 = arith.constant 2 : index
    %c0_38 = arith.constant 0 : index
    %c0_39 = arith.constant 0 : index
    %28 = vector.load %arg7[%c2_37, %c0_38, %c0_39] : memref<10x10x128xbf16, #tpu.memory_space<vmem>>, vector<8x8x128xbf16>
    %c2_40 = arith.constant 2 : index
    %c1_41 = arith.constant 1 : index
    %c0_42 = arith.constant 0 : index
    %29 = vector.load %arg7[%c2_40, %c1_41, %c0_42] : memref<10x10x128xbf16, #tpu.memory_space<vmem>>, vector<8x8x128xbf16>
    %c2_43 = arith.constant 2 : index
    %c2_44 = arith.constant 2 : index
    %c0_45 = arith.constant 0 : index
    %30 = vector.load %arg7[%c2_43, %c2_44, %c0_45] : memref<10x10x128xbf16, #tpu.memory_space<vmem>>, vector<8x8x128xbf16>
    %31 = tpu.concatenate %22, %23, %24, %25, %26, %27, %28, %29, %30 in 2 : vector<8x8x128xbf16>, vector<8x8x128xbf16>, vector<8x8x128xbf16>, vector<8x8x128xbf16>, vector<8x8x128xbf16>, vector<8x8x128xbf16>, vector<8x8x128xbf16>, vector<8x8x128xbf16>, vector<8x8x128xbf16> -> vector<8x8x1152xbf16>
    %32 = vector.shape_cast %31 : vector<8x8x1152xbf16> to vector<64x1152xbf16>
    %c0_46 = arith.constant 0 : index
    %c0_47 = arith.constant 0 : index
    %33 = vector.load %arg3[%c0_46, %c0_47] : memref<1152x128xbf16, #tpu.memory_space<vmem>>, vector<1152x128xbf16>
    %cst_48 = arith.constant dense<0.000000e+00> : vector<64x128xf32>
    %34 = tpu.matmul %32, %33, %cst_48 {dimension_numbers = #tpu.dot_dimension_numbers<[1], [0], [0], [1], [0, 0, 1, 1], [], []>} : vector<64x1152xbf16>, vector<1152x128xbf16>, vector<64x128xf32> -> vector<64x128xf32>
    %35 = vector.shape_cast %34 : vector<64x128xf32> to vector<1x8x8x128xf32>
    %36 = arith.truncf %35 : vector<1x8x8x128xf32> to vector<1x8x8x128xbf16>
    %c0_49 = arith.constant 0 : index
    %c0_50 = arith.constant 0 : index
    %c0_51 = arith.constant 0 : index
    %c0_52 = arith.constant 0 : index
    %37 = vector.load %arg4[%c0_49, %c0_50, %c0_51, %c0_52] : memref<1x8x8x128xbf16, #tpu.memory_space<vmem>>, vector<1x8x8x128xbf16>
    tpu.vector_store %arg4[%c0_49, %c0_50, %c0_51, %c0_52], %36 {strides = array<i32>} : memref<1x8x8x128xbf16, #tpu.memory_space<vmem>>, vector<1x8x8x128xbf16>,
    %cst_53 = arith.constant dense<0.000000e+00> : vector<128xf32>
    %38 = vector.multi_reduction <add>, %34, %cst_53 [0] : vector<64x128xf32> to vector<128xf32>
    %39 = vector.shape_cast %38 : vector<128xf32> to vector<1x128xf32>
    %40 = vector.shape_cast %39 : vector<1x128xf32> to vector<1x1x128xf32>
    %c0_54 = arith.constant 0 : index
    %c0_55 = arith.constant 0 : index
    %c0_56 = arith.constant 0 : index
    %41 = vector.load %arg5[%c0_54, %c0_55, %c0_56] : memref<1x1x128xf32, #tpu.memory_space<vmem>>, vector<1x1x128xf32>
    tpu.vector_store %arg5[%c0_54, %c0_55, %c0_56], %40 {strides = array<i32>} : memref<1x1x128xf32, #tpu.memory_space<vmem>>, vector<1x1x128xf32>,
    %42 = arith.mulf %34, %34 : vector<64x128xf32>
    %cst_57 = arith.constant dense<0.000000e+00> : vector<128xf32>
    %43 = vector.multi_reduction <add>, %42, %cst_57 [0] : vector<64x128xf32> to vector<128xf32>
    %44 = vector.shape_cast %43 : vector<128xf32> to vector<1x128xf32>
    %45 = vector.shape_cast %44 : vector<1x128xf32> to vector<1x1x128xf32>
    %c0_58 = arith.constant 0 : index
    %c0_59 = arith.constant 0 : index
    %c0_60 = arith.constant 0 : index
    %46 = vector.load %arg6[%c0_58, %c0_59, %c0_60] : memref<1x1x128xf32, #tpu.memory_space<vmem>>, vector<1x1x128xf32>
    tpu.vector_store %arg6[%c0_58, %c0_59, %c0_60], %45 {strides = array<i32>} : memref<1x1x128xf32, #tpu.memory_space<vmem>>, vector<1x1x128xf32>,
    return
  }
  func.func @transform_0(%arg0: i32) -> (i32, i32, i32, i32) {
    %c0_i32 = arith.constant 0 : i32
    %c0_i32_0 = arith.constant 0 : i32
    %c0_i32_1 = arith.constant 0 : i32
    %c0_i32_2 = arith.constant 0 : i32
    return %arg0, %c0_i32, %c0_i32_0, %c0_i32_1 : i32, i32, i32, i32
  }
  func.func @transform_1(%arg0: i32) -> (i32, i32) {
    %c0_i32 = arith.constant 0 : i32
    %c0_i32_0 = arith.constant 0 : i32
    %c0_i32_1 = arith.constant 0 : i32
    return %c0_i32, %c0_i32_0 : i32, i32
  }
  func.func @transform_2(%arg0: i32) -> (i32, i32) {
    %c0_i32 = arith.constant 0 : i32
    %c0_i32_0 = arith.constant 0 : i32
    %c0_i32_1 = arith.constant 0 : i32
    return %c0_i32, %c0_i32_0 : i32, i32
  }
  func.func @transform_3(%arg0: i32) -> (i32, i32, i32, i32) {
    %c0_i32 = arith.constant 0 : i32
    %c0_i32_0 = arith.constant 0 : i32
    %c0_i32_1 = arith.constant 0 : i32
    %c0_i32_2 = arith.constant 0 : i32
    return %arg0, %c0_i32, %c0_i32_0, %c0_i32_1 : i32, i32, i32, i32
  }
  func.func @transform_4(%arg0: i32) -> (i32, i32, i32) {
    %c0_i32 = arith.constant 0 : i32
    %c0_i32_0 = arith.constant 0 : i32
    %c0_i32_1 = arith.constant 0 : i32
    return %arg0, %c0_i32, %c0_i32_0 : i32, i32, i32
  }
  func.func @transform_5(%arg0: i32) -> (i32, i32, i32) {
    %c0_i32 = arith.constant 0 : i32
    %c0_i32_0 = arith.constant 0 : i32
    %c0_i32_1 = arith.constant 0 : i32
    return %arg0, %c0_i32, %c0_i32_0 : i32, i32, i32
  }
}

module attributes {stable_mosaic.version = 11 : i64} {
  func.func @_finalize_kernel(%arg0: i32, %arg1: memref<1x8x8x128xbf16, #tpu.memory_space<vmem>>, %arg2: memref<1x8x8x128xbf16, #tpu.memory_space<vmem>>, %arg3: memref<4x128xf32, #tpu.memory_space<vmem>>, %arg4: memref<1x8x8x128xf32, #tpu.memory_space<vmem>>) attributes {dimension_semantics = [#tpu.dimension_semantics<parallel>], iteration_bounds = array<i64: 2>, scalar_prefetch = 0 : i64, scratch_operands = 0 : i64, tpu.core_type = #tpu.core_type<tc>, window_params = [{transform_indices = @transform_0, window_bounds = array<i64: 1, 8, 8, 128>}, {transform_indices = @transform_1, window_bounds = array<i64: 1, 8, 8, 128>}, {pipeline_mode = #tpu.pipeline_mode<synchronous>, transform_indices = @transform_2, window_bounds = array<i64: 4, 128>}, {transform_indices = @transform_3, window_bounds = array<i64: 1, 8, 8, 128>}]} {
    %c0 = arith.constant 0 : index
    %c0_0 = arith.constant 0 : index
    %0 = vector.load %arg3[%c0, %c0_0] : memref<4x128xf32, #tpu.memory_space<vmem>>, vector<4x128xf32>
    %1 = vector.extract_strided_slice %0 {offsets = [0, 0], sizes = [1, 128], strides = [1, 1]} : vector<4x128xf32> to vector<1x128xf32>
    %2 = vector.shape_cast %1 : vector<1x128xf32> to vector<1x1x128xf32>
    %3 = vector.extract_strided_slice %0 {offsets = [1, 0], sizes = [1, 128], strides = [1, 1]} : vector<4x128xf32> to vector<1x128xf32>
    %4 = vector.shape_cast %3 : vector<1x128xf32> to vector<1x1x128xf32>
    %5 = vector.extract_strided_slice %0 {offsets = [2, 0], sizes = [1, 128], strides = [1, 1]} : vector<4x128xf32> to vector<1x128xf32>
    %6 = vector.shape_cast %5 : vector<1x128xf32> to vector<1x1x128xf32>
    %7 = vector.extract_strided_slice %0 {offsets = [3, 0], sizes = [1, 128], strides = [1, 1]} : vector<4x128xf32> to vector<1x128xf32>
    %8 = vector.shape_cast %7 : vector<1x128xf32> to vector<1x1x128xf32>
    %c0_1 = arith.constant 0 : index
    %c0_2 = arith.constant 0 : index
    %c0_3 = arith.constant 0 : index
    %c0_4 = arith.constant 0 : index
    %9 = vector.load %arg1[%c0_1, %c0_2, %c0_3, %c0_4] : memref<1x8x8x128xbf16, #tpu.memory_space<vmem>>, vector<1x8x8x128xbf16>
    %10 = vector.shape_cast %9 : vector<1x8x8x128xbf16> to vector<8x8x128xbf16>
    %11 = arith.extf %10 : vector<8x8x128xbf16> to vector<8x8x128xf32>
    %12 = vector.broadcast %2 : vector<1x1x128xf32> to vector<8x8x128xf32>
    %13 = arith.mulf %11, %12 : vector<8x8x128xf32>
    %14 = vector.broadcast %4 : vector<1x1x128xf32> to vector<8x8x128xf32>
    %15 = arith.addf %13, %14 : vector<8x8x128xf32>
    %c0_5 = arith.constant 0 : index
    %c0_6 = arith.constant 0 : index
    %c0_7 = arith.constant 0 : index
    %c0_8 = arith.constant 0 : index
    %16 = vector.load %arg2[%c0_5, %c0_6, %c0_7, %c0_8] : memref<1x8x8x128xbf16, #tpu.memory_space<vmem>>, vector<1x8x8x128xbf16>
    %17 = vector.shape_cast %16 : vector<1x8x8x128xbf16> to vector<8x8x128xbf16>
    %18 = arith.extf %17 : vector<8x8x128xbf16> to vector<8x8x128xf32>
    %19 = vector.broadcast %6 : vector<1x1x128xf32> to vector<8x8x128xf32>
    %20 = arith.mulf %18, %19 : vector<8x8x128xf32>
    %21 = arith.addf %15, %20 : vector<8x8x128xf32>
    %22 = vector.broadcast %8 : vector<1x1x128xf32> to vector<8x8x128xf32>
    %23 = arith.addf %21, %22 : vector<8x8x128xf32>
    %cst = arith.constant 0.000000e+00 : f32
    %24 = vector.broadcast %cst : f32 to vector<8x8x128xf32>
    %25 = arith.maximumf %23, %24 : vector<8x8x128xf32>
    %26 = vector.shape_cast %25 : vector<8x8x128xf32> to vector<1x8x8x128xf32>
    %c0_9 = arith.constant 0 : index
    %c0_10 = arith.constant 0 : index
    %c0_11 = arith.constant 0 : index
    %c0_12 = arith.constant 0 : index
    %27 = vector.load %arg4[%c0_9, %c0_10, %c0_11, %c0_12] : memref<1x8x8x128xf32, #tpu.memory_space<vmem>>, vector<1x8x8x128xf32>
    tpu.vector_store %arg4[%c0_9, %c0_10, %c0_11, %c0_12], %26 {strides = array<i32>} : memref<1x8x8x128xf32, #tpu.memory_space<vmem>>, vector<1x8x8x128xf32>,
    return
  }
  func.func @transform_0(%arg0: i32) -> (i32, i32, i32, i32) {
    %c0_i32 = arith.constant 0 : i32
    %c0_i32_0 = arith.constant 0 : i32
    %c0_i32_1 = arith.constant 0 : i32
    %c0_i32_2 = arith.constant 0 : i32
    return %arg0, %c0_i32, %c0_i32_0, %c0_i32_1 : i32, i32, i32, i32
  }
  func.func @transform_1(%arg0: i32) -> (i32, i32, i32, i32) {
    %c0_i32 = arith.constant 0 : i32
    %c0_i32_0 = arith.constant 0 : i32
    %c1_i32 = arith.constant 1 : i32
    %c0_i32_1 = arith.constant 0 : i32
    return %arg0, %c0_i32, %c0_i32_0, %c1_i32 : i32, i32, i32, i32
  }
  func.func @transform_2(%arg0: i32) -> (i32, i32) {
    %c0_i32 = arith.constant 0 : i32
    %c0_i32_0 = arith.constant 0 : i32
    %c0_i32_1 = arith.constant 0 : i32
    return %c0_i32, %c0_i32_0 : i32, i32
  }
  func.func @transform_3(%arg0: i32) -> (i32, i32, i32, i32) {
    %c0_i32 = arith.constant 0 : i32
    %c0_i32_0 = arith.constant 0 : i32
    %c0_i32_1 = arith.constant 0 : i32
    %c0_i32_2 = arith.constant 0 : i32
    return %arg0, %c0_i32, %c0_i32_0, %c0_i32_1 : i32, i32, i32, i32
  }
}

</mosaic_0001>

<bundles_post_ra>
// kernel: resblock_forward.5
= control target key start
LH: loop header
LB: loop body
LE: loop exit
PB: predicated region body
PF: predicated region fallthrough
CT: control target
= control target key end

     0   :  { %s574_s12 = smov 0   ;;  %s576_s13 = smov 0   ;;  %s662_s0 = inlined_call_operand.vmem [shape: bf16[2,8,8,128], index: 0, kind: input, shape index: {}]   ;;  %s663_s1 = inlined_call_operand.vmem [shape: bf16[2,8,8,256], index: 1, kind: input, shape index: {}]   ;;  %s664_s2 = inlined_call_operand.vmem [shape: f32[4,128], index: 2, kind: input, shape index: {}]   ;;  %s665_s3 = inlined_call_operand.vmem [shape: f32[2,8,8,128], index: 3, kind: output, shape index: {}]  }
   0x1   :  { %s578_s14 = smov 0  }
   0x2 LB: > { %s442_s15 = sadd.s32 4294967295, %s552_s14   ;;  %s591_s16 = sadd.s32 1, %s552_s14   ;;  %s552_s14 = sphi %s578_s14, %s668_s14   ;;  %s548_s13 = sphi %s576_s13, %s667_s13   ;;  %s544_s12 = sphi %s574_s12, %s666_s12  }
   0x3   : > { %s43_s17 = ssub.s32 %s552_s14, %s591_s16  ;;  %s46_s18 = sadd.s32 1, %s548_s13 }
   0x4   : > { %p44_p0 = scmp.eq.s32.totalorder %s43_s17, 0  ;;  %p53_p1 = scmp.ne.s32.totalorder %s548_s13, %s544_s12 }
   0x5   : > { %p54_p2 = scmp.eq.s32.totalorder %s552_s14, 0  ;;  %p445_p4 = scmp.ge.s32.totalorder %s552_s14, 2 }
   0x6   : > { %s600_s19 = scalar_select %p44_p0, %s548_s13, %s46_s18  }
   0x7   : > { %p55_p3 = por %p54_p2, %p53_p1  ;;  %129 = sbr.rel (%p445_p4) target bundleno = 23 (0x17), region = 20 }
   0xe   : > { %140 = sbr.rel (!%p55_p3) target bundleno = 23 (0x17), region = 28  ;;  %s142_s20 = sand.u32 (%p55_p3), 1, %s548_s13  }
   0xf   : > { %s465_s21 = sshll.u32 (%p55_p3), %s552_s14, 6  ;;  %s446_s22 = sshll.u32 (%p55_p3), %s142_s20, 5 }
  0x10   : > { %s394_s25 = scalar_lea.vmem (%p55_p3), %s663_s1, %s465_s21  ;;  %s144_s26 = scalar_lea.vmem (%p55_p3), [#allocation2], %s446_s22 }
  0x11   : > { %v449_v0 = vld [vmem:[%s394_s25 + $0x4] sm:$0xf] (%p55_p3)  ;;  %v450_v1 = vld [vmem:[%s394_s25 + $0xc] sm:$0xf] (%p55_p3)  ;;  %v451_v2 = vld [vmem:[%s394_s25 + $0x14] sm:$0xf] (%p55_p3) }
  0x12   : > { %165 = vst [vmem:[%s144_s26] sm:$0xf] (%p55_p3), %v449_v0  ;;  %167 = vst [vmem:[%s144_s26 + $0x4] sm:$0xf] (%p55_p3), %v450_v1  ;;  %v452_v3 = vld [vmem:[%s394_s25 + $0x1c] sm:$0xf] (%p55_p3) }
  0x13   : > { %v453_v4 = vld [vmem:[%s394_s25 + $0x24] sm:$0xf] (%p55_p3)  ;;  %169 = vst [vmem:[%s144_s26 + $0x8] sm:$0xf] (%p55_p3), %v451_v2  ;;  %171 = vst [vmem:[%s144_s26 + $0xc] sm:$0xf] (%p55_p3), %v452_v3 }
  0x14   : > { %173 = vst [vmem:[%s144_s26 + $0x10] sm:$0xf] (%p55_p3), %v453_v4  ;;  %v454_v5 = vld [vmem:[%s394_s25 + $0x2c] sm:$0xf] (%p55_p3)  ;;  %v455_v6 = vld [vmem:[%s394_s25 + $0x34] sm:$0xf] (%p55_p3) }
  0x15   : > { %v456_v7 = vld [vmem:[%s394_s25 + $0x3c] sm:$0xf]  ;;  %175 = vst [vmem:[%s144_s26 + $0x14] sm:$0xf] %v454_v5  ;;  %177 = vst [vmem:[%s144_s26 + $0x18] sm:$0xf] %v455_v6 }
  0x16   : > { %179 = vst [vmem:[%s144_s26 + $0x1c] sm:$0xf] %v456_v7 }
  0x17 PF: > { %p457_p5 = scmp.ge.s32.totalorder %s552_s14, 1  ;;  %p217_p6 = scmp.lt.s32.totalorder %s552_s14, 3 }
  0x19   : > { %p218_p7 = pnand %p457_p5, %p217_p6 }
  0x1a   : > { %s224_s27 = sand.u32 (!%p218_p7), 1, %s544_s12   ;;  %p252_p8 = scmp.lt.s32.totalorder (!%p218_p7), %s442_s15, 1  ;;  %v279_v8 = vlaneseq (!%p218_p7)  ;;  %v262_v9 = vld [vmem:[%s664_s2] sm:$0xf] (!%p218_p7) }
  0x1b   : > { %221 = sbr.rel (%p218_p7) target bundleno = 54 (0x36), region = 69  ;;  %s458_s28 = sshll.u32 (!%p218_p7), %s224_s27, 5 }
  0x1c   : > { %v280_v10 = vshrl.u32 (!%p218_p7), %v279_v8, 7  ;;  %s226_s4 = scalar_lea.vmem (!%p218_p7), [#allocation2], %s458_s28 }
  0x1d   : > { %v485_v11 = vld [vmem:[%s226_s4] sm:$0xff] (!%p218_p7)   ;;  %v503_v12 = vld [vmem:[%s226_s4 + $0x8] sm:$0xff] (!%p218_p7)   ;;  %v504_v13 = vld [vmem:[%s226_s4 + $0x10] sm:$0xff] (!%p218_p7)  }
  0x1e   : > { %v281_v14 = vsub.s32 (!%p218_p7), 0, %v280_v10  ;;  %v293_v15 = vsub.s32 (!%p218_p7), 1, %v280_v10  ;;  %v486_v16 = vunpack.c.l.bf16 (!%p218_p7), %v485_v11  ;;  %v321_v17 = vsub.s32 (!%p218_p7), 2, %v280_v10  ;;  %v620_v18 = vld [vmem:[%s226_s4 + $0x18] sm:$0xff] (!%p218_p7)  }
  0x1f   : > { %v341_v19 = vsub.s32 (!%p218_p7), 3, %v280_v10  ;;  %v487_v20 = vunpack.c.h.bf16 (!%p218_p7), %v485_v11  ;;  %v490_v21 = vunpack.c.l.bf16 (!%p218_p7), %v503_v12  ;;  %v491_v22 = vunpack.c.h.bf16 (!%p218_p7), %v503_v12 }
  0x20   : > { %v282_v23 = vrot.slane (!%p218_p7), %v262_v9, %v281_v14  ;;  %v294_v24 = vrot.slane (!%p218_p7), %v262_v9, %v293_v15  ;;  %v626_v25 = vrot.slane (!%p218_p7), %v262_v9, %v321_v17  ;;  %v494_v26 = vunpack.c.l.bf16 (!%p218_p7), %v504_v13 }
  0x21   : > { %v628_v28 = vrot.slane (!%p218_p7), %v262_v9, %v341_v19  ;;  %v495_v31 = vunpack.c.h.bf16 (!%p218_p7), %v504_v13  ;;  %v498_v32 = vunpack.c.l.bf16 (!%p218_p7), %v620_v18  ;;  %v499_v33 = vunpack.c.h.bf16 (!%p218_p7), %v620_v18 }
  0x22   : > { %s670_s15 = smov (!%p252_p8, %s442_s15), 1  ;;  %v323_v35 = vmul.f32 %v486_v16, %v626_v25  ;;  %v324_v37 = vmul.f32 %v487_v20, %v626_v25  ;;  %v325_v39 = vmul.f32 %v490_v21, %v626_v25  ;;  %v326_v41 = vmul.f32 %v491_v22, %v626_v25 }
  0x23   : > { %s466_s5 = sshll.u32 %s670_s15, 5  ;;  %v327_v46 = vmul.f32 %v494_v26, %v626_v25  ;;  %v328_v50 = vmul.f32 %v495_v31, %v626_v25  ;;  %v329_v58 = vmul.f32 %v498_v32, %v626_v25  ;;  %s467_s9 = sshll.u32 %s670_s15, 6  ;;  %v330_v21 = vmul.f32 %v499_v33, %v626_v25 }
  0x24   : > { %s256_s8 = scalar_lea.vmem %s662_s0, %s466_s5  ;;  %s261_s12 = scalar_lea.vmem %s665_s3, %s467_s9 }
  0x25   : > { %v469_v27 = vld [vmem:[%s256_s8] sm:$0xff]   ;;  %v500_v29 = vld [vmem:[%s256_s8 + $0x8] sm:$0xff]   ;;  %v501_v30 = vld [vmem:[%s256_s8 + $0x10] sm:$0xff]  }
  0x26   : > { %v470_v34 = vunpack.c.l.bf16 %v469_v27  ;;  %v471_v36 = vunpack.c.h.bf16 %v469_v27  ;;  %v474_v38 = vunpack.c.l.bf16 %v500_v29  ;;  %v475_v40 = vunpack.c.h.bf16 %v500_v29  ;;  %v502_v42 = vld [vmem:[%s256_s8 + $0x18] sm:$0xff]  }
  0x27   : > { %v478_v45 = vunpack.c.l.bf16 %v501_v30  ;;  %v479_v49 = vunpack.c.h.bf16 %v501_v30  ;;  %v482_v54 = vunpack.c.l.bf16 %v502_v42  ;;  %v483_v2 = vunpack.c.h.bf16 %v502_v42 }
  0x28   : > { %v283_v43 = vmul.f32 %v470_v34, %v282_v23  ;;  %v284_v44 = vmul.f32 %v471_v36, %v282_v23  ;;  %v285_v47 = vmul.f32 %v474_v38, %v282_v23  ;;  %v286_v48 = vmul.f32 %v475_v40, %v282_v23 }
  0x29   : > { %v287_v53 = vmul.f32 %v478_v45, %v282_v23  ;;  %v288_v57 = vmul.f32 %v479_v49, %v282_v23  ;;  %v289_v62 = vmul.f32 %v482_v54, %v282_v23  ;;  %v290_v10 = vmul.f32 %v483_v2, %v282_v23 }
  0x2a   : > { %v295_v51 = vadd.f32 %v294_v24, %v283_v43  ;;  %v296_v52 = vadd.f32 %v294_v24, %v284_v44  ;;  %v297_v55 = vadd.f32 %v294_v24, %v285_v47  ;;  %v298_v56 = vadd.f32 %v294_v24, %v286_v48 }
  0x2b   : > { %v299_v61 = vadd.f32 %v294_v24, %v287_v53  ;;  %v300_v1 = vadd.f32 %v294_v24, %v288_v57  ;;  %v301_v6 = vadd.f32 %v294_v24, %v289_v62  ;;  %v302_v18 = vadd.f32 %v294_v24, %v290_v10 }
  0x2c   : > { %v331_v59 = vadd.f32 %v323_v35, %v295_v51  ;;  %v332_v60 = vadd.f32 %v324_v37, %v296_v52  ;;  %v333_v63 = vadd.f32 %v325_v39, %v297_v55  ;;  %v334_v0 = vadd.f32 %v326_v41, %v298_v56 }
  0x2d   : > { %v335_v5 = vadd.f32 %v327_v46, %v299_v61  ;;  %v336_v9 = vadd.f32 %v328_v50, %v300_v1  ;;  %v337_v14 = vadd.f32 %v329_v58, %v301_v6  ;;  %v338_v26 = vadd.f32 %v330_v21, %v302_v18 }
  0x2e   : > { %v343_v3 = vadd.f32 %v628_v28, %v331_v59  ;;  %v344_v4 = vadd.f32 %v628_v28, %v332_v60  ;;  %v345_v7 = vadd.f32 %v628_v28, %v333_v63  ;;  %v346_v8 = vadd.f32 %v628_v28, %v334_v0 }
  0x2f   : > { %v347_v13 = vadd.f32 %v628_v28, %v335_v5  ;;  %v348_v17 = vadd.f32 %v628_v28, %v336_v9  ;;  %v349_v20 = vadd.f32 %v628_v28, %v337_v14  ;;  %v350_v27 = vadd.f32 %v628_v28, %v338_v26 }
  0x30   : > { %v351_v11 = vmax.f32 %v343_v3, 0.0  ;;  %v352_v12 = vmax.f32 %v344_v4, 0.0  ;;  %v353_v15 = vmax.f32 %v345_v7, 0.0  ;;  %v354_v16 = vmax.f32 %v346_v8, 0.0 }
  0x31   : > { %v355_v19 = vmax.f32 %v347_v13, 0.0  ;;  %v356_v22 = vmax.f32 %v348_v17, 0.0  ;;  %v357_v23 = vmax.f32 %v349_v20, 0.0  ;;  %v358_v29 = vmax.f32 %v350_v27, 0.0 }
  0x32   : > { %359 = vst [vmem:[%s261_s12] sm:$0xff] %v351_v11  ;;  %360 = vst [vmem:[%s261_s12 + $0x8] sm:$0xff] %v352_v12 }
  0x33   : > { %361 = vst [vmem:[%s261_s12 + $0x10] sm:$0xff] %v353_v15  ;;  %362 = vst [vmem:[%s261_s12 + $0x18] sm:$0xff] %v354_v16 }
  0x34   : > { %363 = vst [vmem:[%s261_s12 + $0x20] sm:$0xff] %v355_v19  ;;  %364 = vst [vmem:[%s261_s12 + $0x28] sm:$0xff] %v356_v22 }
  0x35   : > { %365 = vst [vmem:[%s261_s12 + $0x30] sm:$0xff] %v357_v23  ;;  %366 = vst [vmem:[%s261_s12 + $0x38] sm:$0xff] %v358_v29 }
  0x36 PF: > { %p10_p9 = scmp.ge.s32.totalorder %s591_s16, 4   ;;  %s666_s12 = smov %s548_s13 }
  0x37   : > { %s667_s13 = smov %s600_s19  ;;  %s668_s14 = smov %s591_s16 }
  0x38   :  { %12 = sbr.rel (!%p10_p9) target bundleno = 2 (0x2), region = 111 }

// kernel: resblock_forward.3
= control target key start
LH: loop header
LB: loop body
LE: loop exit
PB: predicated region body
PF: predicated region fallthrough
CT: control target
= control target key end

     0   :  { %s2876_s15 = smov 0   ;;  %s3545_s0 = inlined_call_operand.vmem [shape: bf16[2,9,9,512], index: 0, kind: input, shape index: {}]   ;;  %s3546_s1 = inlined_call_operand.vmem [shape: bf16[1152,256], index: 1, kind: input, shape index: {}]   ;;  %s3547_s2 = inlined_call_operand.vmem [shape: bf16[2,8,8,256], index: 2, kind: output, shape index: {0}]   ;;  %s3548_s3 = inlined_call_operand.vmem [shape: f32[2,1,256], index: 3, kind: output, shape index: {1}]   ;;  %s3549_s4 = inlined_call_operand.vmem [shape: f32[2,1,256], index: 4, kind: output, shape index: {2}]  }
   0x1 LB: > { %s2253_s16 = sadd.s32 4294967295, %s2847_s15   ;;  %p2257_p0 = scmp.ge.s32.totalorder %s2847_s15, 1  ;;  %s2847_s15 = sphi %s2876_s15, %s15_s15  }
   0x2   : > { %p167_p1 = scmp.lt.s32.totalorder %s2847_s15, 3 }
   0x4   : > { %p168_p2 = pnand %p2257_p0, %p167_p1 }
   0x5   : > { %v2601_v0 = vld [vmem:[%s3546_s1 + $0x4] ss:$8 sps:$4 sm:$0xff] (!%p168_p2)   ;;  %v2605_v2 = vld [vmem:[%s3546_s1] ss:$8 sps:$4 sm:$0xff] (!%p168_p2)   ;;  %v2607_v4 = vld [vmem:[%s3546_s1 + $0x14] ss:$8 sps:$4 sm:$0xff] (!%p168_p2)  }
   0x6   : > { %171 = sbr.rel (%p168_p2) target bundleno = 423 (0x1a7), region = 28  ;;  %v2603_v1 = vld [vmem:[%s3546_s1 + $0x204] ss:$8 sps:$4 sm:$0xff] (!%p168_p2)   ;;  %1589 = vmatprep.subr.bf16.mxu1 (!%p168_p2), %v2601_v0  ;;  %v2606_v3 = vld [vmem:[%s3546_s1 + $0x200] ss:$8 sps:$4 sm:$0xff] (!%p168_p2)   ;;  %p201_p3 = scmp.lt.s32.totalorder (!%p168_p2), %s2253_s16, 1 }
   0x7   : > { %1735 = vmatprep.subr.bf16.mxu0 (!%p168_p2), %v2603_v1  ;;  %1590 = vmatpush1.bf16.msra.mxu1 (!%p168_p2), %v2605_v2  ;;  %v2609_v5 = vld [vmem:[%s3546_s1 + $0x214] ss:$8 sps:$4 sm:$0xff] (!%p168_p2)   ;;  %v2611_v6 = vld [vmem:[%s3546_s1 + $0x10] ss:$8 sps:$4 sm:$0xff] (!%p168_p2)   ;;  %v2613_v8 = vld [vmem:[%s3546_s1 + $0x24] ss:$8 sps:$4 sm:$0xff] (!%p168_p2)  }
   0x8   : > { %1736 = vmatpush1.bf16.msra.mxu0 (!%p168_p2), %v2606_v3  ;;  %1591 = vmatprep.subr.bf16.mxu1 (!%p168_p2), %v2607_v4  ;;  %v2612_v7 = vld [vmem:[%s3546_s1 + $0x210] ss:$8 sps:$4 sm:$0xff] (!%p168_p2)   ;;  %v2615_v9 = vld [vmem:[%s3546_s1 + $0x224] ss:$8 sps:$4 sm:$0xff] (!%p168_p2)   ;;  %v2617_v10 = vld [vmem:[%s3546_s1 + $0x20] ss:$8 sps:$4 sm:$0xff] (!%p168_p2)  }
   0x9   : > { %1737 = vmatprep.subr.bf16.mxu0 (!%p168_p2), %v2609_v5  ;;  %v2618_v11 = vld [vmem:[%s3546_s1 + $0x220] ss:$8 sps:$4 sm:$0xff] (!%p168_p2)   ;;  %v2619_v12 = vld [vmem:[%s3546_s1 + $0x34] ss:$8 sps:$4 sm:$0xff] (!%p168_p2)   ;;  %v2623_v14 = vld [vmem:[%s3546_s1 + $0x30] ss:$8 sps:$4 sm:$0xff] (!%p168_p2)  }
   0xa   : > { %v2621_v13 = vld [vmem:[%s3546_s1 + $0x234] ss:$8 sps:$4 sm:$0xff] (!%p168_p2)   ;;  %v2624_v15 = vld [vmem:[%s3546_s1 + $0x230] ss:$8 sps:$4 sm:$0xff] (!%p168_p2)   ;;  %v2625_v16 = vld [vmem:[%s3546_s1 + $0x44] ss:$8 sps:$4 sm:$0xff] (!%p168_p2)  }
   0xb   : > { %1592 = vmatpush1.bf16.msra.mxu1 (!%p168_p2), %v2611_v6  ;;  %v2627_v17 = vld [vmem:[%s3546_s1 + $0x244] ss:$8 sps:$4 sm:$0xff] (!%p168_p2)   ;;  %v2629_v18 = vld [vmem:[%s3546_s1 + $0x40] ss:$8 sps:$4 sm:$0xff] (!%p168_p2)   ;;  %v2631_v20 = vld [vmem:[%s3546_s1 + $0x54] ss:$8 sps:$4 sm:$0xff] (!%p168_p2)  }
   0xc   : > { %1738 = vmatpush1.bf16.msra.mxu0 (!%p168_p2), %v2612_v7  ;;  %1593 = vmatprep.subr.bf16.mxu1 (!%p168_p2), %v2613_v8  ;;  %v2630_v19 = vld [vmem:[%s3546_s1 + $0x240] ss:$8 sps:$4 sm:$0xff] (!%p168_p2)   ;;  %v2633_v21 = vld [vmem:[%s3546_s1 + $0x254] ss:$8 sps:$4 sm:$0xff] (!%p168_p2)   ;;  %v2635_v22 = vld [vmem:[%s3546_s1 + $0x50] ss:$8 sps:$4 sm:$0xff] (!%p168_p2)  }
   0xd   : > { %1739 = vmatprep.subr.bf16.mxu0 %v2615_v9  ;;  %v2636_v23 = vld [vmem:[%s3546_s1 + $0x250] ss:$8 sps:$4 sm:$0xff]   ;;  %v2637_v24 = vld [vmem:[%s3546_s1 + $0x64] ss:$8 sps:$4 sm:$0xff]   ;;  %v2641_v26 = vld [vmem:[%s3546_s1 + $0x60] ss:$8 sps:$4 sm:$0xff]  }
   0xe   : > { %v2639_v25 = vld [vmem:[%s3546_s1 + $0x264] ss:$8 sps:$4 sm:$0xff]   ;;  %v2642_v27 = vld [vmem:[%s3546_s1 + $0x260] ss:$8 sps:$4 sm:$0xff]   ;;  %v2643_v28 = vld [vmem:[%s3546_s1 + $0x74] ss:$8 sps:$4 sm:$0xff]  }
   0xf   : > { %1594 = vmatpush1.bf16.msra.mxu1 %v2617_v10  ;;  %v2645_v29 = vld [vmem:[%s3546_s1 + $0x274] ss:$8 sps:$4 sm:$0xff]   ;;  %v2647_v30 = vld [vmem:[%s3546_s1 + $0x70] ss:$8 sps:$4 sm:$0xff]   ;;  %v2649_v32 = vld [vmem:[%s3546_s1 + $0x84] ss:$8 sps:$4 sm:$0xff]  }
  0x10   : > { %1740 = vmatpush1.bf16.msra.mxu0 %v2618_v11  ;;  %1595 = vmatprep.subr.bf16.mxu1 %v2619_v12  ;;  %v2648_v31 = vld [vmem:[%s3546_s1 + $0x270] ss:$8 sps:$4 sm:$0xff]   ;;  %v2651_v33 = vld [vmem:[%s3546_s1 + $0x284] ss:$8 sps:$4 sm:$0xff]   ;;  %v2653_v34 = vld [vmem:[%s3546_s1 + $0x80] ss:$8 sps:$4 sm:$0xff]  }
  0x11   : > { %1741 = vmatprep.subr.bf16.mxu0 %v2621_v13  ;;  %v2654_v35 = vld [vmem:[%s3546_s1 + $0x280] ss:$8 sps:$4 sm:$0xff]   ;;  %v2655_v36 = vld [vmem:[%s3546_s1 + $0x94] ss:$8 sps:$4 sm:$0xff]   ;;  %s3551_s16 = smov (!%p201_p3, %s2253_s16), 1 }
  0x12   : > { %v2657_v37 = vld [vmem:[%s3546_s1 + $0x294] ss:$8 sps:$4 sm:$0xff]   ;;  %v2659_v38 = vld [vmem:[%s3546_s1 + $0x90] ss:$8 sps:$4 sm:$0xff]   ;;  %v2661_v40 = vld [vmem:[%s3546_s1 + $0xa4] ss:$8 sps:$4 sm:$0xff]  }
  0x13   : > { %1596 = vmatpush1.bf16.msra.mxu1 %v2623_v14  ;;  %v2660_v39 = vld [vmem:[%s3546_s1 + $0x290] ss:$8 sps:$4 sm:$0xff]   ;;  %v2663_v41 = vld [vmem:[%s3546_s1 + $0x2a4] ss:$8 sps:$4 sm:$0xff]   ;;  %s2590_s29 = smul.u32 288, %s3551_s16  ;;  %s2501_s28 = sshll.u32 %s3551_s16, 6 }
  0x14   : > { %1742 = vmatpush1.bf16.msra.mxu0 %v2624_v15  ;;  %1597 = vmatprep.subr.bf16.mxu1 %v2625_v16  ;;  %v2665_v42 = vld [vmem:[%s3546_s1 + $0xa0] ss:$8 sps:$4 sm:$0xff]   ;;  %v2667_v44 = vld [vmem:[%s3546_s1 + $0xb4] ss:$8 sps:$4 sm:$0xff]   ;;  %v2671_v46 = vld [vmem:[%s3546_s1 + $0xb0] ss:$8 sps:$4 sm:$0xff]   ;;  %s3516_s5 = scalar_lea.vmem %s3547_s2, %s2501_s28 }
  0x15   : > { %1743 = vmatprep.subr.bf16.mxu0 %v2627_v17  ;;  %v2666_v43 = vld [vmem:[%s3546_s1 + $0x2a0] ss:$8 sps:$4 sm:$0xff]   ;;  %v2669_v45 = vld [vmem:[%s3546_s1 + $0x2b4] ss:$8 sps:$4 sm:$0xff]   ;;  %s3032_s14 = scalar_lea.vmem %s3545_s0, %s2590_s29  ;;  %v2672_v47 = vld [vmem:[%s3546_s1 + $0x2b0] ss:$8 sps:$4 sm:$0xff]  }
  0x16   : > { %v228_v48 = vld [vmem:[%s3032_s14 + $0x4] sm:$0xf]  ;;  %v3049_v53 = vld [vmem:[%s3032_s14 + $0x8] sm:$0xf]  ;;  %v260_v55 = vld [vmem:[%s3032_s14 + $0x18] sm:$0x1] }
  0x17   : > { %1598 = vmatpush1.bf16.msra.mxu1 %v2629_v18  ;;  %v229_v49 = vld [vmem:[%s3032_s14 + $0x24] sm:$0xf]  ;;  %v3052_v54 = vld [vmem:[%s3032_s14 + $0x28] sm:$0xf]  ;;  %v261_v56 = vld [vmem:[%s3032_s14 + $0x38] sm:$0x1]  ;;  %v2295_v57 = vcombine.low %v3049_v53, %v260_v55 }
  0x18   : > { %1744 = vmatpush1.bf16.msra.mxu0 %v2630_v19  ;;  %1599 = vmatprep.subr.bf16.mxu1 %v2631_v20  ;;  %v2673_v50 = vld [vmem:[%s3546_s1 + $0xc4] ss:$8 sps:$4 sm:$0xff]   ;;  %v2312_v52 = vcombine.low %v228_v48, %v229_v49  ;;  %v2296_v58 = vcombine.low %v3052_v54, %v261_v56  ;;  %v2677_v59 = vld [vmem:[%s3546_s1 + $0xc0] ss:$8 sps:$4 sm:$0xff]   ;;  %v2679_v1 = vld [vmem:[%s3546_s1 + $0xd4] ss:$8 sps:$4 sm:$0xff]  }
  0x19   : > { %1745 = vmatprep.subr.bf16.mxu0 %v2633_v21  ;;  %v2675_v51 = vld [vmem:[%s3546_s1 + $0x2c4] ss:$8 sps:$4 sm:$0xff]   ;;  %v2678_v60 = vld [vmem:[%s3546_s1 + $0x2c0] ss:$8 sps:$4 sm:$0xff]   ;;  %v430_v61 = vshrl.u32 %v2295_v57, 16  ;;  %v432_v62 = vshll.u32 %v2295_v57, 16 }
  0x1a   : > { %1621 = vmatprep.mubr.bf16.mxu1 %v2312_v52  ;;  %v437_v63 = vshrl.u32 %v2296_v58, 16  ;;  %v439_v0 = vshll.u32 %v2296_v58, 16  ;;  %v2681_v2 = vld [vmem:[%s3546_s1 + $0x2d4] ss:$8 sps:$4 sm:$0xff]   ;;  %v2683_v5 = vld [vmem:[%s3546_s1 + $0xd0] ss:$8 sps:$4 sm:$0xff]  }
  0x1b   : > { %1600 = vmatpush1.bf16.msra.mxu1 %v2635_v22  ;;  %v434_v3 = vrot.slane %v432_v62, 1  ;;  %v2684_v6 = vld [vmem:[%s3546_s1 + $0x2d0] ss:$8 sps:$4 sm:$0xff]   ;;  %v2685_v7 = vld [vmem:[%s3546_s1 + $0xe4] ss:$8 sps:$4 sm:$0xff]   ;;  %s2261_s6 = sshll.u32 %s3551_s16, 1 }
  0x1c   : > { %1746 = vmatpush1.bf16.msra.mxu0 %v2636_v23  ;;  %1601 = vmatprep.subr.bf16.mxu1 %v2637_v24  ;;  %v441_v4 = vrot.slane %v439_v0, 1  ;;  %v2687_v10 = vld [vmem:[%s3546_s1 + $0x2e4] ss:$8 sps:$4 sm:$0xff]   ;;  %v2689_v12 = vld [vmem:[%s3546_s1 + $0xe0] ss:$8 sps:$4 sm:$0xff]   ;;  %s214_s9 = scalar_lea.vmem %s3548_s3, %s2261_s6  ;;  %s218_s12 = scalar_lea.vmem %s3549_s4, %s2261_s6 }
  0x1d   : > { %1747 = vmatprep.subr.bf16.mxu0 %v2639_v25  ;;  %v435_v8 = vor.u32 %v434_v3, %v430_v61  ;;  %v2690_v13 = vld [vmem:[%s3546_s1 + $0x2e0] ss:$8 sps:$4 sm:$0xff]   ;;  %v2691_v14 = vld [vmem:[%s3546_s1 + $0xf4] ss:$8 sps:$4 sm:$0xff]   ;;  %v2695_v16 = vld [vmem:[%s3546_s1 + $0xf0] ss:$8 sps:$4 sm:$0xff]  }
  0x1e   : > { %v442_v9 = vor.u32 %v441_v4, %v437_v63  ;;  %v2693_v15 = vld [vmem:[%s3546_s1 + $0x2f4] ss:$8 sps:$4 sm:$0xff]   ;;  %v2696_v17 = vld [vmem:[%s3546_s1 + $0x2f0] ss:$8 sps:$4 sm:$0xff]   ;;  %v2699_v18 = vld [vmem:[%s3546_s1 + $0x104] ss:$8 sps:$4 sm:$0xff]  }
  0x1f   : > { %1602 = vmatpush1.bf16.msra.mxu1 %v2641_v26  ;;  %v3104_v19 = vld [vmem:[%s3032_s14] sm:$0xf]  ;;  %v252_v21 = vld [vmem:[%s3032_s14 + $0xc] sm:$0xf]  ;;  %v2733_v63 = vld [vmem:[%s3546_s1 + $0x154] ss:$8 sps:$4 sm:$0xff]  }
  0x20   : > { %1748 = vmatpush1.bf16.msra.mxu0 %v2642_v27  ;;  %1603 = vmatprep.subr.bf16.mxu1 %v2643_v28  ;;  %v2316_v11 = vcombine.low %v435_v8, %v442_v9  ;;  %v3107_v20 = vld [vmem:[%s3032_s14 + $0x20] sm:$0xf]  ;;  %v253_v22 = vld [vmem:[%s3032_s14 + $0x2c] sm:$0xf]  ;;  %v2709_v28 = vld [vmem:[%s3546_s1 + $0x114] ss:$8 sps:$4 sm:$0xff]  }
  0x21   : > { %1749 = vmatprep.subr.bf16.mxu0 %v2645_v29  ;;  %v2704_v23 = vld [vmem:[%s3546_s1 + $0x304] ss:$8 sps:$4 sm:$0xff]   ;;  %v2697_v24 = vld [vmem:[%s3546_s1 + $0x100] ss:$8 sps:$4 sm:$0xff]   ;;  %v2311_v25 = vcombine.low %v3104_v19, %v3107_v20  ;;  %v2315_v26 = vcombine.low %v252_v21, %v253_v22  ;;  %v2712_v29 = vld [vmem:[%s3546_s1 + $0x314] ss:$8 sps:$4 sm:$0xff]  }
  0x22   : > { %1767 = vmatprep.mubr.bf16.mxu0 %v2316_v11  ;;  %v2702_v27 = vld [vmem:[%s3546_s1 + $0x300] ss:$8 sps:$4 sm:$0xff]   ;;  %v2736_v0 = vld [vmem:[%s3546_s1 + $0x354] ss:$8 sps:$4 sm:$0xff]   ;;  %v2734_v3 = vld [vmem:[%s3546_s1 + $0x350] ss:$8 sps:$4 sm:$0xff]  }
  0x23   : > { %1604 = vmatpush1.bf16.msra.mxu1 %v2647_v30  ;;  %v2707_v30 = vld [vmem:[%s3546_s1 + $0x110] ss:$8 sps:$4 sm:$0xff]   ;;  %v3170_v48 = vld [vmem:[%s3032_s14 + $0x40] sm:$0xf]  ;;  %v255_v8 = vld [vmem:[%s3032_s14 + $0x6c] sm:$0xf] }
  0x24   : > { %1750 = vmatpush1.bf16.msra.mxu0 %v2648_v31  ;;  %1605 = vmatprep.subr.bf16.mxu1 %v2649_v32  ;;  %v2710_v31 = vld [vmem:[%s3546_s1 + $0x310] ss:$8 sps:$4 sm:$0xff]   ;;  %v2715_v32 = vld [vmem:[%s3546_s1 + $0x124] ss:$8 sps:$4 sm:$0xff]   ;;  %v3173_v49 = vld [vmem:[%s3032_s14 + $0x60] sm:$0xf] }
  0x25   : > { %1751 = vmatprep.subr.bf16.mxu0 %v2651_v33  ;;  %v2718_v33 = vld [vmem:[%s3546_s1 + $0x324] ss:$8 sps:$4 sm:$0xff]   ;;  %v2320_v55 = vcombine.low %v3170_v48, %v3173_v49  ;;  %v2728_v61 = vld [vmem:[%s3546_s1 + $0x340] ss:$8 sps:$4 sm:$0xff]  }
  0x26   : > { %v2742_v9 = vld [vmem:[%s3546_s1 + $0x364] ss:$8 sps:$4 sm:$0xff]   ;;  %v3222_v22 = vld [vmem:[%s3032_s14 + $0x80] sm:$0xf] }
  0x27   : > { %1606 = vmatpush1.bf16.msra.mxu1 %v2653_v34  ;;  %v2713_v34 = vld [vmem:[%s3546_s1 + $0x120] ss:$8 sps:$4 sm:$0xff]   ;;  %v233_v11 = vld [vmem:[%s3032_s14 + $0xa4] sm:$0xf] }
  0x28   : > { %1752 = vmatpush1.bf16.msra.mxu0 %v2654_v35  ;;  %1607 = vmatprep.subr.bf16.mxu1 %v2655_v36  ;;  %v2716_v35 = vld [vmem:[%s3546_s1 + $0x320] ss:$8 sps:$4 sm:$0xff]   ;;  %v2721_v36 = vld [vmem:[%s3546_s1 + $0x134] ss:$8 sps:$4 sm:$0xff]  }
  0x29   : > { %1753 = vmatprep.subr.bf16.mxu0 %v2657_v37  ;;  %v2724_v37 = vld [vmem:[%s3546_s1 + $0x334] ss:$8 sps:$4 sm:$0xff]  }
  0x2b   : > { %1608 = vmatpush1.bf16.msra.mxu1 %v2659_v38  ;;  %v2719_v38 = vld [vmem:[%s3546_s1 + $0x130] ss:$8 sps:$4 sm:$0xff]  }
  0x2c   : > { %1754 = vmatpush1.bf16.msra.mxu0 %v2660_v39  ;;  %1609 = vmatprep.subr.bf16.mxu1 %v2661_v40  ;;  %v2722_v39 = vld [vmem:[%s3546_s1 + $0x330] ss:$8 sps:$4 sm:$0xff]   ;;  %v230_v40 = vld [vmem:[%s3032_s14 + $0x44] sm:$0xf] }
  0x2d   : > { %1755 = vmatprep.subr.bf16.mxu0 %v2663_v41  ;;  %v231_v41 = vld [vmem:[%s3032_s14 + $0x64] sm:$0xf] }
  0x2f   : > { %1610 = vmatpush1.bf16.msra.mxu1 %v2665_v42  ;;  %v2321_v42 = vcombine.low %v230_v40, %v231_v41  ;;  %v256_v40 = vld [vmem:[%s3032_s14 + $0x8c] sm:$0xf] }
  0x30   : > { %1756 = vmatpush1.bf16.msra.mxu0 %v2666_v43  ;;  %1611 = vmatprep.subr.bf16.mxu1 %v2667_v44  ;;  %v3161_v43 = vld [vmem:[%s3032_s14 + $0x48] sm:$0xf]  ;;  %v257_v41 = vld [vmem:[%s3032_s14 + $0xac] sm:$0xf] }
  0x31   : > { %1757 = vmatprep.subr.bf16.mxu0 %v2669_v45  ;;  %v3164_v44 = vld [vmem:[%s3032_s14 + $0x68] sm:$0xf]  ;;  %v262_v45 = vld [vmem:[%s3032_s14 + $0x58] sm:$0x1] }
  0x33   : > { %1612 = vmatpush1.bf16.msra.mxu1 %v2671_v46  ;;  %v263_v46 = vld [vmem:[%s3032_s14 + $0x78] sm:$0x1] }
  0x34   : > { %1758 = vmatpush1.bf16.msra.mxu0 %v2672_v47  ;;  %1613 = vmatprep.subr.bf16.mxu1 %v2673_v50  ;;  %v2297_v47 = vcombine.low %v3161_v43, %v262_v45  ;;  %v2727_v50 = vld [vmem:[%s3546_s1 + $0x144] ss:$8 sps:$4 sm:$0xff]   ;;  %v2298_v52 = vcombine.low %v3164_v44, %v263_v46  ;;  %v2749_v46 = vld [vmem:[%s3546_s1 + $0x180] ss:$8 sps:$4 sm:$0xff]  }
  0x35   : > { %1759 = vmatprep.subr.bf16.mxu0 %v2675_v51  ;;  %v2730_v51 = vld [vmem:[%s3546_s1 + $0x344] ss:$8 sps:$4 sm:$0xff]  }
  0x36   : > { %v444_v56 = vshrl.u32 %v2297_v47, 16  ;;  %v446_v57 = vshll.u32 %v2297_v47, 16  ;;  %v451_v58 = vshrl.u32 %v2298_v52, 16  ;;  %v2752_v47 = vld [vmem:[%s3546_s1 + $0x380] ss:$8 sps:$4 sm:$0xff]  }
  0x37   : > { %1614 = vmatpush1.bf16.msra.mxu1 %v2677_v59  ;;  %v453_v59 = vshll.u32 %v2298_v52, 16 }
  0x38   : > { %1760 = vmatpush1.bf16.msra.mxu0 %v2678_v60  ;;  %1615 = vmatprep.subr.bf16.mxu1 %v2679_v1  ;;  %v2725_v60 = vld [vmem:[%s3546_s1 + $0x140] ss:$8 sps:$4 sm:$0xff]   ;;  %v448_v62 = vrot.slane %v446_v57, 1 }
  0x39   : > { %1761 = vmatprep.subr.bf16.mxu0 %v2681_v2  ;;  %v455_v1 = vrot.slane %v453_v59, 1  ;;  %v2731_v2 = vld [vmem:[%s3546_s1 + $0x150] ss:$8 sps:$4 sm:$0xff]   ;;  %v3265_v57 = vld [vmem:[%s3032_s14 + $0xc8] sm:$0xf] }
  0x3a   : > { %v449_v4 = vor.u32 %v448_v62, %v444_v56  ;;  %v266_v59 = vld [vmem:[%s3032_s14 + $0xd8] sm:$0x1]  ;;  %v3274_v62 = vld [vmem:[%s3032_s14 + $0xc0] sm:$0xf] }
  0x3b   : > { %1616 = vmatpush1.bf16.msra.mxu1 %v2683_v5  ;;  %v254_v5 = vld [vmem:[%s3032_s14 + $0x4c] sm:$0xf] }
  0x3c   : > { %1762 = vmatpush1.bf16.msra.mxu0 %v2684_v6  ;;  %1617 = vmatprep.subr.bf16.mxu1 %v2685_v7  ;;  %v2739_v6 = vld [vmem:[%s3546_s1 + $0x164] ss:$8 sps:$4 sm:$0xff]   ;;  %v456_v7 = vor.u32 %v455_v1, %v451_v58  ;;  %v3268_v58 = vld [vmem:[%s3032_s14 + $0xe8] sm:$0xf]  ;;  %v2760_v1 = vld [vmem:[%s3546_s1 + $0x394] ss:$8 sps:$4 sm:$0xff]  }
  0x3d   : > { %1763 = vmatprep.subr.bf16.mxu0 %v2687_v10  ;;  %v232_v10 = vld [vmem:[%s3032_s14 + $0x84] sm:$0xf] }
  0x3f   : > { %1618 = vmatpush1.bf16.msra.mxu1 %v2689_v12  ;;  %v2325_v12 = vcombine.low %v449_v4, %v456_v7 }
  0x40   : > { %1764 = vmatpush1.bf16.msra.mxu0 %v2690_v13  ;;  %1619 = vmatprep.subr.bf16.mxu1 %v2691_v14  ;;  %v2330_v13 = vcombine.low %v232_v10, %v233_v11  ;;  %v3213_v14 = vld [vmem:[%s3032_s14 + $0x88] sm:$0xf]  ;;  %v2758_v10 = vld [vmem:[%s3546_s1 + $0x390] ss:$8 sps:$4 sm:$0xff]  }
  0x41   : > { %1765 = vmatprep.subr.bf16.mxu0 %v2693_v15  ;;  %v3216_v15 = vld [vmem:[%s3032_s14 + $0xa8] sm:$0xf] }
  0x43   : > { %1620 = vmatpush1.bf16.msra.mxu1 %v2695_v16  ;;  %v264_v16 = vld [vmem:[%s3032_s14 + $0x98] sm:$0x1] }
  0x44   : > { %1766 = vmatpush1.bf16.msra.mxu0 %v2696_v17  ;;  %1662 = vmatprep.subr.bf16.mxu1 %v2699_v18  ;;  %v2324_v17 = vcombine.low %v254_v5, %v255_v8  ;;  %v265_v18 = vld [vmem:[%s3032_s14 + $0xb8] sm:$0x1]  ;;  %v2299_v21 = vcombine.low %v3213_v14, %v264_v16 }
  0x45   : > { %1808 = vmatprep.subr.bf16.mxu0 %v2704_v23  ;;  %v3225_v23 = vld [vmem:[%s3032_s14 + $0xa0] sm:$0xf] }
  0x46   : > { %1622 = vmatmul.mubr.bf16.vlgmr.msra.gmra.mrb[0].mxu1 %v2311_v25  ;;  %v2300_v25 = vcombine.low %v3216_v15, %v265_v18 }
  0x47   : > { %1768 = vmatmul.mubr.bf16.vlgmr.msra.gmra.mrb[0].mxu0 %v2315_v26  ;;  %1663 = vmatpush1.bf16.msra.mxu1 %v2697_v24  ;;  %v2737_v24 = vld [vmem:[%s3546_s1 + $0x160] ss:$8 sps:$4 sm:$0xff]   ;;  %v2329_v26 = vcombine.low %v3222_v22, %v3225_v23 }
  0x48   : > { %1809 = vmatpush1.bf16.msra.mxu0 %v2702_v27  ;;  %1664 = vmatprep.subr.bf16.mxu1 %v2709_v28  ;;  %v2740_v27 = vld [vmem:[%s3546_s1 + $0x360] ss:$8 sps:$4 sm:$0xff]   ;;  %v458_v28 = vshrl.u32 %v2299_v21, 16 }
  0x49   : > { %1810 = vmatprep.subr.bf16.mxu0 %v2712_v29  ;;  %1631 = vmatprep.mubr.bf16.mxu1 %v2321_v42  ;;  %v460_v29 = vshll.u32 %v2299_v21, 16  ;;  %v2754_v42 = vld [vmem:[%s3546_s1 + $0x384] ss:$8 sps:$4 sm:$0xff]  }
  0x4a   : > { %1777 = vmatprep.mubr.bf16.mxu0 %v2325_v12  ;;  %v259_v21 = vld [vmem:[%s3032_s14 + $0xec] sm:$0xf] }
  0x4b   : > { %1665 = vmatpush1.bf16.msra.mxu1 %v2707_v30  ;;  %v2745_v30 = vld [vmem:[%s3546_s1 + $0x174] ss:$8 sps:$4 sm:$0xff]  }
  0x4c   : > { %1811 = vmatpush1.bf16.msra.mxu0 %v2710_v31  ;;  %1666 = vmatprep.subr.bf16.mxu1 %v2715_v32  ;;  %v2748_v31 = vld [vmem:[%s3546_s1 + $0x374] ss:$8 sps:$4 sm:$0xff]   ;;  %v465_v32 = vshrl.u32 %v2300_v25, 16 }
  0x4d   : > { %1812 = vmatprep.subr.bf16.mxu0 %v2718_v33  ;;  %v467_v33 = vshll.u32 %v2300_v25, 16  ;;  %v2271_v25 = vld [vmem:[%s3032_s14 + $0x24] sm:$0xf] }
  0x4e   : > { %1632 = vmatmul.mubr.bf16.gmra.mrb[4].mxu1 %v2320_v55  ;;  %v2333_v55 = vcombine.low %v256_v40, %v257_v41  ;;  %v2781_v40 = vld [vmem:[%s3546_s1 + $0x1c0] ss:$8 sps:$4 sm:$0xff]  }
  0x4f   : > { %1667 = vmatpush1.bf16.msra.mxu1 %v2713_v34  ;;  %1641 = vmatprep.mubr.bf16.mxu1 %v2330_v13  ;;  %v2743_v34 = vld [vmem:[%s3546_s1 + $0x170] ss:$8 sps:$4 sm:$0xff]   ;;  %v2765_v13 = vld [vmem:[%s3546_s1 + $0x1a0] ss:$8 sps:$4 sm:$0xff]  }
  0x50   : > { %1813 = vmatpush1.bf16.msra.mxu0 %v2716_v35  ;;  %1668 = vmatprep.subr.bf16.mxu1 %v2721_v36  ;;  %v462_v35 = vrot.slane %v460_v29, 1  ;;  %v2746_v36 = vld [vmem:[%s3546_s1 + $0x370] ss:$8 sps:$4 sm:$0xff]   ;;  %v2784_v41 = vld [vmem:[%s3546_s1 + $0x3c0] ss:$8 sps:$4 sm:$0xff]  }
  0x51   : > { %1814 = vmatprep.subr.bf16.mxu0 %v2724_v37  ;;  %1778 = vmatmul.mubr.bf16.gmra.mrb[4].mxu0 %v2324_v17  ;;  %v2751_v37 = vld [vmem:[%s3546_s1 + $0x184] ss:$8 sps:$4 sm:$0xff]  }
  0x52   : > { %v258_v17 = vld [vmem:[%s3032_s14 + $0xcc] sm:$0xf] }
  0x53   : > { %1669 = vmatpush1.bf16.msra.mxu1 %v2719_v38  ;;  %v469_v38 = vrot.slane %v467_v33, 1 }
  0x54   : > { %1815 = vmatpush1.bf16.msra.mxu0 %v2722_v39  ;;  %1670 = vmatprep.subr.bf16.mxu1 %v2727_v50  ;;  %v463_v39 = vor.u32 %v462_v35, %v458_v28  ;;  %v234_v50 = vld [vmem:[%s3032_s14 + $0xc4] sm:$0xf]  ;;  %v2776_v28 = vld [vmem:[%s3546_s1 + $0x3b4] ss:$8 sps:$4 sm:$0xff]   ;;  %v2774_v35 = vld [vmem:[%s3546_s1 + $0x3b0] ss:$8 sps:$4 sm:$0xff]  }
  0x55   : > { %1816 = vmatprep.subr.bf16.mxu0 %v2730_v51  ;;  %v470_v45 = vor.u32 %v469_v38, %v465_v32  ;;  %v235_v51 = vld [vmem:[%s3032_s14 + $0xe4] sm:$0xf]  ;;  %v237_v32 = vld [vmem:[%s3032_s14 + $0x30] sm:$0x1] }
  0x56   : > { %1642 = vmatmul.mubr.bf16.gmra.mrb[8].mxu1 %v2329_v26  ;;  %v2339_v56 = vcombine.low %v234_v50, %v235_v51  ;;  %v2272_v26 = vld [vmem:[%s3032_s14 + $0x44] sm:$0xf]  ;;  %v2787_v50 = vld [vmem:[%s3546_s1 + $0x1d0] ss:$8 sps:$4 sm:$0xff]  }
  0x57   : > { %1671 = vmatpush1.bf16.msra.mxu1 %v2725_v60  ;;  %v2334_v52 = vcombine.low %v463_v39, %v470_v45  ;;  %v267_v60 = vld [vmem:[%s3032_s14 + $0xf8] sm:$0x1]  ;;  %v2318_v33 = vcombine.low %v2271_v25, %v2272_v26  ;;  %v2288_v39 = vcombine.low %v3107_v20, %v237_v32  ;;  %v242_v25 = vld [vmem:[%s3032_s14 + $0xd0] sm:$0x1] }
  0x58   : > { %1817 = vmatpush1.bf16.msra.mxu0 %v2728_v61  ;;  %1672 = vmatprep.subr.bf16.mxu1 %v2733_v63  ;;  %v2301_v61 = vcombine.low %v3265_v57, %v266_v59  ;;  %v3277_v63 = vld [vmem:[%s3032_s14 + $0xe0] sm:$0xf]  ;;  %v2790_v51 = vld [vmem:[%s3546_s1 + $0x3d0] ss:$8 sps:$4 sm:$0xff]   ;;  %v3409_v32 = vcombine.low %v3274_v62, %v242_v25  ;;  %v2832_v25 = vld [vmem:[%s3546_s1 + $0x454] ss:$8 sps:$4 sm:$0xff]  }
  0x59   : > { %1818 = vmatprep.subr.bf16.mxu0 %v2736_v0  ;;  %v2757_v0 = vld [vmem:[%s3546_s1 + $0x194] ss:$8 sps:$4 sm:$0xff]   ;;  %1787 = vmatprep.mubr.bf16.mxu0 %v2334_v52  ;;  %v343_v45 = vshll.u32 %v2288_v39, 16  ;;  %v2799_v52 = vld [vmem:[%s3546_s1 + $0x1e4] ss:$8 sps:$4 sm:$0xff]  }
  0x5a   : > { %1651 = vmatprep.mubr.bf16.mxu1 %v2339_v56  ;;  %v472_v4 = vshrl.u32 %v2301_v61, 16  ;;  %v474_v5 = vshll.u32 %v2301_v61, 16  ;;  %1788 = vmatmul.mubr.bf16.gmra.mrb[8].mxu0 %v2333_v55  ;;  %v2802_v55 = vld [vmem:[%s3546_s1 + $0x3e4] ss:$8 sps:$4 sm:$0xff]  }
  0x5b   : > { %1673 = vmatpush1.bf16.msra.mxu1 %v2731_v2  ;;  %v2302_v2 = vcombine.low %v3268_v58, %v267_v60 }
  0x5c   : > { %1819 = vmatpush1.bf16.msra.mxu0 %v2734_v3  ;;  %1674 = vmatprep.subr.bf16.mxu1 %v2739_v6  ;;  %v2338_v3 = vcombine.low %v3274_v62, %v3277_v63  ;;  %v2314_v6 = vcombine.low %v3049_v53, %v3052_v54  ;;  %v476_v11 = vrot.slane %v474_v5, 1  ;;  %v2767_v53 = vld [vmem:[%s3546_s1 + $0x1a4] ss:$8 sps:$4 sm:$0xff]   ;;  %v2814_v62 = vld [vmem:[%s3546_s1 + $0x410] ss:$8 sps:$4 sm:$0xff]  }
  0x5d   : > { %1820 = vmatprep.subr.bf16.mxu0 %v2742_v9  ;;  %v479_v7 = vshrl.u32 %v2302_v2, 16  ;;  %v481_v8 = vshll.u32 %v2302_v2, 16  ;;  %v2755_v9 = vld [vmem:[%s3546_s1 + $0x190] ss:$8 sps:$4 sm:$0xff]   ;;  %v2770_v54 = vld [vmem:[%s3546_s1 + $0x3a4] ss:$8 sps:$4 sm:$0xff]  }
  0x5e   : > { %1652 = vmatmul.mubr.bf16.gmra.mrb[12].mxu1 %v2338_v3  ;;  %v477_v16 = vor.u32 %v476_v11, %v472_v4  ;;  %v2797_v2 = vld [vmem:[%s3546_s1 + $0x1e0] ss:$8 sps:$4 sm:$0xff]   ;;  %v2806_v11 = vld [vmem:[%s3546_s1 + $0x3f0] ss:$8 sps:$4 sm:$0xff]  }
  0x5f   : > { %1675 = vmatpush1.bf16.msra.mxu1 %v2737_v24  ;;  %v483_v12 = vrot.slane %v481_v8, 1  ;;  %1694 = vmatprep.mubr.bf16.mxu1 %v2314_v6  ;;  %v2768_v24 = vld [vmem:[%s3546_s1 + $0x3a0] ss:$8 sps:$4 sm:$0xff]   ;;  %v240_v8 = vld [vmem:[%s3032_s14 + $0x90] sm:$0x1] }
  0x60   : > { %1821 = vmatpush1.bf16.msra.mxu0 %v2740_v27  ;;  %1676 = vmatprep.subr.bf16.mxu1 %v2745_v30  ;;  %v2773_v27 = vld [vmem:[%s3546_s1 + $0x1b4] ss:$8 sps:$4 sm:$0xff]   ;;  %v2342_v30 = vcombine.low %v258_v17, %v259_v21  ;;  %v2800_v3 = vld [vmem:[%s3546_s1 + $0x3e0] ss:$8 sps:$4 sm:$0xff]  }
  0x61   : > { %1822 = vmatprep.subr.bf16.mxu0 %v2748_v31  ;;  %v484_v18 = vor.u32 %v483_v12, %v479_v7  ;;  %v236_v31 = vld [vmem:[%s3032_s14 + $0x10] sm:$0x1]  ;;  %v2813_v12 = vld [vmem:[%s3546_s1 + $0x404] ss:$8 sps:$4 sm:$0xff]  }
  0x62   : > { %v2287_v38 = vcombine.low %v3104_v19, %v236_v31  ;;  %v2792_v19 = vld [vmem:[%s3546_s1 + $0x3d4] ss:$8 sps:$4 sm:$0xff]  }
  0x63   : > { %1677 = vmatpush1.bf16.msra.mxu1 %v2743_v34  ;;  %v2343_v29 = vcombine.low %v477_v16, %v484_v18  ;;  %v2771_v34 = vld [vmem:[%s3546_s1 + $0x1b0] ss:$8 sps:$4 sm:$0xff]   ;;  %v3392_v16 = vcombine.low %v3222_v22, %v240_v8  ;;  %v2811_v22 = vld [vmem:[%s3546_s1 + $0x400] ss:$8 sps:$4 sm:$0xff]   ;;  %v2829_v8 = vld [vmem:[%s3546_s1 + $0x444] ss:$8 sps:$4 sm:$0xff]  }
  0x64   : > { %1823 = vmatpush1.bf16.msra.mxu0 %v2746_v36  ;;  %1678 = vmatprep.subr.bf16.mxu1 %v2751_v37  ;;  %v2783_v36 = vld [vmem:[%s3546_s1 + $0x1c4] ss:$8 sps:$4 sm:$0xff]   ;;  %v336_v20 = vshll.u32 %v2287_v38, 16  ;;  %v334_v60 = vshrl.u32 %v2287_v38, 16 }
  0x65   : > { %1824 = vmatprep.subr.bf16.mxu0 %v2754_v42  ;;  %1797 = vmatprep.mubr.bf16.mxu0 %v2343_v29  ;;  %v2786_v37 = vld [vmem:[%s3546_s1 + $0x3c4] ss:$8 sps:$4 sm:$0xff]   ;;  %v2789_v42 = vld [vmem:[%s3546_s1 + $0x1d4] ss:$8 sps:$4 sm:$0xff]   ;;  %v364_v31 = vshll.u32 %v3392_v16, 16 }
  0x66   : > { %1798 = vmatmul.mubr.bf16.gmra.mrb[12].mxu0 %v2342_v30  ;;  %v338_v61 = vrot.slane %v336_v20, 1  ;;  %v2274_v29 = vld [vmem:[%s3032_s14 + $0x84] sm:$0xf]  ;;  %v243_v30 = vld [vmem:[%s3032_s14 + $0xf0] sm:$0x1] }
  0x67   : > { %1679 = vmatpush1.bf16.msra.mxu1 %v2749_v46  ;;  %1840 = vmatprep.mubr.bf16.mxu0 %v2318_v33  ;;  %v238_v46 = vld [vmem:[%s3032_s14 + $0x50] sm:$0x1]  ;;  %v2323_v33 = vcombine.low %v3161_v43, %v3164_v44  ;;  %v3423_v43 = vld [vmem:[%s3032_s14 + $0x80] sm:$0xf]  ;;  %v2821_v44 = vld [vmem:[%s3546_s1 + $0x424] ss:$8 sps:$4 sm:$0xff]  }
  0x68   : > { %1825 = vmatpush1.bf16.msra.mxu0 %v2752_v47  ;;  %1680 = vmatprep.subr.bf16.mxu1 %v2757_v0  ;;  %v239_v47 = vld [vmem:[%s3032_s14 + $0x70] sm:$0x1]  ;;  %v2289_v56 = vcombine.low %v3170_v48, %v238_v46  ;;  %v341_v0 = vshrl.u32 %v2288_v39, 16  ;;  %v2805_v48 = vld [vmem:[%s3546_s1 + $0x1f4] ss:$8 sps:$4 sm:$0xff]   ;;  %v339_v6 = vor.u32 %v338_v61, %v334_v60  ;;  %v376_v61 = vshrl.u32 %v3409_v32, 16 }
  0x69   : > { %1826 = vmatprep.subr.bf16.mxu0 %v2760_v1  ;;  %v2290_v59 = vcombine.low %v3173_v49, %v239_v47  ;;  %v345_v1 = vrot.slane %v343_v45, 1  ;;  %v2808_v49 = vld [vmem:[%s3546_s1 + $0x3f4] ss:$8 sps:$4 sm:$0xff]   ;;  %v3420_v39 = vld [vmem:[%s3032_s14 + $0x60] sm:$0xf] }
  0x6a   : > { %v350_v4 = vshll.u32 %v2289_v56, 16  ;;  %v2326_v45 = vcombine.low %v3420_v39, %v3423_v43  ;;  %v2275_v46 = vld [vmem:[%s3032_s14 + $0xa4] sm:$0xf] }
  0x6b   : > { %1681 = vmatpush1.bf16.msra.mxu1 %v2755_v9  ;;  %v357_v5 = vshll.u32 %v2290_v59, 16  ;;  %v346_v7 = vor.u32 %v345_v1, %v341_v0  ;;  %v241_v9 = vld [vmem:[%s3032_s14 + $0xb0] sm:$0x1]  ;;  %v355_v18 = vshrl.u32 %v2290_v59, 16  ;;  %v2276_v47 = vld [vmem:[%s3032_s14 + $0xc4] sm:$0xf]  ;;  %v2332_v59 = vcombine.low %v3213_v14, %v3216_v15 }
  0x6c   : > { %1827 = vmatpush1.bf16.msra.mxu0 %v2758_v10  ;;  %1682 = vmatprep.subr.bf16.mxu1 %v2767_v53  ;;  %v2803_v10 = vld [vmem:[%s3546_s1 + $0x1f0] ss:$8 sps:$4 sm:$0xff]   ;;  %v3383_v53 = vld [vmem:[%s3032_s14 + $0x20] sm:$0xf]  ;;  %v352_v17 = vrot.slane %v350_v4, 1  ;;  %v2336_v60 = vcombine.low %v2275_v46, %v2276_v47 }
  0x6d   : > { %1828 = vmatprep.subr.bf16.mxu0 %v2770_v54  ;;  %v3386_v54 = vld [vmem:[%s3032_s14 + $0x40] sm:$0xf]  ;;  %v359_v21 = vrot.slane %v357_v5, 1  ;;  %v2313_v26 = vcombine.low %v339_v6, %v346_v7  ;;  %v2822_v1 = vld [vmem:[%s3546_s1 + $0x430] ss:$8 sps:$4 sm:$0xff]  }
  0x6e   : > { %v2267_v14 = vld [vmem:[%s3032_s14 + $0xa0] sm:$0xf]  ;;  %v2284_v5 = vld [vmem:[%s3032_s14 + $0xd0] sm:$0x1] }
  0x6f   : > { %1683 = vmatpush1.bf16.msra.mxu1 %v2765_v13  ;;  %v348_v13 = vshrl.u32 %v2289_v56, 16  ;;  %v360_v38 = vor.u32 %v359_v21, %v355_v18  ;;  %v2280_v56 = vld [vmem:[%s3032_s14 + $0x50] sm:$0x1]  ;;  %v2268_v15 = vld [vmem:[%s3032_s14 + $0xc0] sm:$0xf] }
  0x70   : > { %1829 = vmatpush1.bf16.msra.mxu0 %v2768_v24  ;;  %1684 = vmatprep.subr.bf16.mxu1 %v2773_v27  ;;  %v2292_v24 = vcombine.low %v3225_v23, %v241_v9  ;;  %v2317_v27 = vcombine.low %v3383_v53, %v3386_v54  ;;  %v2816_v23 = vld [vmem:[%s3546_s1 + $0x414] ss:$8 sps:$4 sm:$0xff]   ;;  %v3458_v7 = vcombine.low %v3386_v54, %v2280_v56  ;;  %v2827_v54 = vld [vmem:[%s3546_s1 + $0x440] ss:$8 sps:$4 sm:$0xff]  }
  0x71   : > { %1830 = vmatprep.subr.bf16.mxu0 %v2776_v28  ;;  %v2273_v28 = vld [vmem:[%s3032_s14 + $0x64] sm:$0xf] }
  0x72   : > { %v535_v21 = vshll.u32 %v3458_v7, 16 }
  0x73   : > { %1685 = vmatpush1.bf16.msra.mxu1 %v2771_v34  ;;  %v2327_v34 = vcombine.low %v2273_v28, %v2274_v29  ;;  %v2341_v28 = vcombine.low %v3265_v57, %v3268_v58  ;;  %v2837_v57 = vld [vmem:[%s3546_s1 + $0x464] ss:$8 sps:$4 sm:$0xff]  }
  0x74   : > { %1831 = vmatpush1.bf16.msra.mxu0 %v2774_v35  ;;  %1686 = vmatprep.subr.bf16.mxu1 %v2783_v36  ;;  %v371_v35 = vshll.u32 %v2292_v24, 16  ;;  %v3414_v36 = vcombine.low %v3277_v63, %v243_v30  ;;  %v378_v63 = vshll.u32 %v3409_v32, 16 }
  0x75   : > { %1832 = vmatprep.subr.bf16.mxu0 %v2786_v37  ;;  %v353_v37 = vor.u32 %v352_v17, %v348_v13  ;;  %v2277_v13 = vld [vmem:[%s3032_s14 + $0xe4] sm:$0xf] }
  0x76   : > { %v380_v0 = vrot.slane %v378_v63, 1 }
  0x77   : > { %1687 = vmatpush1.bf16.msra.mxu1 %v2781_v40  ;;  %v362_v40 = vshrl.u32 %v3392_v16, 16  ;;  %v2322_v20 = vcombine.low %v353_v37, %v360_v38  ;;  %v533_v37 = vshrl.u32 %v3458_v7, 16  ;;  %v537_v38 = vrot.slane %v535_v21, 1 }
  0x78   : > { %1833 = vmatpush1.bf16.msra.mxu0 %v2784_v41  ;;  %1688 = vmatprep.subr.bf16.mxu1 %v2789_v42  ;;  %v366_v41 = vrot.slane %v364_v31, 1  ;;  %v369_v42 = vshrl.u32 %v2292_v24, 16  ;;  %v381_v16 = vor.u32 %v380_v0, %v376_v61  ;;  %v2281_v24 = vld [vmem:[%s3032_s14 + $0x70] sm:$0x1]  ;;  %v2849_v0 = vmov 0  }
  0x79   : > { %1834 = vmatprep.subr.bf16.mxu0 %v2792_v19  ;;  %v385_v19 = vshll.u32 %v3414_v36, 16  ;;  %v2305_v31 = vcombine.low %v3420_v39, %v2281_v24  ;;  %v538_v46 = vor.u32 %v537_v38, %v533_v37 }
  0x7b   : > { %1689 = vmatpush1.bf16.msra.mxu1 %v2787_v50  ;;  %v373_v50 = vrot.slane %v371_v35, 1  ;;  %v387_v4 = vrot.slane %v385_v19, 1  ;;  %v2286_v35 = vld [vmem:[%s3032_s14 + $0x110] sm:$0x1]  ;;  %v542_v47 = vshll.u32 %v2305_v31, 16  ;;  %v540_v61 = vshrl.u32 %v2305_v31, 16 }
  0x7c   : > { %1835 = vmatpush1.bf16.msra.mxu0 %v2790_v51  ;;  %1690 = vmatprep.subr.bf16.mxu1 %v2799_v52  ;;  %v2819_v51 = vld [vmem:[%s3546_s1 + $0x420] ss:$8 sps:$4 sm:$0xff]   ;;  %v2824_v52 = vld [vmem:[%s3546_s1 + $0x434] ss:$8 sps:$4 sm:$0xff]  }
  0x7d   : > { %1836 = vmatprep.subr.bf16.mxu0 %v2802_v55  ;;  %v2279_v55 = vld [vmem:[%s3032_s14 + $0x30] sm:$0x1] }
  0x7e   : > { %v3455_v6 = vcombine.low %v3383_v53, %v2279_v55  ;;  %v2278_v53 = vld [vmem:[%s3032_s14 + $0x104] sm:$0xf] }
  0x7f   : > { %1691 = vmatpush1.bf16.msra.mxu1 %v2797_v2  ;;  %v367_v2 = vor.u32 %v366_v41, %v362_v40  ;;  %v2345_v29 = vcombine.low %v2277_v13, %v2278_v53 }
  0x80   : > { %1837 = vmatpush1.bf16.msra.mxu0 %v2800_v3  ;;  %1692 = vmatprep.subr.bf16.mxu1 %v2805_v48  ;;  %v374_v3 = vor.u32 %v373_v50, %v369_v42  ;;  %v2283_v48 = vld [vmem:[%s3032_s14 + $0xb0] sm:$0x1]  ;;  %v528_v18 = vshll.u32 %v3455_v6, 16  ;;  %v526_v58 = vshrl.u32 %v3455_v6, 16 }
  0x81   : > { %1838 = vmatprep.subr.bf16.mxu0 %v2808_v49  ;;  %v383_v49 = vshrl.u32 %v3414_v36, 16  ;;  %v2307_v9 = vcombine.low %v2267_v14, %v2283_v48 }
  0x82   : > { %v530_v36 = vrot.slane %v528_v18, 1 }
  0x83   : > { %1693 = vmatpush1.bf16.msra.mxu1 %v2803_v10  ;;  %v2331_v10 = vcombine.low %v367_v2, %v374_v3  ;;  %v388_v17 = vor.u32 %v387_v4, %v383_v49  ;;  %v554_v39 = vshrl.u32 %v2307_v9, 16 }
  0x84   : > { %1839 = vmatpush1.bf16.msra.mxu0 %v2806_v11  ;;  %2510 = vmatprep.subr.bf16.mxu1 %v2813_v12  ;;  %v2308_v11 = vcombine.low %v2268_v15, %v2284_v5 }
  0x85   : > { %1881 = vmatprep.subr.bf16.mxu0 %v2813_v12  ;;  %v2335_v12 = vcombine.low %v2267_v14, %v2268_v15  ;;  %v2340_v32 = vcombine.low %v381_v16, %v388_v17 }
  0x86   : > { %1695 = vmatmul.mubr.bf16.vlgmr.msra.gmra.mrb[0].mxu1 %v2313_v26  ;;  %v2282_v26 = vld [vmem:[%s3032_s14 + $0x90] sm:$0x1]  ;;  %v563_v30 = vshll.u32 %v2308_v11, 16  ;;  %v561_v63 = vshrl.u32 %v2308_v11, 16 }
  0x87   : > { %1841 = vmatmul.mubr.bf16.vlgmr.msra.gmra.mrb[0].mxu0 %v2317_v27  ;;  %2518 = vmatpush1.bf16.msra.mxu1 %v2811_v22  ;;  %v556_v27 = vshll.u32 %v2307_v9, 16 }
  0x88   : > { %1882 = vmatpush1.bf16.msra.mxu0 %v2811_v22  ;;  %2511 = vmatprep.subr.bf16.mxu1 %v2816_v23  ;;  %v2830_v22 = vld [vmem:[%s3546_s1 + $0x450] ss:$8 sps:$4 sm:$0xff]   ;;  %v565_v40 = vrot.slane %v563_v30, 1 }
  0x89   : > { %1883 = vmatprep.subr.bf16.mxu0 %v2816_v23  ;;  %1704 = vmatprep.mubr.bf16.mxu1 %v2323_v33  ;;  %v2269_v23 = vld [vmem:[%s3032_s14 + $0xe0] sm:$0xf] }
  0x8a   : > { %1850 = vmatprep.mubr.bf16.mxu0 %v2327_v34  ;;  %v2270_v33 = vld [vmem:[%s3032_s14 + $0x100] sm:$0xf]  ;;  %v2285_v34 = vld [vmem:[%s3032_s14 + $0xf0] sm:$0x1] }
  0x8b   : > { %2519 = vmatpush1.bf16.msra.mxu1 %v2814_v62  ;;  %v2309_v41 = vcombine.low %v2269_v23, %v2285_v34  ;;  %v2310_v42 = vcombine.low %v2270_v33, %v2286_v35  ;;  %v2344_v19 = vcombine.low %v2269_v23, %v2270_v33 }
  0x8c   : > { %1884 = vmatpush1.bf16.msra.mxu0 %v2814_v62  ;;  %2512 = vmatprep.subr.bf16.mxu1 %v2821_v44  ;;  %v2306_v62 = vcombine.low %v3423_v43, %v2282_v26  ;;  %v2840_v43 = vld [vmem:[%s3546_s1 + $0x474] ss:$8 sps:$4 sm:$0xff]  }
  0x8d   : > { %1885 = vmatprep.subr.bf16.mxu0 %v2821_v44  ;;  %v558_v44 = vrot.slane %v556_v27, 1  ;;  %v570_v55 = vshll.u32 %v2309_v41, 16  ;;  %v577_v56 = vshll.u32 %v2310_v42, 16  ;;  %v568_v48 = vshrl.u32 %v2309_v41, 16 }
  0x8e   : > { %1705 = vmatmul.mubr.bf16.gmra.mrb[4].mxu1 %v2322_v20  ;;  %v2835_v20 = vld [vmem:[%s3546_s1 + $0x460] ss:$8 sps:$4 sm:$0xff]   ;;  %v549_v50 = vshll.u32 %v2306_v62, 16  ;;  %v547_v2 = vshrl.u32 %v2306_v62, 16  ;;  %v575_v14 = vshrl.u32 %v2310_v42, 16 }
  0x8f   : > { %1851 = vmatmul.mubr.bf16.gmra.mrb[4].mxu0 %v2326_v45  ;;  %2520 = vmatpush1.bf16.msra.mxu1 %v2819_v51  ;;  %v531_v45 = vor.u32 %v530_v36, %v526_v58  ;;  %v572_v4 = vrot.slane %v570_v55, 1  ;;  %v579_v15 = vrot.slane %v577_v56, 1 }
  0x90   : > { %1886 = vmatpush1.bf16.msra.mxu0 %v2819_v51  ;;  %2513 = vmatprep.subr.bf16.mxu1 %v2824_v52  ;;  %v559_v51 = vor.u32 %v558_v44, %v554_v39  ;;  %v551_v3 = vrot.slane %v549_v50, 1 }
  0x91   : > { %1887 = vmatprep.subr.bf16.mxu0 %v2824_v52  ;;  %1714 = vmatprep.mubr.bf16.mxu1 %v2332_v59  ;;  %v566_v52 = vor.u32 %v565_v40, %v561_v63  ;;  %v2838_v59 = vld [vmem:[%s3546_s1 + $0x470] ss:$8 sps:$4 sm:$0xff]   ;;  %v573_v7 = vor.u32 %v572_v4, %v568_v48 }
  0x92   : > { %1860 = vmatprep.mubr.bf16.mxu0 %v2336_v60  ;;  %v2319_v60 = vcombine.low %v531_v45, %v538_v46  ;;  %v552_v6 = vor.u32 %v551_v3, %v547_v2 }
  0x93   : > { %2521 = vmatpush1.bf16.msra.mxu1 %v2822_v1  ;;  %v2337_v49 = vcombine.low %v559_v51, %v566_v52 }
  0x94   : > { %1888 = vmatpush1.bf16.msra.mxu0 %v2822_v1  ;;  %2514 = vmatprep.subr.bf16.mxu1 %v2829_v8  ;;  %v544_v1 = vrot.slane %v542_v47, 1 }
  0x95   : > { %1889 = vmatprep.subr.bf16.mxu0 %v2829_v8  ;;  %v580_v8 = vor.u32 %v579_v15, %v575_v14 }
  0x96   : > { %1715 = vmatmul.mubr.bf16.gmra.mrb[8].mxu1 %v2331_v10  ;;  %v545_v5 = vor.u32 %v544_v1, %v540_v61 }
  0x97   : > { %1861 = vmatmul.mubr.bf16.gmra.mrb[8].mxu0 %v2335_v12  ;;  %2522 = vmatpush1.bf16.msra.mxu1 %v2827_v54  ;;  %v2346_v10 = vcombine.low %v573_v7, %v580_v8 }
  0x98   : > { %1890 = vmatpush1.bf16.msra.mxu0 %v2827_v54  ;;  %2515 = vmatprep.subr.bf16.mxu1 %v2832_v25  ;;  %v2328_v9 = vcombine.low %v545_v5, %v552_v6 }
  0x99   : > { %1891 = vmatprep.subr.bf16.mxu0 %v2832_v25  ;;  %1724 = vmatprep.mubr.bf16.mxu1 %v2341_v28 }
  0x9a   : > { %1870 = vmatprep.mubr.bf16.mxu0 %v2345_v29 }
  0x9b   : > { %2523 = vmatpush1.bf16.msra.mxu1 %v2830_v22 }
  0x9c   : > { %1892 = vmatpush1.bf16.msra.mxu0 %v2830_v22  ;;  %2516 = vmatprep.subr.bf16.mxu1 %v2837_v57 }
  0x9d   : > { %1893 = vmatprep.subr.bf16.mxu0 %v2837_v57 }
  0x9e   : > { %1725 = vmatmul.mubr.bf16.gmra.mrb[12].mxu1 %v2340_v32 }
  0x9f   : > { %1871 = vmatmul.mubr.bf16.gmra.mrb[12].mxu0 %v2344_v19  ;;  %2524 = vmatpush1.bf16.msra.mxu1 %v2835_v20 }
  0xa0   : > { %1894 = vmatpush1.bf16.msra.mxu0 %v2835_v20  ;;  %2517 = vmatprep.subr.bf16.mxu1 %v2840_v43 }
  0xa1   : > { %1895 = vmatprep.subr.bf16.mxu0 %v2840_v43  ;;  %1913 = vmatprep.mubr.bf16.mxu0 %v2849_v0 }
  0xa2   : > { %1933 = vmatprep.mubr.bf16.mxu1 %v2849_v0 }
  0xa3   : > { %2525 = vmatpush1.bf16.msra.mxu1 %v2838_v59 }
  0xa4   : > { %1896 = vmatpush1.bf16.msra.mxu0 %v2838_v59 }
  0xa6   : > { %1934 = vmatmul.mubr.bf16.vlgmr.msra.gmra.mrb[16].mxu1 %v2337_v49 }
  0xa7   : > { %1914 = vmatmul.mubr.bf16.vlgmr.msra.gmra.mrb[0].mxu0 %v2319_v60  ;;  %1943 = vmatprep.mubr.bf16.mxu1 %v2849_v0 }
  0xa8   : > { %1923 = vmatprep.mubr.bf16.mxu0 %v2849_v0 }
  0xae   : > { %1944 = vmatmul.mubr.bf16.gmra.mrb[20].mxu1 %v2346_v10 }
  0xaf   : > { %1924 = vmatmul.mubr.bf16.gmra.mrb[4].mxu0 %v2328_v9 }
 0x159   : > { %v1696_v11 = vpop.f32.mrb[0].mxu1 }
 0x15a   : > { %v1698_v12 = vpop.f32.mrb[1].mxu1 }
 0x15b   : > { %v1700_v13 = vpop.f32.mrb[2].mxu1 }
 0x15c   : > { %v1702_v53 = vpop.f32.mrb[3].mxu1 }
 0x161   : > { %v3500_v54 = vpop.f32.mrb[4].mxu1 }
 0x162   : > { %v3502_v16 = vpop.f32.mrb[5].mxu1 }
 0x163   : > { %v3504_v17 = vpop.f32.mrb[6].mxu1 }
 0x164   : > { %v3506_v18 = vpop.f32.mrb[7].mxu1 }
 0x169   : > { %v1716_v21 = vpop.f32.mrb[8].mxu1 }
 0x16a   : > { %v1862_v24 = vpop.f32.mrb[8].mxu0  ;;  %v1718_v26 = vpop.f32.mrb[9].mxu1 }
 0x16b   : > { %v2534_v25 = vadd.f32 %v1862_v24, %v1716_v21  ;;  %v1864_v27 = vpop.f32.mrb[9].mxu0  ;;  %v1720_v29 = vpop.f32.mrb[10].mxu1 }
 0x16c   : > { %v2536_v28 = vadd.f32 %v1864_v27, %v1718_v26  ;;  %v1866_v30 = vpop.f32.mrb[10].mxu0  ;;  %v1722_v23 = vpop.f32.mrb[11].mxu1 }
 0x16d   : > { %v2538_v22 = vadd.f32 %v1866_v30, %v1720_v29  ;;  %v1868_v31 = vpop.f32.mrb[11].mxu0 }
 0x16e   : > { %v2540_v32 = vadd.f32 %v1868_v31, %v1722_v23 }
 0x171   : > { %v1726_v33 = vpop.f32.mrb[12].mxu1 }
 0x172   : > { %v1872_v34 = vpop.f32.mrb[12].mxu0  ;;  %v1728_v57 = vpop.f32.mrb[13].mxu1 }
 0x173   : > { %v2542_v35 = vadd.f32 %v1872_v34, %v1726_v33  ;;  %v1874_v58 = vpop.f32.mrb[13].mxu0  ;;  %v1730_v37 = vpop.f32.mrb[14].mxu1 }
 0x174   : > { %v2544_v36 = vadd.f32 %v1874_v58, %v1728_v57  ;;  %v1876_v38 = vpop.f32.mrb[14].mxu0  ;;  %v1732_v39 = vpop.f32.mrb[15].mxu1 }
 0x175   : > { %v3508_v62 = vadd.f32 %v1876_v38, %v1730_v37  ;;  %v1878_v44 = vpop.f32.mrb[15].mxu0 }
 0x176   : > { %v2548_v63 = vadd.f32 %v1878_v44, %v1732_v39 }
 0x179   : > { %v1935_v41 = vpop.f32.mrb[16].mxu1 }
 0x17a   : > { %v1915_v40 = vpop.f32.mrb[0].mxu0  ;;  %v2535_v19 = vadd.f32 %v2534_v25, %v1935_v41  ;;  %v1937_v43 = vpop.f32.mrb[17].mxu1 }
 0x17b   : > { %v2526_v42 = vadd.f32 %v1915_v40, %v1696_v11  ;;  %v1917_v20 = vpop.f32.mrb[1].mxu0  ;;  %v3511_v46 = vadd.f32 %v2536_v28, %v1937_v43  ;;  %v1939_v50 = vpop.f32.mrb[18].mxu1 }
 0x17c   : > { %v2527_v45 = vadd.f32 %v1917_v20, %v1698_v12  ;;  %v1919_v47 = vpop.f32.mrb[2].mxu0  ;;  %v2539_v52 = vadd.f32 %v2538_v22, %v1939_v50  ;;  %v1941_v56 = vpop.f32.mrb[19].mxu1  ;;  %v2083_v58 = vmul.f32 %v2535_v19, %v2535_v19 }
 0x17d   : > { %v2528_v51 = vadd.f32 %v1919_v47, %v1700_v13  ;;  %v1921_v55 = vpop.f32.mrb[3].mxu0  ;;  %v2506_v60 = vpack.c.bf16 %v3511_v46, %v2535_v19  ;;  %v2075_v61 = vmul.f32 %v2526_v42, %v2526_v42  ;;  %v2541_v48 = vadd.f32 %v2540_v32, %v1941_v56 }
 0x17e   : > { %v2502_v59 = vpack.c.bf16 %v2527_v45, %v2526_v42  ;;  %v2529_v2 = vadd.f32 %v1921_v55, %v1702_v53  ;;  %v2076_v3 = vmul.f32 %v2527_v45, %v2527_v45  ;;  %v2085_v44 = vmul.f32 %v2539_v52, %v2539_v52 }
 0x17f   : > { %v2026_v0 = vadd.f32 %v2528_v51, %v2526_v42  ;;  %v2077_v1 = vmul.f32 %v2528_v51, %v2528_v51  ;;  %2022 = vst [vmem:[%s3516_s5 + $0x20] sm:$0xff] %v2506_v60  ;;  %v2507_v5 = vpack.c.bf16 %v2541_v48, %v2539_v52  ;;  %v2084_v20 = vmul.f32 %v3511_v46, %v3511_v46 }
 0x180   : > { %2018 = vst [vmem:[%s3516_s5] sm:$0xff] %v2502_v59  ;;  %v2503_v4 = vpack.c.bf16 %v2529_v2, %v2528_v51  ;;  %v2039_v14 = vadd.f32 %v2529_v2, %v2527_v45  ;;  %v2078_v15 = vmul.f32 %v2529_v2, %v2529_v2 }
 0x181   : > { %v2091_v49 = vadd.f32 %v2077_v1, %v2075_v61  ;;  %v1945_v7 = vpop.f32.mrb[20].mxu1  ;;  %2023 = vst [vmem:[%s3516_s5 + $0x28] sm:$0xff] %v2507_v5 }
 0x182   : > { %v1925_v6 = vpop.f32.mrb[4].mxu0  ;;  %2019 = vst [vmem:[%s3516_s5 + $0x8] sm:$0xff] %v2503_v4  ;;  %v2104_v8 = vadd.f32 %v2078_v15, %v2076_v3  ;;  %v2543_v10 = vadd.f32 %v2542_v35, %v1945_v7  ;;  %v1947_v12 = vpop.f32.mrb[21].mxu1  ;;  %v2850_v7 = vmov 1966171168  }
 0x183   : > { %v2530_v9 = vadd.f32 %v1925_v6, %v3500_v54  ;;  %v1927_v11 = vpop.f32.mrb[5].mxu0  ;;  %v2545_v53 = vadd.f32 %v2544_v36, %v1947_v12  ;;  %v1949_v24 = vpop.f32.mrb[22].mxu1 }
 0x184   : > { %v2531_v13 = vadd.f32 %v1927_v11, %v3502_v16  ;;  %v1929_v21 = vpop.f32.mrb[6].mxu0  ;;  %v1951_v29 = vpop.f32.mrb[23].mxu1  ;;  %v2547_v34 = vadd.f32 %v3508_v62, %v1949_v24 }
 0x185   : > { %v2027_v25 = vadd.f32 %v2530_v9, %v2026_v0  ;;  %v2079_v26 = vmul.f32 %v2530_v9, %v2530_v9  ;;  %v2532_v27 = vadd.f32 %v1929_v21, %v3504_v17  ;;  %v1931_v28 = vpop.f32.mrb[7].mxu0  ;;  %v2508_v23 = vpack.c.bf16 %v2545_v53, %v2543_v10 }
 0x186   : > { %v2504_v30 = vpack.c.bf16 %v2531_v13, %v2530_v9  ;;  %v2040_v22 = vadd.f32 %v2531_v13, %v2039_v14  ;;  %v2080_v54 = vmul.f32 %v2531_v13, %v2531_v13  ;;  %v2533_v35 = vadd.f32 %v1931_v28, %v3506_v18 }
 0x187   : > { %v2092_v31 = vadd.f32 %v2091_v49, %v2079_v26  ;;  %v2028_v32 = vadd.f32 %v2532_v27, %v2027_v25  ;;  %v2081_v33 = vmul.f32 %v2532_v27, %v2532_v27  ;;  %2024 = vst [vmem:[%s3516_s5 + $0x30] sm:$0xff] %v2508_v23  ;;  %v2549_v57 = vadd.f32 %v2548_v63, %v1951_v29 }
 0x188   : > { %2020 = vst [vmem:[%s3516_s5 + $0x10] sm:$0xff] %v2504_v30  ;;  %v2105_v16 = vadd.f32 %v2104_v8, %v2080_v54  ;;  %v2505_v37 = vpack.c.bf16 %v2533_v35, %v2532_v27  ;;  %v2041_v38 = vadd.f32 %v2533_v35, %v2040_v22  ;;  %v2082_v39 = vmul.f32 %v2533_v35, %v2533_v35 }
 0x189   : > { %v2029_v17 = vadd.f32 %v2535_v19, %v2028_v32  ;;  %v2093_v36 = vadd.f32 %v2092_v31, %v2081_v33  ;;  %v2509_v42 = vpack.c.bf16 %v2549_v57, %v2547_v34  ;;  %v2087_v18 = vmul.f32 %v2543_v10, %v2543_v10 }
 0x18a   : > { %2021 = vst [vmem:[%s3516_s5 + $0x18] sm:$0xff] %v2505_v37  ;;  %v2042_v62 = vadd.f32 %v3511_v46, %v2041_v38  ;;  %v2106_v43 = vadd.f32 %v2105_v16, %v2082_v39  ;;  %v2086_v19 = vmul.f32 %v2541_v48, %v2541_v48  ;;  %v2089_v55 = vmul.f32 %v2547_v34, %v2547_v34 }
 0x18b   : > { %v2094_v40 = vadd.f32 %v2093_v36, %v2083_v58  ;;  %v2030_v41 = vadd.f32 %v2539_v52, %v2029_v17  ;;  %2025 = vst [vmem:[%s3516_s5 + $0x38] sm:$0xff] %v2509_v42  ;;  %v2088_v59 = vmul.f32 %v2545_v53, %v2545_v53  ;;  %v2090_v2 = vmul.f32 %v2549_v57, %v2549_v57 }
 0x18c   : > { %v2107_v47 = vadd.f32 %v2106_v43, %v2084_v20  ;;  %v2043_v50 = vadd.f32 %v2541_v48, %v2042_v62  ;;  %v2056_v48 = vunpack.c.l.s4 %v2850_v7  ;;  %v2058_v8 = vlaneseq }
 0x18d   : > { %v2031_v63 = vadd.f32 %v2543_v10, %v2030_v41  ;;  %v2095_v45 = vadd.f32 %v2094_v40, %v2085_v44 }
 0x18e   : > { %v2044_v52 = vadd.f32 %v2545_v53, %v2043_v50  ;;  %v2108_v60 = vadd.f32 %v2107_v47, %v2086_v19  ;;  %v2057_v25 = vunpack.c.0.s8 %v2056_v48  ;;  %v2059_v26 = vshrl.u32 %v2058_v8, 7 }
 0x18f   : > { %v2032_v51 = vadd.f32 %v2547_v34, %v2031_v63  ;;  %v2096_v56 = vadd.f32 %v2095_v45, %v2087_v18  ;;  %vm2072_vm0 = vcmp.lt.s32.totalorder %v2058_v8, 256 }
 0x190   : > { %v2045_v1 = vadd.f32 %v2549_v57, %v2044_v52  ;;  %v2109_v3 = vadd.f32 %v2108_v60, %v2088_v59  ;;  %v2060_v31 = vsub.s32 %v2057_v25, %v2059_v26 }
 0x191   : > { %v2033_v61 = vrot.slane %v2032_v51, 4  ;;  %v2097_v0 = vadd.f32 %v2096_v56, %v2089_v55 }
 0x192   : > { %v2046_v4 = vrot.slane %v2045_v1, 4  ;;  %v2110_v14 = vadd.f32 %v2109_v3, %v2090_v2 }
 0x193   : > { %v2034_v46 = vadd.f32 %v2033_v61, %v2032_v51  ;;  %v2098_v49 = vrot.slane %v2097_v0, 4 }
 0x194   : > { %v2047_v6 = vadd.f32 %v2046_v4, %v2045_v1  ;;  %v2111_v9 = vrot.slane %v2110_v14, 4 }
 0x195   : > { %v2035_v15 = vrot.slane %v2034_v46, 2  ;;  %v2099_v5 = vadd.f32 %v2098_v49, %v2097_v0 }
 0x196   : > { %v2048_v12 = vrot.slane %v2047_v6, 2  ;;  %v2112_v13 = vadd.f32 %v2111_v9, %v2110_v14 }
 0x197   : > { %v2036_v10 = vadd.f32 %v2035_v15, %v2034_v46  ;;  %v2100_v11 = vrot.slane %v2099_v5, 2 }
 0x198   : > { %v2049_v24 = vadd.f32 %v2048_v12, %v2047_v6  ;;  %v2113_v27 = vrot.slane %v2112_v13, 2 }
 0x199   : > { %v2037_v53 = vrot.slane %v2036_v10, 1  ;;  %v2101_v21 = vadd.f32 %v2100_v11, %v2099_v5 }
 0x19a   : > { %v2050_v30 = vrot.slane %v2049_v24, 1  ;;  %v2114_v22 = vadd.f32 %v2113_v27, %v2112_v13 }
 0x19b   : > { %v2102_v28 = vrot.slane %v2101_v21, 1  ;;  %v2038_v29 = vadd.f32 %v2037_v53, %v2036_v10 }
 0x19c   : > { %v2051_v23 = vadd.f32 %v2050_v30, %v2049_v24  ;;  %v2115_v32 = vrot.slane %v2114_v22, 1 }
 0x19d   : > { %v2103_v54 = vadd.f32 %v2102_v28, %v2101_v21 }
 0x19e   : > { %v2054_v33 = vcombine.low %v2038_v29, %v2051_v23  ;;  %v2116_v16 = vadd.f32 %v2115_v32, %v2114_v22 }
 0x1a0   : > { %v2061_v34 = vrot.slane %v2054_v33, %v2060_v31  ;;  %v2119_v35 = vcombine.low %v2103_v54, %v2116_v16 }
 0x1a2   : > { %v2068_v57 = vrot.slane %v2061_v34, %v2060_v31  ;;  %v2126_v58 = vrot.slane %v2119_v35, %v2060_v31 }
 0x1a4   : > { %2074 = vst.msk [vmem:[%s214_s9] sm:$0x3] %vm2072_vm0, %v2068_v57  ;;  %v2133_v17 = vrot.slane %v2126_v58, %v2060_v31 }
 0x1a6   : > { %2135 = vst.msk [vmem:[%s218_s12] sm:$0x3] %vm2072_vm0, %v2133_v17 }
 0x1a7 PF: > { %s15_s15 = sadd.s32 1, %s2847_s15  }
 0x1a8   : > { %p12_p4 = scmp.ge.s32.totalorder %s15_s15, 4  }
 0x1aa   :  { %14 = sbr.rel (!%p12_p4) target bundleno = 1 (0x1), region = 83 }

// kernel: resblock_forward.4
= control target key start
LH: loop header
LB: loop body
LE: loop exit
PB: predicated region body
PF: predicated region fallthrough
CT: control target
= control target key end

     0   :  { %s2877_s18 = smov 0   ;;  %s2879_s19 = smov 0   ;;  %s3486_s0 = inlined_call_operand.vmem [shape: bf16[2,8,8,256], index: 0, kind: input, shape index: {}]   ;;  %s3487_s1 = inlined_call_operand.vmem [shape: f32[2,128], index: 1, kind: input, shape index: {}]   ;;  %s3488_s2 = inlined_call_operand.vmem [shape: bf16[1152,128], index: 2, kind: input, shape index: {}]   ;;  %s3489_s3 = inlined_call_operand.vmem [shape: bf16[2,8,8,128], index: 3, kind: output, shape index: {0}]   ;;  %s3490_s4 = inlined_call_operand.vmem [shape: f32[2,1,128], index: 4, kind: output, shape index: {1}]   ;;  %s3491_s5 = inlined_call_operand.vmem [shape: f32[2,1,128], index: 5, kind: output, shape index: {2}]  }
   0x1   :  { %s2881_s20 = smov 0  }
   0x2 LB: > { %s2224_s21 = sadd.s32 4294967295, %s2844_s20   ;;  %s2894_s22 = sadd.s32 1, %s2844_s20   ;;  %s2844_s20 = sphi %s2881_s20, %s3500_s20   ;;  %s2840_s19 = sphi %s2879_s19, %s3499_s19   ;;  %s2836_s18 = sphi %s2877_s18, %s3498_s18  }
   0x3   : > { %s20_s23 = ssub.s32 %s2844_s20, %s2894_s22  ;;  %s23_s24 = sadd.s32 1, %s2840_s19 }
   0x4   : > { %p21_p0 = scmp.eq.s32.totalorder %s20_s23, 0  ;;  %p30_p1 = scmp.ne.s32.totalorder %s2840_s19, %s2836_s18 }
   0x5   : > { %p31_p2 = scmp.eq.s32.totalorder %s2844_s20, 0  ;;  %p2227_p4 = scmp.ge.s32.totalorder %s2844_s20, 2 }
   0x6   : > { %s2903_s25 = scalar_select %p21_p0, %s2840_s19, %s23_s24  }
   0x7   : > { %p32_p3 = por %p31_p2, %p30_p1  ;;  %182 = sbr.rel (%p2227_p4) target bundleno = 23 (0x17), region = 24 }
   0xe   : > { %185 = sbr.rel (!%p32_p3) target bundleno = 23 (0x17), region = 28  ;;  %s187_s26 = sand.u32 (%p32_p3), 1, %s2840_s19  }
   0xf   : > { %s2401_s27 = sshll.u32 (%p32_p3), %s2844_s20, 6  ;;  %s2228_s28 = sshll.u32 (%p32_p3), %s187_s26, 5 }
  0x10   : > { %s192_s6 = scalar_lea.vmem (%p32_p3), %s3486_s0, %s2401_s27  ;;  %s189_s7 = scalar_lea.vmem (%p32_p3), [#allocation3], %s2228_s28 }
  0x11   : > { %v208_v0 = vld [vmem:[%s192_s6] sm:$0xf] (%p32_p3)  ;;  %v210_v1 = vld [vmem:[%s192_s6 + $0x8] sm:$0xf] (%p32_p3)  ;;  %v212_v2 = vld [vmem:[%s192_s6 + $0x10] sm:$0xf] (%p32_p3) }
  0x12   : > { %209 = vst [vmem:[%s189_s7] sm:$0xf] (%p32_p3), %v208_v0  ;;  %211 = vst [vmem:[%s189_s7 + $0x4] sm:$0xf] (%p32_p3), %v210_v1  ;;  %v214_v3 = vld [vmem:[%s192_s6 + $0x18] sm:$0xf] (%p32_p3) }
  0x13   : > { %v216_v4 = vld [vmem:[%s192_s6 + $0x20] sm:$0xf] (%p32_p3)  ;;  %213 = vst [vmem:[%s189_s7 + $0x8] sm:$0xf] (%p32_p3), %v212_v2  ;;  %215 = vst [vmem:[%s189_s7 + $0xc] sm:$0xf] (%p32_p3), %v214_v3 }
  0x14   : > { %217 = vst [vmem:[%s189_s7 + $0x10] sm:$0xf] (%p32_p3), %v216_v4  ;;  %v218_v5 = vld [vmem:[%s192_s6 + $0x28] sm:$0xf] (%p32_p3)  ;;  %v220_v6 = vld [vmem:[%s192_s6 + $0x30] sm:$0xf] (%p32_p3) }
  0x15   : > { %v222_v7 = vld [vmem:[%s192_s6 + $0x38] sm:$0xf]  ;;  %219 = vst [vmem:[%s189_s7 + $0x14] sm:$0xf] %v218_v5  ;;  %221 = vst [vmem:[%s189_s7 + $0x18] sm:$0xf] %v220_v6 }
  0x16   : > { %223 = vst [vmem:[%s189_s7 + $0x1c] sm:$0xf] %v222_v7 }
  0x17 PF: > { %p2231_p5 = scmp.ge.s32.totalorder %s2844_s20, 1  ;;  %p261_p6 = scmp.lt.s32.totalorder %s2844_s20, 3 }
  0x19   : > { %p262_p7 = pnand %p2231_p5, %p261_p6 }
  0x1a   : > { %v2690_v8 = vld [vmem:[%s3488_s2 + $0xc0] sm:$0xff] (!%p262_p7)   ;;  %v2693_v11 = vld [vmem:[%s3488_s2 + $0xc8] sm:$0xff] (!%p262_p7)   ;;  %v2697_v15 = vld [vmem:[%s3488_s2 + $0xd0] sm:$0xff] (!%p262_p7)   ;;  %v2846_v18 = vmov (!%p262_p7), 0   ;;  %s268_s8 = sand.u32 (!%p262_p7), 1, %s2836_s18   ;;  %v330_v28 = vlaneseq (!%p262_p7)  ;;  %vm368_vm0 = vcmask (!%p262_p7), 1040384  }
  0x1b   : > { %265 = sbr.rel (%p262_p7) target bundleno = 406 (0x196), region = 69  ;;  %v2691_v9 = vld [vmem:[%s3488_s2 + $0x80] sm:$0xff] (!%p262_p7)   ;;  %2493 = vmatprep.subr.bf16.mxu1 (!%p262_p7), %v2690_v8  ;;  %v2695_v13 = vld [vmem:[%s3488_s2 + $0x88] sm:$0xff] (!%p262_p7)   ;;  %v2699_v17 = vld [vmem:[%s3488_s2 + $0x90] sm:$0xff] (!%p262_p7)   ;;  %362 = vst [vmem:[#allocation2] sm:$0xf] (!%p262_p7), %v2846_v18 }
  0x1c   : > { %v2692_v10 = vld [vmem:[%s3488_s2 + $0x40] sm:$0xff] (!%p262_p7)   ;;  %2494 = vmatpush3.bf16.msra.mxu1 (!%p262_p7), %v2691_v9  ;;  %v2696_v14 = vld [vmem:[%s3488_s2 + $0x48] sm:$0xff] (!%p262_p7)   ;;  %363 = vst [vmem:[#allocation2 + $0x4] sm:$0x1] (!%p262_p7), %v2846_v18  ;;  %365 = vst [vmem:[#allocation2 + $0x48] sm:$0xf] (!%p262_p7), %v2846_v18 }
  0x1d   : > { %2453 = vmatprep.subr.bf16.mxu0 (!%p262_p7), %v2692_v10  ;;  %v2694_v12 = vld [vmem:[%s3488_s2] sm:$0xff] (!%p262_p7)   ;;  %2495 = vmatprep.subr.bf16.mxu1 (!%p262_p7), %v2693_v11  ;;  %v2698_v16 = vld [vmem:[%s3488_s2 + $0x8] sm:$0xff] (!%p262_p7)   ;;  %366 = vst [vmem:[#allocation2 + $0x4c] sm:$0x1] (!%p262_p7), %v2846_v18  ;;  %v2700_v19 = vld [vmem:[%s3488_s2 + $0x50] sm:$0xff] (!%p262_p7)   ;;  %s2232_s15 = sshll.u32 (!%p262_p7), %s268_s8, 5 }
  0x1e   : > { %2454 = vmatpush3.bf16.msra.mxu0 (!%p262_p7), %v2694_v12  ;;  %v2701_v20 = vld [vmem:[%s3488_s2 + $0xd8] sm:$0xff] (!%p262_p7)   ;;  %v2702_v21 = vld [vmem:[%s3488_s2 + $0x10] sm:$0xff] (!%p262_p7)   ;;  %v2705_v24 = vld [vmem:[%s3488_s2 + $0xe0] sm:$0xff] (!%p262_p7)   ;;  %v331_v33 = vshrl.u32 (!%p262_p7), %v330_v28, 7  ;;  %s3007_s14 = scalar_lea.vmem (!%p262_p7), [#allocation3], %s2232_s15  ;;  %vm533_vm5 = vcmask (!%p262_p7), 1043456  }
  0x1f   : > { %2455 = vmatprep.subr.bf16.mxu0 (!%p262_p7), %v2696_v14  ;;  %v2703_v22 = vld [vmem:[%s3488_s2 + $0x98] sm:$0xff] (!%p262_p7)   ;;  %v2707_v26 = vld [vmem:[%s3488_s2 + $0xa0] sm:$0xff] (!%p262_p7)   ;;  %v2709_v29 = vld [vmem:[%s3488_s2 + $0xe8] sm:$0xff] (!%p262_p7)   ;;  %vm369_vm1 = vsmask.f32 (!%p262_p7), 256  ;;  %p301_p8 = scmp.lt.s32.totalorder (!%p262_p7), %s2224_s21, 1 }
  0x20   : > { %2496 = vmatpush3.bf16.msra.mxu1 (!%p262_p7), %v2695_v13  ;;  %v2704_v23 = vld [vmem:[%s3488_s2 + $0x58] sm:$0xff] (!%p262_p7)   ;;  %v2708_v27 = vld [vmem:[%s3488_s2 + $0x60] sm:$0xff] (!%p262_p7)   ;;  %v2711_v31 = vld [vmem:[%s3488_s2 + $0xa8] sm:$0xff] (!%p262_p7)   ;;  %v332_v38 = vsub.s32 (!%p262_p7), 0, %v331_v33  ;;  %v344_v40 = vsub.s32 (!%p262_p7), 1, %v331_v33 }
  0x21   : > { %2497 = vmatprep.subr.bf16.mxu1 (!%p262_p7), %v2697_v15  ;;  %v2706_v25 = vld [vmem:[%s3488_s2 + $0x18] sm:$0xff] (!%p262_p7)   ;;  %v2710_v30 = vld [vmem:[%s3488_s2 + $0x20] sm:$0xff] (!%p262_p7)   ;;  %v2712_v32 = vld [vmem:[%s3488_s2 + $0x68] sm:$0xff] (!%p262_p7)   ;;  %vm395_vm3 = vsmask.f32 (!%p262_p7), 7938 }
  0x22   : > { %2456 = vmatpush3.bf16.msra.mxu0 %v2698_v16  ;;  %v2713_v34 = vld [vmem:[%s3488_s2 + $0xf0] sm:$0xff]   ;;  %v2714_v35 = vld [vmem:[%s3488_s2 + $0x28] sm:$0xff]   ;;  %v2717_v39 = vld [vmem:[%s3488_s2 + $0xf8] sm:$0xff]   ;;  %s3502_s21 = smov (!%p301_p8, %s2224_s21), 1 }
  0x23   : > { %2457 = vmatprep.subr.bf16.mxu0 %v2700_v19  ;;  %v2715_v36 = vld [vmem:[%s3488_s2 + $0xb0] sm:$0xff]   ;;  %v2719_v42 = vld [vmem:[%s3488_s2 + $0xb8] sm:$0xff]   ;;  %v313_v43 = vld [vmem:[%s3487_s1] sm:$0x3]  ;;  %s2402_s24 = sshll.u32 %s3502_s21, 5  ;;  %s308_s30 = scalar_lea.vmem %s3490_s4, %s3502_s21 }
  0x24   : > { %2498 = vmatpush3.bf16.msra.mxu1 %v2699_v17  ;;  %v2716_v37 = vld [vmem:[%s3488_s2 + $0x70] sm:$0xff]   ;;  %v2725_v45 = vld [vmem:[%s3488_s2 + $0x78] sm:$0xff]   ;;  %v3013_v48 = vrot.slane %v313_v43, %v332_v38  ;;  %v3015_v49 = vrot.slane %v313_v43, %v344_v40  ;;  %vm3018_vm2 = vmand %vm368_vm0, %vm369_vm1  ;;  %s305_s27 = scalar_lea.vmem %s3489_s3, %s2402_s24  ;;  %s311_s8 = scalar_lea.vmem %s3491_s5, %s3502_s21 }
  0x25   : > { %2499 = vmatprep.subr.bf16.mxu1 %v2701_v20  ;;  %v2718_v41 = vld [vmem:[%s3488_s2 + $0x30] sm:$0xff]   ;;  %v371_v51 = vld [vmem:[#allocation2 + $0x8] sm:$0x1]  ;;  %v397_v55 = vld [vmem:[#allocation2 + $0xc] sm:$0x1] }
  0x26   : > { %2458 = vmatpush3.bf16.msra.mxu0 %v2702_v21  ;;  %v2412_v44 = vld [vmem:[%s3007_s14] sm:$0xff]   ;;  %v372_v53 = vsel %vm3018_vm2, 0, %v371_v51  ;;  %vm3030_vm4 = vmand %vm368_vm0, %vm395_vm3  ;;  %v2728_v0 = vld [vmem:[%s3488_s2 + $0x1c0] sm:$0xff]  }
  0x27   : > { %2459 = vmatprep.subr.bf16.mxu0 %v2704_v23  ;;  %v2413_v46 = vunpack.c.l.bf16 %v2412_v44  ;;  %v2414_v47 = vunpack.c.h.bf16 %v2412_v44  ;;  %v374_v52 = vld [vmem:[#allocation2 + $0x10] sm:$0x1]  ;;  %373 = vst [vmem:[#allocation2 + $0x8] sm:$0x1] %v372_v53  ;;  %v400_v59 = vld [vmem:[#allocation2 + $0x14] sm:$0x1]  ;;  %vm3050_vm6 = vmand %vm533_vm5, %vm395_vm3 }
  0x28   : > { %2500 = vmatpush3.bf16.msra.mxu1 %v2703_v22  ;;  %v375_v54 = vsel %vm3018_vm2, 0, %v374_v52  ;;  %v398_v60 = vsel %vm3030_vm4, 0, %v397_v55  ;;  %v401_v61 = vsel %vm3030_vm4, 0, %v400_v59  ;;  %v2729_v3 = vld [vmem:[%s3488_s2 + $0x38] sm:$0xff]   ;;  %v2733_v4 = vld [vmem:[%s3488_s2 + $0x140] sm:$0xff]   ;;  %v2784_v58 = vld [vmem:[%s3488_s2 + $0x130] sm:$0xff]  }
  0x29   : > { %2501 = vmatprep.subr.bf16.mxu1 %v2705_v24  ;;  %v334_v56 = vmul.f32 %v2413_v46, %v3013_v48  ;;  %v335_v57 = vmul.f32 %v2414_v47, %v3013_v48  ;;  %376 = vst [vmem:[#allocation2 + $0x10] sm:$0x1] %v375_v54  ;;  %399 = vst [vmem:[#allocation2 + $0xc] sm:$0x1] %v398_v60  ;;  %v591_v22 = vld [vmem:[#allocation2 + $0x4] sm:$0x1] }
  0x2a   : > { %2460 = vmatpush3.bf16.msra.mxu0 %v2706_v25  ;;  %402 = vst [vmem:[#allocation2 + $0x14] sm:$0x1] %v401_v61  ;;  %v3054_v23 = vld [vmem:[#allocation2] sm:$0xf]  ;;  %v2447_v24 = vld [vmem:[%s3007_s14 + $0x8] sm:$0xff]  }
  0x2b   : > { %2461 = vmatprep.subr.bf16.mxu0 %v2708_v27  ;;  %v346_v62 = vadd.f32 %v3015_v49, %v334_v56  ;;  %v347_v63 = vadd.f32 %v3015_v49, %v335_v57  ;;  %v377_v25 = vld [vmem:[#allocation2 + $0x18] sm:$0x1]  ;;  %v2418_v27 = vunpack.c.h.bf16 %v2447_v24 }
  0x2c   : > { %2502 = vmatpush3.bf16.msra.mxu1 %v2707_v26  ;;  %v2417_v26 = vunpack.c.l.bf16 %v2447_v24  ;;  %v378_v28 = vsel %vm3018_vm2, 0, %v377_v25  ;;  %v2736_v25 = vld [vmem:[%s3488_s2 + $0x100] sm:$0xff]  }
  0x2d   : > { %2503 = vmatprep.subr.bf16.mxu1 %v2709_v29  ;;  %v354_v1 = vmax.f32 %v346_v62, 0.0  ;;  %v355_v2 = vmax.f32 %v347_v63, 0.0  ;;  %v380_v29 = vld [vmem:[#allocation2 + $0x20] sm:$0x1]  ;;  %379 = vst [vmem:[#allocation2 + $0x18] sm:$0x1] %v378_v28  ;;  %v337_v38 = vmul.f32 %v2418_v27, %v3013_v48 }
  0x2e   : > { %2462 = vmatpush3.bf16.msra.mxu0 %v2710_v30  ;;  %v535_v11 = vld [vmem:[#allocation2 + $0x8] sm:$0xf]  ;;  %v403_v30 = vld [vmem:[#allocation2 + $0x1c] sm:$0x1] }
  0x2f   : > { %2463 = vmatprep.subr.bf16.mxu0 %v2712_v32  ;;  %v2403_v5 = vpack.c.bf16 %v354_v1, %v354_v1  ;;  %v2404_v6 = vpack.c.bf16 %v355_v2, %v355_v2  ;;  %v404_v40 = vsel %vm3030_vm4, 0, %v403_v30  ;;  %v349_v44 = vadd.f32 %v3015_v49, %v337_v38  ;;  %v386_v30 = vld [vmem:[#allocation2 + $0x30] sm:$0x1] }
  0x30   : > { %2504 = vmatpush3.bf16.msra.mxu1 %v2711_v31  ;;  %v538_v12 = vld [vmem:[#allocation2 + $0xc] sm:$0x1]  ;;  %v541_v13 = vld [vmem:[#allocation2 + $0x10] sm:$0xf]  ;;  %405 = vst [vmem:[#allocation2 + $0x1c] sm:$0x1] %v404_v40 }
  0x31   : > { %2505 = vmatprep.subr.bf16.mxu1 %v2713_v34  ;;  %v454_v7 = vshrl.u32 %v2403_v5, 16  ;;  %v457_v8 = vshll.u32 %v2403_v5, 16  ;;  %v462_v9 = vshrl.u32 %v2404_v6, 16  ;;  %v465_v10 = vshll.u32 %v2404_v6, 16  ;;  %v544_v17 = vld [vmem:[#allocation2 + $0x14] sm:$0x1] }
  0x32   : > { %2464 = vmatpush3.bf16.msra.mxu0 %v2714_v35  ;;  %v599_v35 = vld [vmem:[#allocation2] sm:$0xe]  ;;  %v357_v51 = vmax.f32 %v349_v44, 0.0  ;;  %v2734_v6 = vld [vmem:[%s3488_s2 + $0x1c8] sm:$0xff]   ;;  %v2746_v40 = vld [vmem:[%s3488_s2 + $0x1d0] sm:$0xff]  }
  0x33   : > { %2465 = vmatprep.subr.bf16.mxu0 %v2716_v37  ;;  %v456_v14 = vrot.slane %v454_v7, 7  ;;  %v464_v15 = vrot.slane %v462_v9, 7  ;;  %v336_v37 = vmul.f32 %v2417_v26, %v3013_v48  ;;  %v2730_v5 = vld [vmem:[%s3488_s2 + $0x180] sm:$0xff]   ;;  %v2737_v26 = vld [vmem:[%s3488_s2 + $0x188] sm:$0xff]   ;;  %v412_v44 = vld [vmem:[#allocation2 + $0x34] sm:$0x1] }
  0x34   : > { %2506 = vmatpush3.bf16.msra.mxu1 %v2715_v36  ;;  %v406_v36 = vld [vmem:[#allocation2 + $0x24] sm:$0x1]  ;;  %v2406_v1 = vpack.c.bf16 %v357_v51, %v357_v51  ;;  %v2750_v51 = vld [vmem:[%s3488_s2 + $0x1d8] sm:$0xff]  }
  0x35   : > { %2507 = vmatprep.subr.bf16.mxu1 %v2717_v39  ;;  %v459_v18 = vor.u32 %v457_v8, %v456_v14  ;;  %v460_v19 = vrot.slane %v456_v14, 4  ;;  %v467_v20 = vor.u32 %v465_v10, %v464_v15  ;;  %v468_v21 = vrot.slane %v464_v15, 4 }
  0x36   : > { %2466 = vmatpush3.bf16.msra.mxu0 %v2718_v41  ;;  %v381_v39 = vsel %vm3018_vm2, 0, %v380_v29  ;;  %v407_v41 = vsel %vm3030_vm4, 0, %v406_v36  ;;  %v348_v43 = vadd.f32 %v3015_v49, %v336_v37  ;;  %v383_v29 = vld [vmem:[#allocation2 + $0x28] sm:$0x1] }
  0x37   : > { %2467 = vmatprep.subr.bf16.mxu0 %v2725_v45  ;;  %v536_v31 = vsel %vm3050_vm6, %v459_v18, %v535_v11  ;;  %v539_v32 = vsel %vm3018_vm2, %v460_v19, %v538_v12  ;;  %v542_v33 = vsel %vm3050_vm6, %v467_v20, %v541_v13  ;;  %v545_v34 = vsel %vm3018_vm2, %v468_v21, %v544_v17  ;;  %v547_v13 = vld [vmem:[#allocation2 + $0x18] sm:$0xf]  ;;  %v550_v14 = vld [vmem:[#allocation2 + $0x1c] sm:$0x1] }
  0x38   : > { %2508 = vmatpush3.bf16.msra.mxu1 %v2719_v42  ;;  %537 = vst [vmem:[#allocation2 + $0x8] sm:$0xf] %v536_v31  ;;  %540 = vst [vmem:[#allocation2 + $0xc] sm:$0x1] %v539_v32  ;;  %v2243_v42 = vcombine.low %v3054_v23, %v591_v22  ;;  %v2251_v45 = vcombine.low %v599_v35, %v591_v22  ;;  %v356_v46 = vmax.f32 %v348_v43, 0.0  ;;  %v478_v12 = vshrl.u32 %v2406_v1, 16 }
  0x39   : > { %2573 = vmatprep.subr.bf16.mxu1 %v2728_v0  ;;  %543 = vst [vmem:[#allocation2 + $0x10] sm:$0xf] %v542_v33  ;;  %546 = vst [vmem:[#allocation2 + $0x14] sm:$0x1] %v545_v34  ;;  %v481_v18 = vshll.u32 %v2406_v1, 16  ;;  %v2448_v22 = vld [vmem:[%s3007_s14 + $0x10] sm:$0xff]  }
  0x3a   : > { %2468 = vmatpush3.bf16.msra.mxu0 %v2729_v3  ;;  %382 = vst [vmem:[#allocation2 + $0x20] sm:$0x1] %v381_v39  ;;  %408 = vst [vmem:[#allocation2 + $0x24] sm:$0x1] %v407_v41  ;;  %v699_v47 = vshll.u32 %v2243_v42, 16  ;;  %v776_v55 = vrot.slane %v2251_v45, 1  ;;  %v2405_v61 = vpack.c.bf16 %v356_v46, %v356_v46  ;;  %v2421_v28 = vunpack.c.l.bf16 %v2448_v22 }
  0x3b   : > { %2533 = vmatprep.subr.bf16.mxu0 %v2733_v4  ;;  %v697_v56 = vshrl.u32 %v2243_v42, 16  ;;  %v480_v27 = vrot.slane %v478_v12, 7  ;;  %v2745_v34 = vld [vmem:[%s3488_s2 + $0x148] sm:$0xff]   ;;  %v2748_v42 = vld [vmem:[%s3488_s2 + $0x190] sm:$0xff]   ;;  %v2422_v43 = vunpack.c.h.bf16 %v2448_v22 }
  0x3c   : > { %v701_v0 = vrot.slane %v699_v47, 1  ;;  %v470_v7 = vshrl.u32 %v2405_v61, 16  ;;  %v473_v8 = vshll.u32 %v2405_v61, 16  ;;  %v409_v35 = vld [vmem:[#allocation2 + $0x2c] sm:$0x1] }
  0x3d   : > { %v483_v37 = vor.u32 %v481_v18, %v480_v27  ;;  %v484_v38 = vrot.slane %v480_v27, 4  ;;  %v2747_v47 = vld [vmem:[%s3488_s2 + $0x108] sm:$0xff]   ;;  %v410_v61 = vsel %vm3030_vm4, 0, %v409_v35 }
  0x3e   : > { %v702_v10 = vor.u32 %v701_v0, %v697_v56  ;;  %v472_v17 = vrot.slane %v470_v7, 7  ;;  %411 = vst [vmem:[#allocation2 + $0x2c] sm:$0x1] %v410_v61  ;;  %v413_v0 = vsel %vm3030_vm4, 0, %v412_v44  ;;  %v2752_v7 = vld [vmem:[%s3488_s2 + $0x110] sm:$0xff]   ;;  %v2766_v35 = vld [vmem:[%s3488_s2 + $0x1e8] sm:$0xff]  }
  0x3f   : > { %v3078_v52 = vld [vmem:[#allocation2 + $0x8] sm:$0xf]  ;;  %v592_v57 = vld [vmem:[#allocation2 + $0xc] sm:$0x1]  ;;  %414 = vst [vmem:[#allocation2 + $0x34] sm:$0x1] %v413_v0 }
  0x40   : > { %v3080_v53 = vld [vmem:[#allocation2 + $0x10] sm:$0xf]  ;;  %v600_v59 = vld [vmem:[#allocation2 + $0x8] sm:$0xe]  ;;  %v3092_v21 = vld [vmem:[#allocation2 + $0x14] sm:$0x1]  ;;  %v475_v32 = vor.u32 %v473_v8, %v472_v17 }
  0x41   : > { %v2294_v54 = vcombine.low %v3078_v52, %v3080_v53  ;;  %v584_v60 = vld [vmem:[#allocation2 + $0x8] sm:$0xf]  ;;  %v2252_v62 = vcombine.low %v600_v59, %v592_v57  ;;  %v3090_v15 = vld [vmem:[#allocation2 + $0x10] sm:$0xf]  ;;  %v553_v19 = vld [vmem:[#allocation2 + $0x20] sm:$0xf]  ;;  %v339_v59 = vmul.f32 %v2422_v43, %v3013_v48 }
  0x42   : > { %v2244_v63 = vcombine.low %v584_v60, %v592_v57  ;;  %v556_v20 = vld [vmem:[#allocation2 + $0x24] sm:$0x1]  ;;  %v2291_v31 = vcombine.low %v3054_v23, %v584_v60  ;;  %v476_v33 = vrot.slane %v472_v17, 4  ;;  %v3107_v39 = vcombine.low %v3090_v15, %v3092_v21  ;;  %v601_v56 = vld [vmem:[#allocation2 + $0x10] sm:$0xe] }
  0x43   : > { %1833 = vmatprep.mubr.bf16.mxu1 %v2294_v54  ;;  %v777_v2 = vrot.slane %v2252_v62, 1  ;;  %v548_v23 = vsel %vm3050_vm6, %v475_v32, %v547_v13  ;;  %v554_v45 = vsel %vm3050_vm6, %v483_v37, %v553_v19  ;;  %v557_v46 = vsel %vm3018_vm2, %v484_v38, %v556_v20  ;;  %v2749_v57 = vld [vmem:[%s3488_s2 + $0x150] sm:$0xff]   ;;  %v2768_v44 = vld [vmem:[%s3488_s2 + $0x120] sm:$0xff]   ;;  %v415_v61 = vld [vmem:[#allocation2 + $0x3c] sm:$0x1] }
  0x44   : > { %v704_v3 = vshrl.u32 %v2244_v63, 16  ;;  %v706_v4 = vshll.u32 %v2244_v63, 16  ;;  %v551_v41 = vsel %vm3018_vm2, %v476_v33, %v550_v14  ;;  %549 = vst [vmem:[#allocation2 + $0x18] sm:$0xf] %v548_v23  ;;  %v338_v54 = vmul.f32 %v2421_v28, %v3013_v48  ;;  %555 = vst [vmem:[#allocation2 + $0x20] sm:$0xf] %v554_v45 }
  0x45   : > { %v2293_v9 = vcombine.low %v776_v55, %v777_v2  ;;  %552 = vst [vmem:[#allocation2 + $0x1c] sm:$0x1] %v551_v41  ;;  %v384_v55 = vsel %vm3018_vm2, 0, %v383_v29  ;;  %558 = vst [vmem:[#allocation2 + $0x24] sm:$0x1] %v557_v46  ;;  %v387_v60 = vsel %vm3018_vm2, 0, %v386_v30  ;;  %v351_v1 = vadd.f32 %v3015_v49, %v339_v59 }
  0x46   : > { %v708_v11 = vrot.slane %v706_v4, 1  ;;  %385 = vst [vmem:[#allocation2 + $0x28] sm:$0x1] %v384_v55  ;;  %v713_v62 = vshll.u32 %v3107_v39, 16  ;;  %v350_v63 = vadd.f32 %v3015_v49, %v338_v54  ;;  %388 = vst [vmem:[#allocation2 + $0x30] sm:$0x1] %v387_v60 }
  0x47   : > { %1834 = vmatmul.mubr.bf16.vlgmr.msra.gmra.mrb[0].mxu1 %v2293_v9  ;;  %v359_v4 = vmax.f32 %v351_v1, 0.0  ;;  %v2761_v9 = vld [vmem:[%s3488_s2 + $0x158] sm:$0xff]   ;;  %v711_v17 = vshrl.u32 %v3107_v39, 16  ;;  %v2764_v28 = vld [vmem:[%s3488_s2 + $0x1a0] sm:$0xff]   ;;  %v562_v43 = vld [vmem:[#allocation2 + $0x2c] sm:$0x1] }
  0x48   : > { %v709_v24 = vor.u32 %v708_v11, %v704_v3  ;;  %2574 = vmatpush3.bf16.msra.mxu1 %v2730_v5  ;;  %v358_v2 = vmax.f32 %v350_v63, 0.0  ;;  %v2753_v3 = vld [vmem:[%s3488_s2 + $0x198] sm:$0xff]   ;;  %v2449_v5 = vld [vmem:[%s3007_s14 + $0x18] sm:$0xff]   ;;  %v715_v18 = vrot.slane %v713_v62, 1  ;;  %v392_v60 = vld [vmem:[#allocation2 + $0x40] sm:$0x1] }
  0x49   : > { %2575 = vmatprep.subr.bf16.mxu1 %v2734_v6  ;;  %v2253_v6 = vcombine.low %v601_v56, %v3092_v21  ;;  %v2425_v11 = vunpack.c.l.bf16 %v2449_v5  ;;  %v2426_v12 = vunpack.c.h.bf16 %v2449_v5  ;;  %v2408_v19 = vpack.c.bf16 %v359_v4, %v359_v4  ;;  %v2769_v45 = vld [vmem:[%s3488_s2 + $0x1a8] sm:$0xff]   ;;  %v568_v56 = vld [vmem:[#allocation2 + $0x34] sm:$0x1]  ;;  %v389_v59 = vld [vmem:[#allocation2 + $0x38] sm:$0x1] }
  0x4a   : > { %v2292_v36 = vcombine.low %v702_v10, %v709_v24  ;;  %v2407_v8 = vpack.c.bf16 %v358_v2, %v358_v2  ;;  %v2762_v10 = vld [vmem:[%s3488_s2 + $0x1e0] sm:$0xff]   ;;  %v2777_v62 = vld [vmem:[%s3488_s2 + $0x168] sm:$0xff]   ;;  %v3297_v50 = vld [vmem:[#allocation2 + $0x14] sm:$0x1] }
  0x4b   : > { %v3159_v13 = vld [vmem:[#allocation2 + $0x18] sm:$0xf]  ;;  %v3164_v20 = vld [vmem:[#allocation2 + $0x20] sm:$0xf]  ;;  %v340_v22 = vmul.f32 %v2425_v11, %v3013_v48  ;;  %v341_v29 = vmul.f32 %v2426_v12, %v3013_v48  ;;  %v494_v33 = vshrl.u32 %v2408_v19, 16 }
  0x4c   : > { %1768 = vmatprep.mubr.bf16.mxu0 %v2292_v36  ;;  %2576 = vmatpush3.bf16.msra.mxu1 %v2737_v26  ;;  %v3161_v14 = vld [vmem:[#allocation2 + $0x18] sm:$0xf]  ;;  %v594_v21 = vld [vmem:[#allocation2 + $0x1c] sm:$0x1]  ;;  %v2303_v24 = vcombine.low %v3159_v13, %v3164_v20  ;;  %v486_v27 = vshrl.u32 %v2407_v8, 16  ;;  %v489_v32 = vshll.u32 %v2407_v8, 16  ;;  %v716_v36 = vor.u32 %v715_v18, %v711_v17 }
  0x4d   : > { %1769 = vmatmul.mubr.bf16.vlgmr.msra.gmra.mrb[0].mxu0 %v2291_v31  ;;  %2577 = vmatprep.subr.bf16.mxu1 %v2746_v40  ;;  %v2246_v26 = vcombine.low %v3161_v14, %v594_v21  ;;  %v778_v31 = vrot.slane %v2253_v6, 1  ;;  %v559_v48 = vld [vmem:[#allocation2 + $0x28] sm:$0xf]  ;;  %v2765_v40 = vld [vmem:[%s3488_s2 + $0x160] sm:$0xff]   ;;  %v496_v41 = vrot.slane %v494_v33, 7  ;;  %v352_v46 = vadd.f32 %v3015_v49, %v340_v22 }
  0x4e   : > { %2534 = vmatpush3.bf16.msra.mxu0 %v2736_v25  ;;  %v602_v25 = vld [vmem:[#allocation2 + $0x18] sm:$0xe]  ;;  %1841 = vmatprep.mubr.bf16.mxu1 %v2303_v24  ;;  %v488_v39 = vrot.slane %v486_v27, 7  ;;  %v565_v55 = vld [vmem:[#allocation2 + $0x30] sm:$0xf]  ;;  %v393_v22 = vsel %vm3018_vm2, 0, %v392_v60 }
  0x4f   : > { %2535 = vmatprep.subr.bf16.mxu0 %v2745_v34  ;;  %v2254_v30 = vcombine.low %v602_v25, %v594_v21  ;;  %v2763_v34 = vld [vmem:[%s3488_s2 + $0x118] sm:$0xff]   ;;  %v718_v37 = vshrl.u32 %v2246_v26, 16  ;;  %v720_v38 = vshll.u32 %v2246_v26, 16  ;;  %v500_v1 = vrot.slane %v496_v41, 4  ;;  %v3194_v2 = vld [vmem:[#allocation2 + $0x20] sm:$0xf] }
  0x50   : > { %2578 = vmatpush3.bf16.msra.mxu1 %v2748_v42  ;;  %v497_v42 = vshll.u32 %v2408_v19, 16  ;;  %v492_v54 = vrot.slane %v488_v39, 4  ;;  %v603_v12 = vld [vmem:[#allocation2 + $0x20] sm:$0xe]  ;;  %v360_v18 = vmax.f32 %v352_v46, 0.0  ;;  %v2780_v19 = vld [vmem:[%s3488_s2 + $0x1b0] sm:$0xff]  }
  0x51   : > { %2579 = vmatprep.subr.bf16.mxu1 %v2750_v51  ;;  %v779_v23 = vrot.slane %v2254_v30, 1  ;;  %v491_v51 = vor.u32 %v489_v32, %v488_v39  ;;  %v390_v21 = vsel %vm3018_vm2, 0, %v389_v59  ;;  %v416_v24 = vsel %vm3030_vm4, 0, %v415_v61  ;;  %v2781_v25 = vld [vmem:[%s3488_s2 + $0x170] sm:$0xff]   ;;  %394 = vst [vmem:[#allocation2 + $0x40] sm:$0x1] %v393_v22 }
  0x52   : > { %2536 = vmatpush3.bf16.msra.mxu0 %v2747_v47  ;;  %v722_v47 = vrot.slane %v720_v38, 1  ;;  %v499_v0 = vor.u32 %v497_v42, %v496_v41  ;;  %v563_v6 = vsel %vm3018_vm2, %v492_v54, %v562_v43  ;;  %391 = vst [vmem:[#allocation2 + $0x38] sm:$0x1] %v390_v21  ;;  %417 = vst [vmem:[#allocation2 + $0x3c] sm:$0x1] %v416_v24 }
  0x53   : > { %2537 = vmatprep.subr.bf16.mxu0 %v2749_v57  ;;  %v353_v57 = vadd.f32 %v3015_v49, %v341_v29  ;;  %v2302_v63 = vcombine.low %v778_v31, %v779_v23  ;;  %v2778_v49 = vld [vmem:[%s3488_s2 + $0x1f0] sm:$0xff]   ;;  %v560_v5 = vsel %vm3050_vm6, %v491_v51, %v559_v48  ;;  %564 = vst [vmem:[#allocation2 + $0x2c] sm:$0x1] %v563_v6  ;;  %v2782_v29 = vld [vmem:[%s3488_s2 + $0x1f8] sm:$0xff]   ;;  %v3267_v6 = vld [vmem:[%s3488_s2 + $0x200] sm:$0xff]  }
  0x54   : > { %2580 = vmatpush3.bf16.msra.mxu1 %v2753_v3  ;;  %v3196_v3 = vld [vmem:[#allocation2 + $0x24] sm:$0x1]  ;;  %v723_v4 = vor.u32 %v722_v47, %v718_v37  ;;  %561 = vst [vmem:[#allocation2 + $0x28] sm:$0xf] %v560_v5  ;;  %v566_v8 = vsel %vm3050_vm6, %v499_v0, %v565_v55  ;;  %v2409_v27 = vpack.c.bf16 %v360_v18, %v360_v18  ;;  %v3244_v37 = vld [vmem:[#allocation2 + $0xc] sm:$0x1] }
  0x55   : > { %2581 = vmatprep.subr.bf16.mxu1 %v2762_v10  ;;  %1842 = vmatmul.mubr.bf16.gmra.mrb[4].mxu1 %v2302_v63  ;;  %v418_v10 = vld [vmem:[#allocation2 + $0x44] sm:$0x1]  ;;  %567 = vst [vmem:[#allocation2 + $0x30] sm:$0xf] %v566_v8  ;;  %v3213_v17 = vcombine.low %v3194_v2, %v3196_v3  ;;  %v2255_v32 = vcombine.low %v603_v12, %v3196_v3  ;;  %v3255_v46 = vld [vmem:[#allocation2 + $0x14] sm:$0x1] }
  0x56   : > { %2538 = vmatpush3.bf16.msra.mxu0 %v2752_v7  ;;  %v2300_v7 = vcombine.low %v3090_v15, %v3161_v14  ;;  %v2301_v11 = vcombine.low %v716_v36, %v723_v4  ;;  %v361_v15 = vmax.f32 %v353_v57, 0.0  ;;  %v2779_v14 = vld [vmem:[%s3488_s2 + $0x128] sm:$0xff]   ;;  %v419_v26 = vsel %vm3030_vm4, 0, %v418_v10  ;;  %v2788_v0 = vld [vmem:[%s3488_s2 + $0x178] sm:$0xff]  }
  0x57   : > { %2539 = vmatprep.subr.bf16.mxu0 %v2761_v9  ;;  %v569_v9 = vsel %vm3018_vm2, %v500_v1, %v568_v56  ;;  %420 = vst [vmem:[#allocation2 + $0x44] sm:$0x1] %v419_v26  ;;  %v727_v30 = vshll.u32 %v3213_v17, 16  ;;  %v502_v31 = vshrl.u32 %v2409_v27, 16  ;;  %v505_v36 = vshll.u32 %v2409_v27, 16 }
  0x58   : > { %2582 = vmatpush3.bf16.msra.mxu1 %v2764_v28  ;;  %570 = vst [vmem:[#allocation2 + $0x34] sm:$0x1] %v569_v9  ;;  %1776 = vmatprep.mubr.bf16.mxu0 %v2301_v11  ;;  %v2410_v28 = vpack.c.bf16 %v361_v15, %v361_v15  ;;  %v725_v48 = vshrl.u32 %v3213_v17, 16  ;;  %v3257_v47 = vld [vmem:[#allocation2 + $0x8] sm:$0xe]  ;;  %v780_v54 = vrot.slane %v2255_v32, 1  ;;  %v3291_v22 = vcombine.low %v3080_v53, %v3255_v46 }
  0x59   : > { %2583 = vmatprep.subr.bf16.mxu1 %v2766_v35  ;;  %1777 = vmatmul.mubr.bf16.gmra.mrb[4].mxu0 %v2300_v7  ;;  %v729_v43 = vrot.slane %v727_v30, 1  ;;  %v571_v56 = vld [vmem:[#allocation2 + $0x38] sm:$0xf]  ;;  %v574_v57 = vld [vmem:[#allocation2 + $0x3c] sm:$0x1]  ;;  %v3271_v7 = vcombine.low %v3078_v52, %v3244_v37  ;;  %v2267_v24 = vcombine.low %v3257_v47, %v3244_v37 }
  0x5a   : > { %2540 = vmatpush3.bf16.msra.mxu0 %v2763_v34  ;;  %v510_v33 = vshrl.u32 %v2410_v28, 16  ;;  %v596_v39 = vld [vmem:[#allocation2 + $0x2c] sm:$0x1]  ;;  %v2791_v17 = vld [vmem:[%s3488_s2 + $0x138] sm:$0xff]   ;;  %v834_v37 = vshll.u32 %v3291_v22, 16 }
  0x5b   : > { %2541 = vmatprep.subr.bf16.mxu0 %v2765_v40  ;;  %v3240_v34 = vld [vmem:[#allocation2 + $0x28] sm:$0xf]  ;;  %v513_v40 = vshll.u32 %v2410_v28, 16  ;;  %v730_v8 = vor.u32 %v729_v43, %v725_v48  ;;  %v3286_v21 = vld [vmem:[#allocation2 + $0x18] sm:$0xf] }
  0x5c   : > { %2584 = vmatpush3.bf16.msra.mxu1 %v2769_v45  ;;  %v3242_v35 = vld [vmem:[#allocation2 + $0x28] sm:$0xf]  ;;  %v3246_v38 = vld [vmem:[#allocation2 + $0x30] sm:$0xf]  ;;  %v2785_v45 = vld [vmem:[%s3488_s2 + $0x1b8] sm:$0xff]   ;;  %v512_v55 = vrot.slane %v510_v33, 7 }
  0x5d   : > { %2585 = vmatprep.subr.bf16.mxu1 %v2778_v49  ;;  %v2312_v23 = vcombine.low %v3240_v34, %v3246_v38  ;;  %v604_v41 = vld [vmem:[#allocation2 + $0x28] sm:$0xe]  ;;  %v2248_v42 = vcombine.low %v3242_v35, %v596_v39  ;;  %v3259_v63 = vld [vmem:[#allocation2 + $0x30] sm:$0xf]  ;;  %v2309_v16 = vcombine.low %v3194_v2, %v3242_v35  ;;  %v3299_v26 = vld [vmem:[#allocation2 + $0x1c] sm:$0x1] }
  0x5e   : > { %2542 = vmatpush3.bf16.msra.mxu0 %v2768_v44  ;;  %v504_v44 = vrot.slane %v502_v31, 7  ;;  %v2256_v51 = vcombine.low %v604_v41, %v596_v39  ;;  %v515_v49 = vor.u32 %v513_v40, %v512_v55  ;;  %v516_v4 = vrot.slane %v512_v55, 4  ;;  %v580_v5 = vld [vmem:[#allocation2 + $0x44] sm:$0x1]  ;;  %v605_v12 = vld [vmem:[#allocation2 + $0x30] sm:$0xe] }
  0x5f   : > { %2543 = vmatprep.subr.bf16.mxu0 %v2777_v62  ;;  %1849 = vmatprep.mubr.bf16.mxu1 %v2312_v23  ;;  %v732_v59 = vshrl.u32 %v2248_v42, 16  ;;  %v734_v60 = vshll.u32 %v2248_v42, 16  ;;  %v577_v62 = vld [vmem:[#allocation2 + $0x40] sm:$0xf]  ;;  %v597_v11 = vld [vmem:[#allocation2 + $0x34] sm:$0x1]  ;;  %v2276_v28 = vcombine.low %v3286_v21, %v3299_v26 }
  0x60   : > { %2586 = vmatpush3.bf16.msra.mxu1 %v2780_v19  ;;  %v507_v61 = vor.u32 %v505_v36, %v504_v44  ;;  %v781_v1 = vrot.slane %v2256_v51, 1  ;;  %v508_v3 = vrot.slane %v504_v44, 4  ;;  %v578_v52 = vsel %vm3050_vm6, %v515_v49, %v577_v62  ;;  %v3284_v19 = vld [vmem:[#allocation2 + $0x10] sm:$0xf]  ;;  %v3312_v48 = vld [vmem:[#allocation2 + $0x1c] sm:$0x1] }
  0x61   : > { %2587 = vmatprep.subr.bf16.mxu1 %v2782_v29  ;;  %v736_v9 = vrot.slane %v734_v60, 1  ;;  %579 = vst [vmem:[#allocation2 + $0x40] sm:$0xf] %v578_v52  ;;  %v2249_v27 = vcombine.low %v3259_v63, %v597_v11  ;;  %v2275_v53 = vcombine.low %v3284_v19, %v3297_v50  ;;  %v624_v2 = vld [vmem:[#allocation2 + $0x10] sm:$0xe]  ;;  %v825_v29 = vshrl.u32 %v3271_v7, 16 }
  0x62   : > { %2544 = vmatpush3.bf16.msra.mxu0 %v2779_v14  ;;  %v572_v10 = vsel %vm3050_vm6, %v507_v61, %v571_v56  ;;  %v2311_v18 = vcombine.low %v780_v54, %v781_v1  ;;  %v575_v15 = vsel %vm3018_vm2, %v508_v3, %v574_v57  ;;  %v581_v14 = vsel %vm3018_vm2, %v516_v4, %v580_v5  ;;  %v3314_v42 = vld [vmem:[#allocation2 + $0x20] sm:$0xf]  ;;  %v3327_v62 = vld [vmem:[#allocation2 + $0x24] sm:$0x1] }
  0x63   : > { %2545 = vmatprep.subr.bf16.mxu0 %v2781_v25  ;;  %573 = vst [vmem:[#allocation2 + $0x38] sm:$0xf] %v572_v10  ;;  %v737_v25 = vor.u32 %v736_v9, %v732_v59  ;;  %576 = vst [vmem:[#allocation2 + $0x3c] sm:$0x1] %v575_v15  ;;  %v2257_v31 = vcombine.low %v605_v12, %v597_v11  ;;  %v953_v32 = vshrl.u32 %v2275_v53, 16  ;;  %v955_v33 = vshll.u32 %v2275_v53, 16 }
  0x64   : > { %2588 = vmatpush3.bf16.msra.mxu1 %v2785_v45  ;;  %582 = vst [vmem:[#allocation2 + $0x44] sm:$0x1] %v581_v14  ;;  %v962_v35 = vshll.u32 %v2276_v28, 16  ;;  %v827_v36 = vshll.u32 %v3271_v7, 16  ;;  %v3310_v39 = vrot.slane %v2267_v24, 1  ;;  %v741_v40 = vshll.u32 %v2249_v27, 16 }
  0x65   : > { %2649 = vmatprep.subr.bf16.mxu1 %v3267_v6  ;;  %1850 = vmatmul.mubr.bf16.gmra.mrb[8].mxu1 %v2311_v18  ;;  %v2310_v30 = vcombine.low %v730_v8, %v737_v25  ;;  %v957_v23 = vrot.slane %v955_v33, 1  ;;  %v2268_v43 = vcombine.low %v624_v2, %v3255_v46  ;;  %v782_v54 = vrot.slane %v2257_v31, 1  ;;  %v3323_v59 = vld [vmem:[#allocation2 + $0x28] sm:$0xf]  ;;  %v3329_v46 = vld [vmem:[#allocation2 + $0x2c] sm:$0x1] }
  0x66   : > { %2546 = vmatpush3.bf16.msra.mxu0 %v2784_v58  ;;  %v960_v58 = vshrl.u32 %v2276_v28, 16  ;;  %v964_v41 = vrot.slane %v962_v35, 1  ;;  %v739_v55 = vshrl.u32 %v2249_v27, 16  ;;  %v743_v3 = vrot.slane %v741_v40, 1  ;;  %v618_v9 = vld [vmem:[#allocation2 + $0x24] sm:$0x1] }
  0x67   : > { %2547 = vmatprep.subr.bf16.mxu0 %v2788_v0  ;;  %1784 = vmatprep.mubr.bf16.mxu0 %v2310_v30  ;;  %v958_v56 = vor.u32 %v957_v23, %v953_v32  ;;  %v2277_v49 = vcombine.low %v3314_v42, %v3327_v62  ;;  %v829_v4 = vrot.slane %v827_v36, 1  ;;  %v905_v5 = vrot.slane %v2268_v43, 1  ;;  %v3344_v30 = vld [vmem:[#allocation2 + $0x30] sm:$0xf]  ;;  %v626_v35 = vld [vmem:[#allocation2 + $0x20] sm:$0xe] }
  0x68   : > { %1785 = vmatmul.mubr.bf16.gmra.mrb[8].mxu0 %v2309_v16  ;;  %v3321_v51 = vld [vmem:[#allocation2 + $0x40] sm:$0xf]  ;;  %v965_v57 = vor.u32 %v964_v41, %v960_v58  ;;  %v3336_v7 = vcombine.low %v3159_v13, %v3312_v48  ;;  %v2278_v8 = vcombine.low %v3323_v59, %v3329_v46  ;;  %v832_v24 = vshrl.u32 %v3291_v22, 16  ;;  %v625_v13 = vld [vmem:[#allocation2 + $0x18] sm:$0xe] }
  0x69   : > { %v967_v18 = vshrl.u32 %v2277_v49, 16  ;;  %v969_v15 = vshll.u32 %v2277_v49, 16  ;;  %v744_v16 = vor.u32 %v743_v3, %v739_v55  ;;  %v3342_v53 = vcombine.low %v3164_v20, %v618_v9  ;;  %v3351_v36 = vld [vmem:[#allocation2 + $0x34] sm:$0x1] }
  0x6a   : > { %2548 = vmatpush3.bf16.msra.mxu0 %v2791_v17  ;;  %v3317_v44 = vld [vmem:[#allocation2 + $0x38] sm:$0xf]  ;;  %v598_v61 = vld [vmem:[#allocation2 + $0x3c] sm:$0x1]  ;;  %v2298_v17 = vcombine.low %v958_v56, %v965_v57  ;;  %v974_v52 = vshrl.u32 %v2278_v8, 16  ;;  %v976_v14 = vshll.u32 %v2278_v8, 16  ;;  %v3348_v32 = vor.u32 %v829_v4, %v825_v29 }
  0x6b   : > { %2625 = vmatprep.subr.bf16.mxu0 %v3267_v6  ;;  %v3319_v45 = vld [vmem:[#allocation2 + $0x38] sm:$0xf]  ;;  %v2321_v60 = vcombine.low %v3317_v44, %v3321_v51  ;;  %v971_v28 = vrot.slane %v969_v15, 1  ;;  %v836_v33 = vrot.slane %v834_v37, 1  ;;  %v2296_v22 = vcombine.low %v3310_v39, %v905_v5  ;;  %v3356_v43 = vld [vmem:[#allocation2 + $0x3c] sm:$0x1] }
  0x6c   : > { %v606_v47 = vld [vmem:[#allocation2 + $0x38] sm:$0xe]  ;;  %v2250_v0 = vcombine.low %v3319_v45, %v598_v61  ;;  %v978_v2 = vrot.slane %v976_v14, 1  ;;  %v841_v40 = vshll.u32 %v3336_v7, 16  ;;  %v2318_v20 = vcombine.low %v3259_v63, %v3319_v45  ;;  %v3358_v29 = vld [vmem:[#allocation2 + $0x2c] sm:$0x1] }
  0x6d   : > { %v2258_v1 = vcombine.low %v606_v47, %v598_v61  ;;  %1857 = vmatprep.mubr.bf16.mxu1 %v2321_v60  ;;  %v3346_v31 = vld [vmem:[#allocation2 + $0x38] sm:$0xf]  ;;  %v972_v23 = vor.u32 %v971_v28, %v967_v18  ;;  %v3360_v37 = vld [vmem:[#allocation2 + $0x34] sm:$0x1]  ;;  %v2269_v39 = vcombine.low %v625_v13, %v3312_v48  ;;  %v848_v63 = vshll.u32 %v3342_v53, 16  ;;  %v2792_v8 = vld [vmem:[%s3488_s2 + $0x208] sm:$0xff]  }
  0x6e   : > { %v746_v11 = vshrl.u32 %v2250_v0, 16  ;;  %v748_v12 = vshll.u32 %v2250_v0, 16  ;;  %v979_v41 = vor.u32 %v978_v2, %v974_v52  ;;  %v2280_v55 = vcombine.low %v3346_v31, %v3356_v43  ;;  %v3371_v48 = vld [vmem:[#allocation2 + $0x40] sm:$0xf]  ;;  %v3383_v5 = vld [vmem:[#allocation2 + $0x44] sm:$0x1] }
  0x6f   : > { %v783_v10 = vrot.slane %v2258_v1, 1  ;;  %v2297_v45 = vcombine.low %v3284_v19, %v3286_v21  ;;  %v2270_v56 = vcombine.low %v626_v35, %v618_v9  ;;  %v839_v57 = vshrl.u32 %v3336_v7, 16  ;;  %v3381_v21 = vld [vmem:[#allocation2 + $0x48] sm:$0xf]  ;;  %v3385_v7 = vld [vmem:[#allocation2 + $0x4c] sm:$0x1] }
  0x70   : > { %v750_v27 = vrot.slane %v748_v12, 1  ;;  %v988_v0 = vshrl.u32 %v2280_v55, 16  ;;  %v990_v1 = vshll.u32 %v2280_v55, 16  ;;  %v837_v3 = vor.u32 %v836_v33, %v832_v24  ;;  %v627_v18 = vld [vmem:[#allocation2 + $0x28] sm:$0xe] }
  0x71   : > { %v2320_v25 = vcombine.low %v782_v54, %v783_v10  ;;  %v2279_v54 = vcombine.low %v3344_v30, %v3351_v36  ;;  %v3375_v49 = vcombine.low %v3240_v34, %v3358_v29  ;;  %v3379_v4 = vcombine.low %v3246_v38, %v3360_v37  ;;  %v628_v52 = vld [vmem:[#allocation2 + $0x30] sm:$0xe] }
  0x72   : > { %v751_v58 = vor.u32 %v750_v27, %v746_v11  ;;  %v2307_v19 = vcombine.low %v972_v23, %v979_v41  ;;  %v906_v9 = vrot.slane %v2269_v39, 1  ;;  %v843_v34 = vrot.slane %v841_v40, 1  ;;  %v622_v41 = vld [vmem:[#allocation2 + $0x44] sm:$0x1] }
  0x73   : > { %1858 = vmatmul.mubr.bf16.gmra.mrb[12].mxu1 %v2320_v25  ;;  %v981_v60 = vshrl.u32 %v2279_v54, 16  ;;  %v983_v61 = vshll.u32 %v2279_v54, 16  ;;  %v992_v11 = vrot.slane %v990_v1, 1  ;;  %v907_v12 = vrot.slane %v2270_v56, 1 }
  0x74   : > { %1963 = vmatprep.mubr.bf16.mxu1 %v2298_v17  ;;  %v2319_v47 = vcombine.low %v744_v16, %v751_v58  ;;  %v846_v38 = vshrl.u32 %v3342_v53, 16  ;;  %v850_v17 = vrot.slane %v848_v63, 1  ;;  %v2281_v15 = vcombine.low %v3371_v48, %v3383_v5  ;;  %v2798_v53 = vld [vmem:[%s3488_s2 + $0x210] sm:$0xff]  }
  0x75   : > { %v985_v10 = vrot.slane %v983_v61, 1  ;;  %v2282_v14 = vcombine.low %v3381_v21, %v3385_v7  ;;  %v2295_v24 = vcombine.low %v3348_v32, %v837_v3  ;;  %v993_v16 = vor.u32 %v992_v11, %v988_v0  ;;  %v630_v61 = vld [vmem:[#allocation2 + $0x40] sm:$0xe] }
  0x76   : > { %1792 = vmatprep.mubr.bf16.mxu0 %v2319_v47  ;;  %v997_v27 = vshll.u32 %v2281_v15, 16  ;;  %v855_v13 = vshll.u32 %v3375_v49, 16  ;;  %v862_v2 = vshll.u32 %v3379_v4, 16  ;;  %v2305_v33 = vcombine.low %v906_v9, %v907_v12 }
  0x77   : > { %1793 = vmatmul.mubr.bf16.gmra.mrb[12].mxu0 %v2318_v20  ;;  %v986_v25 = vor.u32 %v985_v10, %v981_v60  ;;  %v1004_v28 = vshll.u32 %v2282_v14, 16  ;;  %v2271_v58 = vcombine.low %v627_v18, %v3358_v29  ;;  %v2272_v32 = vcombine.low %v628_v52, %v3360_v37  ;;  %v2801_v29 = vld [vmem:[%s3488_s2 + $0x218] sm:$0xff]   ;;  %v648_v52 = vld [vmem:[#allocation2 + $0x10] sm:$0xe] }
  0x78   : > { %1898 = vmatprep.mubr.bf16.mxu0 %v2296_v22  ;;  %v621_v22 = vld [vmem:[#allocation2 + $0x3c] sm:$0x1]  ;;  %v2306_v35 = vcombine.low %v3314_v42, %v3323_v59  ;;  %v844_v40 = vor.u32 %v843_v34, %v839_v57  ;;  %v851_v20 = vor.u32 %v850_v17, %v846_v38  ;;  %v995_v23 = vshrl.u32 %v2281_v15, 16  ;;  %v629_v60 = vld [vmem:[#allocation2 + $0x38] sm:$0xe]  ;;  %v2808_v15 = vld [vmem:[%s3488_s2 + $0x228] sm:$0xff]  }
  0x79   : > { %v2316_v47 = vcombine.low %v986_v25, %v993_v16  ;;  %v999_v39 = vrot.slane %v997_v27, 1  ;;  %v1002_v54 = vshrl.u32 %v2282_v14, 16  ;;  %v1006_v55 = vrot.slane %v1004_v28, 1  ;;  %v649_v14 = vld [vmem:[#allocation2 + $0x18] sm:$0xe] }
  0x7a   : > { %v908_v42 = vrot.slane %v2271_v58, 1  ;;  %v909_v59 = vrot.slane %v2272_v32, 1  ;;  %v853_v37 = vshrl.u32 %v3375_v49, 16  ;;  %v857_v63 = vrot.slane %v855_v13, 1  ;;  %v652_v49 = vld [vmem:[#allocation2 + $0x30] sm:$0xe] }
  0x7b   : > { %1964 = vmatmul.mubr.bf16.vlgmr.msra.gmra.mrb[16].mxu1 %v2297_v45  ;;  %v3412_v45 = vcombine.low %v3317_v44, %v621_v22  ;;  %v3415_v56 = vcombine.low %v3321_v51, %v622_v41  ;;  %v864_v57 = vrot.slane %v862_v2, 1  ;;  %v2304_v0 = vcombine.low %v844_v40, %v851_v20  ;;  %v2805_v44 = vld [vmem:[%s3488_s2 + $0x220] sm:$0xff]   ;;  %v653_v51 = vld [vmem:[#allocation2 + $0x38] sm:$0xe]  ;;  %v2814_v2 = vld [vmem:[%s3488_s2 + $0x230] sm:$0xff]  }
  0x7c   : > { %2657 = vmatpush3.bf16.msra.mxu1 %v3267_v6  ;;  %1971 = vmatprep.mubr.bf16.mxu1 %v2307_v19  ;;  %v1000_v1 = vor.u32 %v999_v39, %v995_v23  ;;  %v1007_v3 = vor.u32 %v1006_v55, %v1002_v54  ;;  %v2314_v19 = vcombine.low %v908_v42, %v909_v59  ;;  %v654_v25 = vld [vmem:[#allocation2 + $0x40] sm:$0xe]  ;;  %v651_v39 = vld [vmem:[#allocation2 + $0x28] sm:$0xe] }
  0x7d   : > { %2650 = vmatprep.subr.bf16.mxu1 %v2792_v8  ;;  %v2273_v9 = vcombine.low %v629_v60, %v621_v22  ;;  %v869_v34 = vshll.u32 %v3412_v45, 16  ;;  %v2315_v10 = vcombine.low %v3344_v30, %v3346_v31  ;;  %v858_v11 = vor.u32 %v857_v63, %v853_v37  ;;  %v650_v20 = vld [vmem:[#allocation2 + $0x20] sm:$0xe] }
  0x7e   : > { %v2325_v38 = vcombine.low %v1000_v1, %v1007_v3  ;;  %v2287_v17 = vcombine.low %v652_v49, %v3351_v36  ;;  %v2288_v18 = vcombine.low %v653_v51, %v3356_v43  ;;  %v867_v16 = vshrl.u32 %v3412_v45, 16  ;;  %v655_v43 = vld [vmem:[#allocation2 + $0x48] sm:$0xe] }
  0x7f   : > { %1899 = vmatmul.mubr.bf16.vlgmr.msra.gmra.mrb[16].mxu0 %v2295_v24  ;;  %v910_v30 = vrot.slane %v2273_v9, 1  ;;  %v871_v36 = vrot.slane %v869_v34, 1  ;;  %v874_v27 = vshrl.u32 %v3415_v56, 16  ;;  %v2284_v58 = vcombine.low %v649_v14, %v3299_v26 }
  0x80   : > { %2658 = vmatpush3.bf16.msra.mxu1 %v2792_v8  ;;  %2626 = vmatpush3.bf16.msra.mxu0 %v3267_v6  ;;  %v860_v6 = vshrl.u32 %v3379_v4, 16  ;;  %v2274_v4 = vcombine.low %v630_v61, %v622_v41  ;;  %v1037_v28 = vrot.slane %v2288_v18, 1  ;;  %v2289_v22 = vcombine.low %v654_v25, %v3383_v5 }
  0x81   : > { %2651 = vmatprep.subr.bf16.mxu1 %v2798_v53  ;;  %2627 = vmatprep.subr.bf16.mxu0 %v2792_v8  ;;  %v2324_v40 = vcombine.low %v3371_v48, %v3381_v21  ;;  %v872_v23 = vor.u32 %v871_v36, %v867_v16  ;;  %v1033_v5 = vrot.slane %v2284_v58, 1  ;;  %v2285_v48 = vcombine.low %v650_v20, %v3327_v62 }
  0x82   : > { %1906 = vmatprep.mubr.bf16.mxu0 %v2305_v33  ;;  %v865_v12 = vor.u32 %v864_v57, %v860_v6  ;;  %v911_v31 = vrot.slane %v2274_v4, 1  ;;  %v2283_v33 = vcombine.low %v648_v52, %v3297_v50  ;;  %v2817_v50 = vld [vmem:[%s3488_s2 + $0x238] sm:$0xff]   ;;  %v2286_v21 = vcombine.low %v651_v39, %v3329_v46 }
  0x83   : > { %1972 = vmatmul.mubr.bf16.gmra.mrb[20].mxu1 %v2306_v35  ;;  %v2290_v35 = vcombine.low %v655_v43, %v3385_v7  ;;  %v1038_v7 = vrot.slane %v2289_v22, 1  ;;  %v1034_v59 = vrot.slane %v2285_v48, 1 }
  0x84   : > { %2659 = vmatpush3.bf16.msra.mxu1 %v2798_v53  ;;  %1979 = vmatprep.mubr.bf16.mxu1 %v2316_v47  ;;  %v2313_v24 = vcombine.low %v858_v11, %v865_v12  ;;  %v2323_v32 = vcombine.low %v910_v30, %v911_v31  ;;  %v1032_v26 = vrot.slane %v2283_v33, 1  ;;  %v1035_v37 = vrot.slane %v2286_v21, 1 }
  0x85   : > { %2628 = vmatpush3.bf16.msra.mxu0 %v2792_v8  ;;  %2652 = vmatprep.subr.bf16.mxu1 %v2801_v29  ;;  %v876_v8 = vshll.u32 %v3415_v56, 16  ;;  %v1039_v54 = vrot.slane %v2290_v35, 1 }
  0x86   : > { %2629 = vmatprep.subr.bf16.mxu0 %v2798_v53  ;;  %v2308_v63 = vcombine.low %v1034_v59, %v1035_v37 }
  0x87   : > { %1907 = vmatmul.mubr.bf16.gmra.mrb[20].mxu0 %v2304_v0  ;;  %v878_v13 = vrot.slane %v876_v8, 1  ;;  %v2326_v42 = vcombine.low %v1038_v7, %v1039_v54 }
  0x88   : > { %2660 = vmatpush3.bf16.msra.mxu1 %v2801_v29  ;;  %1914 = vmatprep.mubr.bf16.mxu0 %v2314_v19 }
  0x89   : > { %2630 = vmatpush3.bf16.msra.mxu0 %v2798_v53  ;;  %2653 = vmatprep.subr.bf16.mxu1 %v2805_v44  ;;  %v1036_v53 = vrot.slane %v2287_v17, 1  ;;  %v879_v41 = vor.u32 %v878_v13, %v874_v27 }
  0x8a   : > { %2631 = vmatprep.subr.bf16.mxu0 %v2801_v29 }
  0x8b   : > { %1980 = vmatmul.mubr.bf16.gmra.mrb[24].mxu1 %v2315_v10  ;;  %v2317_v47 = vcombine.low %v1036_v53, %v1037_v28  ;;  %v2322_v55 = vcombine.low %v872_v23, %v879_v41 }
  0x8c   : > { %2661 = vmatpush3.bf16.msra.mxu1 %v2805_v44  ;;  %1987 = vmatprep.mubr.bf16.mxu1 %v2325_v38 }
  0x8d   : > { %2632 = vmatpush3.bf16.msra.mxu0 %v2801_v29  ;;  %2654 = vmatprep.subr.bf16.mxu1 %v2808_v15  ;;  %v2299_v29 = vcombine.low %v1032_v26, %v1033_v5 }
  0x8e   : > { %2633 = vmatprep.subr.bf16.mxu0 %v2805_v44 }
  0x8f   : > { %1915 = vmatmul.mubr.bf16.gmra.mrb[24].mxu0 %v2313_v24 }
  0x90   : > { %2662 = vmatpush3.bf16.msra.mxu1 %v2808_v15  ;;  %1922 = vmatprep.mubr.bf16.mxu0 %v2323_v32 }
  0x91   : > { %2634 = vmatpush3.bf16.msra.mxu0 %v2805_v44  ;;  %2655 = vmatprep.subr.bf16.mxu1 %v2814_v2 }
  0x92   : > { %2635 = vmatprep.subr.bf16.mxu0 %v2808_v15 }
  0x93   : > { %1988 = vmatmul.mubr.bf16.gmra.mrb[28].mxu1 %v2324_v40 }
  0x94   : > { %2663 = vmatpush3.bf16.msra.mxu1 %v2814_v2  ;;  %2645 = vmatprep.mubr.bf16.mxu1 %v2317_v47 }
  0x95   : > { %2636 = vmatpush3.bf16.msra.mxu0 %v2808_v15  ;;  %2656 = vmatprep.subr.bf16.mxu1 %v2817_v50 }
  0x96   : > { %2637 = vmatprep.subr.bf16.mxu0 %v2814_v2 }
  0x97   : > { %1923 = vmatmul.mubr.bf16.gmra.mrb[28].mxu0 %v2322_v55 }
  0x98   : > { %2664 = vmatpush3.bf16.msra.mxu1 %v2817_v50  ;;  %2641 = vmatprep.mubr.bf16.mxu0 %v2299_v29 }
  0x99   : > { %2638 = vmatpush3.bf16.msra.mxu0 %v2814_v2 }
  0x9a   : > { %2639 = vmatprep.subr.bf16.mxu0 %v2817_v50 }
  0x9b   : > { %2646 = vmatmul.mubr.bf16.vlgmr.msra.gmra.mrb[32].mxu1 %v2326_v42 }
  0x9d   : > { %2640 = vmatpush3.bf16.msra.mxu0 %v2817_v50 }
  0xa0   : > { %2642 = vmatmul.mubr.bf16.vlgmr.msra.gmra.mrb[32].mxu0 %v2308_v63 }
 0x11a   : > { %v2509_v62 = vpop.f32.mrb[0].mxu1 }
 0x11b   : > { %v2510_v46 = vpop.f32.mrb[1].mxu1 }
 0x11c   : > { %v2511_v45 = vadd.f32 %v2510_v46, %v2509_v62  ;;  %v2512_v56 = vpop.f32.mrb[2].mxu1 }
 0x11d   : > { %v2513_v6 = vpop.f32.mrb[3].mxu1 }
 0x11e   : > { %v2514_v57 = vadd.f32 %v2513_v6, %v2512_v56 }
 0x120   : > { %v2469_v60 = vpop.f32.mrb[0].mxu0 }
 0x121   : > { %v2470_v61 = vpop.f32.mrb[1].mxu0 }
 0x122   : > { %v2471_v0 = vadd.f32 %v2470_v61, %v2469_v60  ;;  %v2472_v1 = vpop.f32.mrb[2].mxu0 }
 0x123   : > { %v2473_v3 = vpop.f32.mrb[3].mxu0 }
 0x124   : > { %v1836_v44 = vadd.f32 %v2511_v45, %v2471_v0  ;;  %v2474_v49 = vadd.f32 %v2473_v3, %v2472_v1 }
 0x126   : > { %v1839_v51 = vadd.f32 %v2514_v57, %v2474_v49 }
 0x128   : > { %v2515_v19 = vpop.f32.mrb[4].mxu1 }
 0x129   : > { %v2516_v9 = vpop.f32.mrb[5].mxu1 }
 0x12a   : > { %v2517_v4 = vadd.f32 %v2516_v9, %v2515_v19  ;;  %v2518_v34 = vpop.f32.mrb[6].mxu1 }
 0x12b   : > { %v2519_v10 = vpop.f32.mrb[7].mxu1 }
 0x12c   : > { %v2475_v11 = vpop.f32.mrb[4].mxu0  ;;  %v2520_v12 = vadd.f32 %v2519_v10, %v2518_v34 }
 0x12d   : > { %v2476_v8 = vpop.f32.mrb[5].mxu0 }
 0x12e   : > { %v2477_v38 = vadd.f32 %v2476_v8, %v2475_v11  ;;  %v2478_v17 = vpop.f32.mrb[6].mxu0 }
 0x12f   : > { %v2479_v18 = vpop.f32.mrb[7].mxu0 }
 0x130   : > { %v1844_v15 = vadd.f32 %v2517_v4, %v2477_v38  ;;  %v2480_v30 = vadd.f32 %v2479_v18, %v2478_v17 }
 0x132   : > { %v1847_v31 = vadd.f32 %v2520_v12, %v2480_v30 }
 0x138   : > { %v2521_v52 = vpop.f32.mrb[8].mxu1 }
 0x139   : > { %v2522_v14 = vpop.f32.mrb[9].mxu1 }
 0x13a   : > { %v2523_v24 = vadd.f32 %v2522_v14, %v2521_v52  ;;  %v2524_v25 = vpop.f32.mrb[10].mxu1 }
 0x13b   : > { %v2525_v16 = vpop.f32.mrb[11].mxu1  ;;  %v2481_v36 = vpop.f32.mrb[8].mxu0 }
 0x13c   : > { %v2526_v43 = vadd.f32 %v2525_v16, %v2524_v25  ;;  %v2482_v27 = vpop.f32.mrb[9].mxu0 }
 0x13d   : > { %v2483_v13 = vadd.f32 %v2482_v27, %v2481_v36  ;;  %v2484_v53 = vpop.f32.mrb[10].mxu0 }
 0x13e   : > { %v2485_v28 = vpop.f32.mrb[11].mxu0 }
 0x13f   : > { %v1852_v2 = vadd.f32 %v2523_v24, %v2483_v13  ;;  %v2486_v33 = vadd.f32 %v2485_v28, %v2484_v53 }
 0x141   : > { %v3446_v58 = vadd.f32 %v2526_v43, %v2486_v33 }
 0x146   : > { %v2527_v32 = vpop.f32.mrb[12].mxu1 }
 0x147   : > { %v2528_v22 = vpop.f32.mrb[13].mxu1 }
 0x148   : > { %v2529_v35 = vadd.f32 %v2528_v22, %v2527_v32  ;;  %v2530_v40 = vpop.f32.mrb[14].mxu1 }
 0x149   : > { %v2531_v20 = vpop.f32.mrb[15].mxu1 }
 0x14a   : > { %v2532_v23 = vadd.f32 %v2531_v20, %v2530_v40  ;;  %v2487_v41 = vpop.f32.mrb[12].mxu0 }
 0x14b   : > { %v2488_v47 = vpop.f32.mrb[13].mxu0 }
 0x14c   : > { %v2489_v39 = vadd.f32 %v2488_v47, %v2487_v41  ;;  %v2490_v50 = vpop.f32.mrb[14].mxu0 }
 0x14d   : > { %v2491_v26 = vpop.f32.mrb[15].mxu0 }
 0x14e   : > { %v2589_v5 = vpop.f32.mrb[16].mxu1  ;;  %v3448_v7 = vadd.f32 %v2529_v35, %v2489_v39  ;;  %v2492_v54 = vadd.f32 %v2491_v26, %v2490_v50 }
 0x14f   : > { %v2590_v48 = vpop.f32.mrb[17].mxu1 }
 0x150   : > { %v2591_v21 = vadd.f32 %v2590_v48, %v2589_v5  ;;  %v2592_v55 = vpop.f32.mrb[18].mxu1  ;;  %v3450_v29 = vadd.f32 %v2532_v23, %v2492_v54 }
 0x151   : > { %v2593_v42 = vpop.f32.mrb[19].mxu1 }
 0x152   : > { %v2594_v59 = vadd.f32 %v2593_v42, %v2592_v55  ;;  %v2549_v37 = vpop.f32.mrb[16].mxu0 }
 0x153   : > { %v2550_v63 = vpop.f32.mrb[17].mxu0 }
 0x154   : > { %v2551_v62 = vadd.f32 %v2550_v63, %v2549_v37  ;;  %v2552_v46 = vpop.f32.mrb[18].mxu0 }
 0x155   : > { %v2553_v45 = vpop.f32.mrb[19].mxu0 }
 0x156   : > { %v2595_v56 = vpop.f32.mrb[20].mxu1  ;;  %v1901_v6 = vadd.f32 %v2551_v62, %v1836_v44  ;;  %v2554_v57 = vadd.f32 %v2553_v45, %v2552_v46 }
 0x157   : > { %v2596_v60 = vpop.f32.mrb[21].mxu1 }
 0x158   : > { %v2597_v61 = vadd.f32 %v2596_v60, %v2595_v56  ;;  %v2598_v0 = vpop.f32.mrb[22].mxu1  ;;  %v1904_v1 = vadd.f32 %v2554_v57, %v1839_v51  ;;  %v1966_v49 = vadd.f32 %v2591_v21, %v1901_v6 }
 0x159   : > { %v2599_v3 = vpop.f32.mrb[23].mxu1 }
 0x15a   : > { %v2600_v19 = vadd.f32 %v2599_v3, %v2598_v0  ;;  %v2555_v9 = vpop.f32.mrb[20].mxu0  ;;  %v3452_v4 = vadd.f32 %v2594_v59, %v1904_v1 }
 0x15b   : > { %v2556_v34 = vpop.f32.mrb[21].mxu0 }
 0x15c   : > { %v2557_v10 = vadd.f32 %v2556_v34, %v2555_v9  ;;  %v2558_v11 = vpop.f32.mrb[22].mxu0 }
 0x15d   : > { %v2559_v12 = vpop.f32.mrb[23].mxu0 }
 0x15e   : > { %v2601_v8 = vpop.f32.mrb[24].mxu1  ;;  %v1909_v38 = vadd.f32 %v2557_v10, %v1844_v15  ;;  %v2560_v17 = vadd.f32 %v2559_v12, %v2558_v11 }
 0x15f   : > { %v2602_v18 = vpop.f32.mrb[25].mxu1 }
 0x160   : > { %v2603_v44 = vadd.f32 %v2602_v18, %v2601_v8  ;;  %v2604_v30 = vpop.f32.mrb[26].mxu1  ;;  %v1912_v52 = vadd.f32 %v2560_v17, %v1847_v31  ;;  %v1974_v51 = vadd.f32 %v2597_v61, %v1909_v38 }
 0x161   : > { %v2605_v14 = vpop.f32.mrb[27].mxu1 }
 0x162   : > { %v2606_v24 = vadd.f32 %v2605_v14, %v2604_v30  ;;  %v2561_v25 = vpop.f32.mrb[24].mxu0  ;;  %v1977_v16 = vadd.f32 %v2600_v19, %v1912_v52 }
 0x163   : > { %v2562_v36 = vpop.f32.mrb[25].mxu0 }
 0x164   : > { %v2563_v43 = vadd.f32 %v2562_v36, %v2561_v25  ;;  %v2564_v27 = vpop.f32.mrb[26].mxu0 }
 0x165   : > { %v2565_v13 = vpop.f32.mrb[27].mxu0 }
 0x166   : > { %v2607_v53 = vpop.f32.mrb[28].mxu1  ;;  %v1917_v28 = vadd.f32 %v2563_v43, %v1852_v2  ;;  %v2566_v33 = vadd.f32 %v2565_v13, %v2564_v27 }
 0x167   : > { %v2608_v15 = vpop.f32.mrb[29].mxu1 }
 0x168   : > { %v2609_v32 = vadd.f32 %v2608_v15, %v2607_v53  ;;  %v2610_v22 = vpop.f32.mrb[30].mxu1  ;;  %v1920_v31 = vadd.f32 %v2566_v33, %v3446_v58  ;;  %v1982_v40 = vadd.f32 %v2603_v44, %v1917_v28 }
 0x169   : > { %v2611_v35 = vpop.f32.mrb[31].mxu1 }
 0x16a   : > { %v2612_v20 = vadd.f32 %v2611_v35, %v2610_v22  ;;  %v2567_v23 = vpop.f32.mrb[28].mxu0  ;;  %v1985_v41 = vadd.f32 %v2606_v24, %v1920_v31 }
 0x16b   : > { %v2568_v47 = vpop.f32.mrb[29].mxu0 }
 0x16c   : > { %v2569_v39 = vadd.f32 %v2568_v47, %v2567_v23  ;;  %v2570_v2 = vpop.f32.mrb[30].mxu0 }
 0x16d   : > { %v2571_v50 = vpop.f32.mrb[31].mxu0 }
 0x16e   : > { %v2647_v26 = vpop.f32.mrb[32].mxu1  ;;  %v1925_v5 = vadd.f32 %v2569_v39, %v3448_v7  ;;  %v2572_v54 = vadd.f32 %v2571_v50, %v2570_v2 }
 0x16f   : > { %v2046_v48 = vpop.f32.mrb[33].mxu1 }
 0x170   : > { %v2047_v21 = vadd.f32 %v2046_v48, %v1982_v40  ;;  %v2648_v58 = vpop.f32.mrb[34].mxu1  ;;  %v1928_v55 = vadd.f32 %v2572_v54, %v3450_v29  ;;  %v1990_v42 = vadd.f32 %v2609_v32, %v1925_v5 }
 0x171   : > { %v2049_v59 = vpop.f32.mrb[35].mxu1 }
 0x172   : > { %v2050_v37 = vadd.f32 %v2049_v59, %v1985_v41  ;;  %v2055_v63 = vadd.f32 %v2647_v26, %v1990_v42  ;;  %v1993_v62 = vadd.f32 %v2612_v20, %v1928_v55  ;;  %v2095_v18 = vmul.f32 %v2047_v21, %v2047_v21 }
 0x173   : > { %v2643_v46 = vpop.f32.mrb[32].mxu0 }
 0x174   : > { %v2440_v45 = vpack.c.bf16 %v2050_v37, %v2047_v21  ;;  %v2039_v56 = vadd.f32 %v2643_v46, %v1974_v51  ;;  %v2030_v7 = vpop.f32.mrb[33].mxu0  ;;  %v2058_v6 = vadd.f32 %v2648_v58, %v1993_v62  ;;  %v2096_v52 = vmul.f32 %v2050_v37, %v2050_v37 }
 0x175   : > { %v2031_v57 = vadd.f32 %v2030_v7, %v1966_v49  ;;  %v2644_v60 = vpop.f32.mrb[34].mxu0  ;;  %v2097_v51 = vmul.f32 %v2055_v63, %v2055_v63 }
 0x176   : > { %2451 = vst [vmem:[%s305_s27 + $0x10] sm:$0xff] %v2440_v45   ;;  %v2042_v61 = vadd.f32 %v2644_v60, %v1977_v16  ;;  %v2033_v0 = vpop.f32.mrb[35].mxu0  ;;  %v2445_v29 = vpack.c.bf16 %v2058_v6, %v2055_v63  ;;  %v2093_v11 = vmul.f32 %v2039_v56, %v2039_v56  ;;  %v2098_v16 = vmul.f32 %v2058_v6, %v2058_v6 }
 0x177   : > { %v2034_v1 = vadd.f32 %v2033_v0, %v3452_v4  ;;  %v2091_v19 = vmul.f32 %v2031_v57, %v2031_v57 }
 0x178   : > { %v2435_v3 = vpack.c.bf16 %v2042_v61, %v2039_v56  ;;  %2452 = vst [vmem:[%s305_s27 + $0x18] sm:$0xff] %v2445_v29   ;;  %v2094_v38 = vmul.f32 %v2042_v61, %v2042_v61 }
 0x179   : > { %v2430_v9 = vpack.c.bf16 %v2034_v1, %v2031_v57  ;;  %v2077_v34 = vadd.f32 %v2034_v1, %v2031_v57  ;;  %v2092_v10 = vmul.f32 %v2034_v1, %v2034_v1 }
 0x17a   : > { %2450 = vst [vmem:[%s305_s27 + $0x8] sm:$0xff] %v2435_v3  }
 0x17b   : > { %2431 = vst [vmem:[%s305_s27] sm:$0xff] %v2430_v9   ;;  %v2078_v12 = vadd.f32 %v2077_v34, %v2039_v56  ;;  %v2099_v8 = vadd.f32 %v2092_v10, %v2091_v19 }
 0x17d   : > { %v2079_v49 = vadd.f32 %v2078_v12, %v2042_v61  ;;  %v2100_v17 = vadd.f32 %v2099_v8, %v2093_v11 }
 0x17f   : > { %v2080_v44 = vadd.f32 %v2079_v49, %v2047_v21  ;;  %v2101_v30 = vadd.f32 %v2100_v17, %v2094_v38 }
 0x181   : > { %v2081_v14 = vadd.f32 %v2080_v44, %v2050_v37  ;;  %v2102_v4 = vadd.f32 %v2101_v30, %v2095_v18 }
 0x183   : > { %v2082_v24 = vadd.f32 %v2081_v14, %v2055_v63  ;;  %v2103_v25 = vadd.f32 %v2102_v4, %v2096_v52 }
 0x185   : > { %v2083_v36 = vadd.f32 %v2082_v24, %v2058_v6  ;;  %v2104_v43 = vadd.f32 %v2103_v25, %v2097_v51 }
 0x187   : > { %v2084_v27 = vrot.slane %v2083_v36, 4  ;;  %v2105_v13 = vadd.f32 %v2104_v43, %v2098_v16 }
 0x189   : > { %v2085_v53 = vadd.f32 %v2084_v27, %v2083_v36  ;;  %v2106_v28 = vrot.slane %v2105_v13, 4 }
 0x18b   : > { %v2086_v33 = vrot.slane %v2085_v53, 2  ;;  %v2107_v15 = vadd.f32 %v2106_v28, %v2105_v13 }
 0x18d   : > { %v2087_v32 = vadd.f32 %v2086_v33, %v2085_v53  ;;  %v2108_v22 = vrot.slane %v2107_v15, 2 }
 0x18f   : > { %v2088_v31 = vrot.slane %v2087_v32, 1  ;;  %v2109_v35 = vadd.f32 %v2108_v22, %v2107_v15 }
 0x191   : > { %v2089_v40 = vadd.f32 %v2088_v31, %v2087_v32  ;;  %v2110_v20 = vrot.slane %v2109_v35, 1 }
 0x193   : > { %2090 = vst [vmem:[%s308_s30] sm:$0x1] %v2089_v40  ;;  %v2111_v23 = vadd.f32 %v2110_v20, %v2109_v35 }
 0x195   : > { %2112 = vst [vmem:[%s311_s8] sm:$0x1] %v2111_v23 }
 0x196 PF: > { %p13_p9 = scmp.ge.s32.totalorder %s2894_s22, 4   ;;  %s3498_s18 = smov %s2840_s19 }
 0x197   : > { %s3499_s19 = smov %s2903_s25  ;;  %s3500_s20 = smov %s2894_s22 }
 0x198   :  { %15 = sbr.rel (!%p13_p9) target bundleno = 2 (0x2), region = 135 }

</bundles_post_ra>
